<compile_context>
chip_gen: v7x
topology: tpu7x:2x2x1
jax: 0.10.0
libtpu: 0.0.40
codegen_flags: <defaults>
</compile_context>

<pallas_src>
import functools

import jax
import jax.numpy as jnp
from jax.experimental import pallas as pl
from jax.experimental.pallas import tpu as pltpu


# ---------------------------------------------------------------------------
# Static layer geometry constants
# ---------------------------------------------------------------------------
C_PAD = 128                 # lane padding for channel dims (81 -> 128, 64 -> 128)
K1, S1, P1 = 10, 2, 5       # Conv1d(81, 81, 10, stride=2, padding=5)
KP1, SP1 = 10, 2            # MaxPool1d(10, 2)
K2, S2, P2 = 4, 2, 2        # Conv1d(81, 64, 4, stride=2, padding=2)
KP2, SP2 = 4, 2             # MaxPool1d(4, 2)
_ALIGN = 8                  # sublane alignment for the conv2-input scratch
_P1_BASE = _ALIGN - P2      # conceptual padded row 0 of conv2 input -> scratch row 6


# ---------------------------------------------------------------------------
# In-kernel math helpers (f32 elementwise; exp/reciprocal go to the EUP)
# ---------------------------------------------------------------------------
def _erf(x):
    # Abramowitz & Stegun 7.1.26 polynomial erf (|err| < ~1.5e-7) so we only
    # need exp + elementwise ops; reciprocal uses the EUP approx slot.
    p = 0.3275911
    a1, a2, a3, a4, a5 = (0.254829592, -0.284496736, 1.421413741,
                          -1.453152027, 1.061405429)
    ax = jnp.abs(x)
    t = pl.reciprocal(1.0 + p * ax, approx=True)
    poly = ((((a5 * t + a4) * t + a3) * t + a2) * t + a1) * t
    y = 1.0 - poly * jnp.exp(-ax * ax)
    return jnp.where(x >= 0, y, -y)


def _gelu(x):
    # nn.GELU() default (erf-based) formulation.
    return 0.5 * x * (1.0 + _erf(x * 0.7071067811865476))


# ---------------------------------------------------------------------------
# The fused kernel (one grid step == one batch element)
# ---------------------------------------------------------------------------
def _fused_kernel(x_ref, w1_ref, b1_ref, bn1s_ref, bn1h_ref,
                  w2_ref, b2_ref, bn2s_ref, bn2h_ref,
                  fc1w_ref, fc1b_ref, lng_ref, lnb_ref,
                  fc2w_ref, fc2b_ref,
                  o_ref,
                  h1_ref, p1_ref, h2_ref, p2_ref,
                  *, L1, L2, L3, L4):
    f32 = jnp.float32
    bf16 = jnp.bfloat16

    # ---- Conv1d(81, 81, K=10, stride=2, pad=5): tap-wise matmul accumulation.
    # x_ref is the already zero-padded (T+10, 128) time-major input.
    acc = jnp.zeros((L1, C_PAD), f32)
    for k in range(K1):
        lhs = x_ref[pl.ds(k, L1, stride=S1), :].astype(bf16)
        acc += jnp.dot(lhs, w1_ref[k], preferred_element_type=f32)
    h1_ref[...] = acc + b1_ref[...]

    # ---- MaxPool1d(10, 2) -> GELU -> Dropout(identity) -> BN1 (folded affine).
    m = h1_ref[pl.ds(0, L2, stride=SP1), :]
    for k in range(1, KP1):
        m = jnp.maximum(m, h1_ref[pl.ds(k, L2, stride=SP1), :])
    p1 = _gelu(m) * bn1s_ref[...] + bn1h_ref[...]

    # Stash with conv2's zero padding (2 rows each side); data starts at row 8
    # so the big store stays sublane-aligned.
    p1_ref[...] = jnp.zeros(p1_ref.shape, f32)
    p1_ref[pl.ds(_ALIGN, L2), :] = p1

    # ---- Conv1d(81, 64, K=4, stride=2, pad=2).
    acc2 = jnp.zeros((L3, C_PAD), f32)
    for k in range(K2):
        lhs = p1_ref[pl.ds(_P1_BASE + k, L3, stride=S2), :].astype(bf16)
        acc2 += jnp.dot(lhs, w2_ref[k], preferred_element_type=f32)
    h2_ref[...] = acc2 + b2_ref[...]

    # ---- MaxPool1d(4, 2) -> GELU -> Dropout(identity) -> BN2 (folded affine).
    m2 = h2_ref[pl.ds(0, L4, stride=SP2), :]
    for k in range(1, KP2):
        m2 = jnp.maximum(m2, h2_ref[pl.ds(k, L4, stride=SP2), :])
    p2_ref[...] = _gelu(m2) * bn2s_ref[...] + bn2h_ref[...]

    # ---- transpose(1,2) + Flatten + Linear(1088, H): accumulate over the L4
    # time rows (fc1 weight pre-reshaped to (L4, 128, H), zero rows for the
    # channel padding), so no in-kernel flatten/reshape is needed.
    acc3 = jnp.zeros((1, fc1w_ref.shape[-1]), f32)
    for t in range(L4):
        lhs = p2_ref[pl.ds(t, 1), :].astype(bf16)
        acc3 += jnp.dot(lhs, fc1w_ref[t], preferred_element_type=f32)
    h = acc3 + fc1b_ref[...]

    # ---- LayerNorm(H) + Sigmoid (f32).
    mu = jnp.mean(h, axis=-1, keepdims=True)
    d = h - mu
    var = jnp.mean(d * d, axis=-1, keepdims=True)
    hn = d * jax.lax.rsqrt(var + 1e-5) * lng_ref[...] + lnb_ref[...]
    s = 1.0 / (1.0 + jnp.exp(-hn))

    # ---- Linear(H, 3): output lanes padded 3 -> 128 (lane-dense store),
    # sliced back to 3 outside the kernel.
    o_ref[...] = (jnp.dot(s, fc2w_ref[...], preferred_element_type=f32)
                  + fc2b_ref[...])


# ---------------------------------------------------------------------------
# Wrapper: layout glue + weight prep + the single pallas_call
# ---------------------------------------------------------------------------
def wwd_forward(x, params):
    B = x.shape[0]
    T = x.shape[-1]
    C1, C2 = 81, 64
    H = params["fc1_b"].shape[0]
    f32, bf16 = jnp.float32, jnp.bfloat16

    # PyTorch floor semantics (ceil_mode=False).
    L1 = (T + 2 * P1 - K1) // S1 + 1
    L2 = (L1 - KP1) // SP1 + 1
    L3 = (L2 + 2 * P2 - K2) // S2 + 1
    L4 = (L3 - KP2) // SP2 + 1
    assert L4 * C2 == params["fc1_w"].shape[0], "flatten size mismatch with fc1"

    # ---- layout glue (pure data movement): NCHW-ish -> time-major,
    # channels lane-padded to 128, conv1 zero-padding applied once up front.
    xcl = jnp.transpose(jnp.squeeze(x, axis=1), (0, 2, 1))          # (B, T, 81)
    Tp = T + 2 * P1
    xcl = jnp.pad(xcl, ((0, 0), (P1, P1), (0, C_PAD - C1)))         # (B, Tp, 128)

    def pad_vec(v, n=C_PAD):
        return jnp.pad(v, (0, n - v.shape[0])).reshape(1, n).astype(f32)

    # Conv weights: (C_out, C_in, K) -> per-tap (K, C_in_pad, C_out_pad), bf16.
    w1 = jnp.transpose(params["conv1_w"], (2, 1, 0))
    w1 = jnp.pad(w1, ((0, 0), (0, C_PAD - C1), (0, C_PAD - C1))).astype(bf16)
    w2 = jnp.transpose(params["conv2_w"], (2, 1, 0))
    w2 = jnp.pad(w2, ((0, 0), (0, C_PAD - C1), (0, C_PAD - C2))).astype(bf16)

    # fc1 weight (1088, H) -> (L4, 128, H) with zero rows for channel padding.
    fc1w = params["fc1_w"].reshape(L4, C2, H)
    fc1w = jnp.pad(fc1w, ((0, 0), (0, C_PAD - C2), (0, 0))).astype(bf16)

    # fc2 weight (H, 3) -> (H, 128) lane-padded; bias -> (1, 128).
    fc2w = jnp.pad(params["fc2_w"], ((0, 0), (0, C_PAD - 3))).astype(f32)

    args = (
        xcl,
        w1, pad_vec(params["conv1_b"]),
        pad_vec(params["bn1_scale"]), pad_vec(params["bn1_shift"]),
        w2, pad_vec(params["conv2_b"]),
        pad_vec(params["bn2_scale"]), pad_vec(params["bn2_shift"]),
        fc1w, params["fc1_b"].reshape(1, H).astype(f32),
        params["ln_g"].reshape(1, H).astype(f32),
        params["ln_b"].reshape(1, H).astype(f32),
        fc2w, pad_vec(params["fc2_b"]),
    )

    in_specs = [
        pl.BlockSpec((None, Tp, C_PAD), lambda b: (b, 0, 0)),    # padded input
        pl.BlockSpec((K1, C_PAD, C_PAD), lambda b: (0, 0, 0)),   # conv1 taps
        pl.BlockSpec((1, C_PAD), lambda b: (0, 0)),              # conv1 bias
        pl.BlockSpec((1, C_PAD), lambda b: (0, 0)),              # bn1 scale
        pl.BlockSpec((1, C_PAD), lambda b: (0, 0)),              # bn1 shift
        pl.BlockSpec((K2, C_PAD, C_PAD), lambda b: (0, 0, 0)),   # conv2 taps
        pl.BlockSpec((1, C_PAD), lambda b: (0, 0)),              # conv2 bias
        pl.BlockSpec((1, C_PAD), lambda b: (0, 0)),              # bn2 scale
        pl.BlockSpec((1, C_PAD), lambda b: (0, 0)),              # bn2 shift
        pl.BlockSpec((L4, C_PAD, H), lambda b: (0, 0, 0)),       # fc1 weight
        pl.BlockSpec((1, H), lambda b: (0, 0)),                  # fc1 bias
        pl.BlockSpec((1, H), lambda b: (0, 0)),                  # ln gamma
        pl.BlockSpec((1, H), lambda b: (0, 0)),                  # ln beta
        pl.BlockSpec((H, C_PAD), lambda b: (0, 0)),              # fc2 weight
        pl.BlockSpec((1, C_PAD), lambda b: (0, 0)),              # fc2 bias
    ]

    kernel = functools.partial(_fused_kernel, L1=L1, L2=L2, L3=L3, L4=L4)

    out = pl.pallas_call(
        kernel,
        grid=(B,),
        in_specs=in_specs,
        out_specs=pl.BlockSpec((None, 1, C_PAD), lambda b: (b, 0, 0)),
        out_shape=jax.ShapeDtypeStruct((B, 1, C_PAD), f32),
        scratch_shapes=[
            pltpu.VMEM((L1, C_PAD), f32),                        # conv1 output
            pltpu.VMEM((_P1_BASE + L2 + 2 * P2, C_PAD), f32),    # padded conv2 input
            pltpu.VMEM((L3, C_PAD), f32),                        # conv2 output
            pltpu.VMEM((L4, C_PAD), f32),                        # block-2 output
        ],
        compiler_params=pltpu.CompilerParams(
            dimension_semantics=("parallel",)),                  # megacore on v7x
    )(*args)

    # Slice lane padding off only at the very end.
    return out[:, 0, :3]


# ---------------------------------------------------------------------------
# Deterministic parameter initialization (shapes from WWDModel.__init__)
# ---------------------------------------------------------------------------
def init_params(key, hidden_size=256):
    ks = jax.random.split(key, 20)
    eps = 1e-5

    def n(k, shape, scale=0.05):
        return scale * jax.random.normal(k, shape, dtype=jnp.float32)

    def bn_fold(kg, kb, km, kv, c):
        gamma = 1.0 + n(kg, (c,))
        beta = n(kb, (c,))
        mean = n(km, (c,))
        var = 1.0 + jnp.abs(n(kv, (c,)))
        scale = gamma / jnp.sqrt(var + eps)
        shift = beta - mean * scale
        return scale, shift

    bn1_scale, bn1_shift = bn_fold(ks[2], ks[3], ks[4], ks[5], 81)
    bn2_scale, bn2_shift = bn_fold(ks[8], ks[9], ks[10], ks[11], 64)

    return {
        "conv1_w": n(ks[0], (81, 81, 10)),      # (C_out, C_in, K)
        "conv1_b": n(ks[1], (81,)),
        "bn1_scale": bn1_scale, "bn1_shift": bn1_shift,
        "conv2_w": n(ks[6], (64, 81, 4)),
        "conv2_b": n(ks[7], (64,)),
        "bn2_scale": bn2_scale, "bn2_shift": bn2_shift,
        "fc1_w": n(ks[12], (1088, hidden_size)),   # stored (in, out)
        "fc1_b": n(ks[13], (hidden_size,)),
        "ln_g": 1.0 + n(ks[14], (hidden_size,)),
        "ln_b": n(ks[15], (hidden_size,)),
        "fc2_w": n(ks[16], (hidden_size, 3)),      # stored (in, out)
        "fc2_b": n(ks[17], (3,)),
    }


if __name__ == "__main__":
    key = jax.random.PRNGKey(0)
    pkey, xkey = jax.random.split(key)
    params = init_params(pkey, hidden_size=256)

    # T = 296 so the flattened conv trunk is exactly 17 * 64 = 1088, the size
    # nn.Linear(1088, hidden) requires.
    x = jax.random.normal(xkey, (2, 1, 81, 296), dtype=jnp.float32)

    fwd = jax.jit(functools.partial(wwd_forward, params=params))
    out = jax.block_until_ready(fwd(x))
    assert out.shape == (2, 3) and out.dtype == jnp.float32
    print("KERNEL_OK")
</pallas_src>

<mosaic_0001>
module attributes {stable_mosaic.version = 11 : i64} {
  func.func @_fused_kernel(%arg0: i32, %arg1: memref<1x306x128xf32, #tpu.memory_space<vmem>>, %arg2: memref<10x128x128xbf16, #tpu.memory_space<vmem>>, %arg3: memref<1x128xf32, #tpu.memory_space<vmem>>, %arg4: memref<1x128xf32, #tpu.memory_space<vmem>>, %arg5: memref<1x128xf32, #tpu.memory_space<vmem>>, %arg6: memref<4x128x128xbf16, #tpu.memory_space<vmem>>, %arg7: memref<1x128xf32, #tpu.memory_space<vmem>>, %arg8: memref<1x128xf32, #tpu.memory_space<vmem>>, %arg9: memref<1x128xf32, #tpu.memory_space<vmem>>, %arg10: memref<17x128x256xbf16, #tpu.memory_space<vmem>>, %arg11: memref<1x256xf32, #tpu.memory_space<vmem>>, %arg12: memref<1x256xf32, #tpu.memory_space<vmem>>, %arg13: memref<1x256xf32, #tpu.memory_space<vmem>>, %arg14: memref<256x128xf32, #tpu.memory_space<vmem>>, %arg15: memref<1x128xf32, #tpu.memory_space<vmem>>, %arg16: memref<1x1x128xf32, #tpu.memory_space<vmem>>, %arg17: memref<149x128xf32, #tpu.memory_space<vmem>>, %arg18: memref<80x128xf32, #tpu.memory_space<vmem>>, %arg19: memref<36x128xf32, #tpu.memory_space<vmem>>, %arg20: memref<17x128xf32, #tpu.memory_space<vmem>>) attributes {dimension_semantics = [#tpu.dimension_semantics<parallel>], iteration_bounds = array<i64: 2>, scalar_prefetch = 0 : i64, scratch_operands = 4 : i64, tpu.core_type = #tpu.core_type<tc>, window_params = [{transform_indices = @transform_0, window_bounds = array<i64: 1, 306, 128>}, {pipeline_mode = #tpu.pipeline_mode<synchronous>, transform_indices = @transform_1, window_bounds = array<i64: 10, 128, 128>}, {pipeline_mode = #tpu.pipeline_mode<synchronous>, transform_indices = @transform_2, window_bounds = array<i64: 1, 128>}, {pipeline_mode = #tpu.pipeline_mode<synchronous>, transform_indices = @transform_3, window_bounds = array<i64: 1, 128>}, {pipeline_mode = #tpu.pipeline_mode<synchronous>, transform_indices = @transform_4, window_bounds = array<i64: 1, 128>}, {pipeline_mode = #tpu.pipeline_mode<synchronous>, transform_indices = @transform_5, window_bounds = array<i64: 4, 128, 128>}, {pipeline_mode = #tpu.pipeline_mode<synchronous>, transform_indices = @transform_6, window_bounds = array<i64: 1, 128>}, {pipeline_mode = #tpu.pipeline_mode<synchronous>, transform_indices = @transform_7, window_bounds = array<i64: 1, 128>}, {pipeline_mode = #tpu.pipeline_mode<synchronous>, transform_indices = @transform_8, window_bounds = array<i64: 1, 128>}, {pipeline_mode = #tpu.pipeline_mode<synchronous>, transform_indices = @transform_9, window_bounds = array<i64: 17, 128, 256>}, {pipeline_mode = #tpu.pipeline_mode<synchronous>, transform_indices = @transform_10, window_bounds = array<i64: 1, 256>}, {pipeline_mode = #tpu.pipeline_mode<synchronous>, transform_indices = @transform_11, window_bounds = array<i64: 1, 256>}, {pipeline_mode = #tpu.pipeline_mode<synchronous>, transform_indices = @transform_12, window_bounds = array<i64: 1, 256>}, {pipeline_mode = #tpu.pipeline_mode<synchronous>, transform_indices = @transform_13, window_bounds = array<i64: 256, 128>}, {pipeline_mode = #tpu.pipeline_mode<synchronous>, transform_indices = @transform_14, window_bounds = array<i64: 1, 128>}, {transform_indices = @transform_15, window_bounds = array<i64: 1, 1, 128>}]} {
    %cst = arith.constant 0.000000e+00 : f32
    %0 = vector.broadcast %cst : f32 to vector<149x128xf32>
    %c0 = arith.constant 0 : index
    %c0_0 = arith.constant 0 : index
    %c0_1 = arith.constant 0 : index
    %1 = tpu.strided_load %arg1[%c0, %c0_0, %c0_1] {strides = array<i32: 1, 2, 1>} : memref<1x306x128xf32, #tpu.memory_space<vmem>>, vector<1x149x128xf32>
    %2 = vector.shape_cast %1 : vector<1x149x128xf32> to vector<149x128xf32>
    %3 = arith.truncf %2 : vector<149x128xf32> to vector<149x128xbf16>
    %c0_2 = arith.constant 0 : index
    %c0_3 = arith.constant 0 : index
    %c0_4 = arith.constant 0 : index
    %4 = vector.load %arg2[%c0_2, %c0_3, %c0_4] : memref<10x128x128xbf16, #tpu.memory_space<vmem>>, vector<1x128x128xbf16>
    %5 = vector.shape_cast %4 : vector<1x128x128xbf16> to vector<128x128xbf16>
    %cst_5 = arith.constant dense<0.000000e+00> : vector<149x128xf32>
    %6 = tpu.matmul %3, %5, %cst_5 {dimension_numbers = #tpu.dot_dimension_numbers<[1], [0], [0], [1], [0, 0, 1, 1], [], []>} : vector<149x128xbf16>, vector<128x128xbf16>, vector<149x128xf32> -> vector<149x128xf32>
    %7 = arith.addf %0, %6 : vector<149x128xf32>
    %c0_6 = arith.constant 0 : index
    %c1 = arith.constant 1 : index
    %c0_7 = arith.constant 0 : index
    %8 = tpu.strided_load %arg1[%c0_6, %c1, %c0_7] {strides = array<i32: 1, 2, 1>} : memref<1x306x128xf32, #tpu.memory_space<vmem>>, vector<1x149x128xf32>
    %9 = vector.shape_cast %8 : vector<1x149x128xf32> to vector<149x128xf32>
    %10 = arith.truncf %9 : vector<149x128xf32> to vector<149x128xbf16>
    %c1_8 = arith.constant 1 : index
    %c0_9 = arith.constant 0 : index
    %c0_10 = arith.constant 0 : index
    %11 = vector.load %arg2[%c1_8, %c0_9, %c0_10] : memref<10x128x128xbf16, #tpu.memory_space<vmem>>, vector<1x128x128xbf16>
    %12 = vector.shape_cast %11 : vector<1x128x128xbf16> to vector<128x128xbf16>
    %cst_11 = arith.constant dense<0.000000e+00> : vector<149x128xf32>
    %13 = tpu.matmul %10, %12, %cst_11 {dimension_numbers = #tpu.dot_dimension_numbers<[1], [0], [0], [1], [0, 0, 1, 1], [], []>} : vector<149x128xbf16>, vector<128x128xbf16>, vector<149x128xf32> -> vector<149x128xf32>
    %14 = arith.addf %7, %13 : vector<149x128xf32>
    %c0_12 = arith.constant 0 : index
    %c2 = arith.constant 2 : index
    %c0_13 = arith.constant 0 : index
    %15 = tpu.strided_load %arg1[%c0_12, %c2, %c0_13] {strides = array<i32: 1, 2, 1>} : memref<1x306x128xf32, #tpu.memory_space<vmem>>, vector<1x149x128xf32>
    %16 = vector.shape_cast %15 : vector<1x149x128xf32> to vector<149x128xf32>
    %17 = arith.truncf %16 : vector<149x128xf32> to vector<149x128xbf16>
    %c2_14 = arith.constant 2 : index
    %c0_15 = arith.constant 0 : index
    %c0_16 = arith.constant 0 : index
    %18 = vector.load %arg2[%c2_14, %c0_15, %c0_16] : memref<10x128x128xbf16, #tpu.memory_space<vmem>>, vector<1x128x128xbf16>
    %19 = vector.shape_cast %18 : vector<1x128x128xbf16> to vector<128x128xbf16>
    %cst_17 = arith.constant dense<0.000000e+00> : vector<149x128xf32>
    %20 = tpu.matmul %17, %19, %cst_17 {dimension_numbers = #tpu.dot_dimension_numbers<[1], [0], [0], [1], [0, 0, 1, 1], [], []>} : vector<149x128xbf16>, vector<128x128xbf16>, vector<149x128xf32> -> vector<149x128xf32>
    %21 = arith.addf %14, %20 : vector<149x128xf32>
    %c0_18 = arith.constant 0 : index
    %c3 = arith.constant 3 : index
    %c0_19 = arith.constant 0 : index
    %22 = tpu.strided_load %arg1[%c0_18, %c3, %c0_19] {strides = array<i32: 1, 2, 1>} : memref<1x306x128xf32, #tpu.memory_space<vmem>>, vector<1x149x128xf32>
    %23 = vector.shape_cast %22 : vector<1x149x128xf32> to vector<149x128xf32>
    %24 = arith.truncf %23 : vector<149x128xf32> to vector<149x128xbf16>
    %c3_20 = arith.constant 3 : index
    %c0_21 = arith.constant 0 : index
    %c0_22 = arith.constant 0 : index
    %25 = vector.load %arg2[%c3_20, %c0_21, %c0_22] : memref<10x128x128xbf16, #tpu.memory_space<vmem>>, vector<1x128x128xbf16>
    %26 = vector.shape_cast %25 : vector<1x128x128xbf16> to vector<128x128xbf16>
    %cst_23 = arith.constant dense<0.000000e+00> : vector<149x128xf32>
    %27 = tpu.matmul %24, %26, %cst_23 {dimension_numbers = #tpu.dot_dimension_numbers<[1], [0], [0], [1], [0, 0, 1, 1], [], []>} : vector<149x128xbf16>, vector<128x128xbf16>, vector<149x128xf32> -> vector<149x128xf32>
    %28 = arith.addf %21, %27 : vector<149x128xf32>
    %c0_24 = arith.constant 0 : index
    %c4 = arith.constant 4 : index
    %c0_25 = arith.constant 0 : index
    %29 = tpu.strided_load %arg1[%c0_24, %c4, %c0_25] {strides = array<i32: 1, 2, 1>} : memref<1x306x128xf32, #tpu.memory_space<vmem>>, vector<1x149x128xf32>
    %30 = vector.shape_cast %29 : vector<1x149x128xf32> to vector<149x128xf32>
    %31 = arith.truncf %30 : vector<149x128xf32> to vector<149x128xbf16>
    %c4_26 = arith.constant 4 : index
    %c0_27 = arith.constant 0 : index
    %c0_28 = arith.constant 0 : index
    %32 = vector.load %arg2[%c4_26, %c0_27, %c0_28] : memref<10x128x128xbf16, #tpu.memory_space<vmem>>, vector<1x128x128xbf16>
    %33 = vector.shape_cast %32 : vector<1x128x128xbf16> to vector<128x128xbf16>
    %cst_29 = arith.constant dense<0.000000e+00> : vector<149x128xf32>
    %34 = tpu.matmul %31, %33, %cst_29 {dimension_numbers = #tpu.dot_dimension_numbers<[1], [0], [0], [1], [0, 0, 1, 1], [], []>} : vector<149x128xbf16>, vector<128x128xbf16>, vector<149x128xf32> -> vector<149x128xf32>
    %35 = arith.addf %28, %34 : vector<149x128xf32>
    %c0_30 = arith.constant 0 : index
    %c5 = arith.constant 5 : index
    %c0_31 = arith.constant 0 : index
    %36 = tpu.strided_load %arg1[%c0_30, %c5, %c0_31] {strides = array<i32: 1, 2, 1>} : memref<1x306x128xf32, #tpu.memory_space<vmem>>, vector<1x149x128xf32>
    %37 = vector.shape_cast %36 : vector<1x149x128xf32> to vector<149x128xf32>
    %38 = arith.truncf %37 : vector<149x128xf32> to vector<149x128xbf16>
    %c5_32 = arith.constant 5 : index
    %c0_33 = arith.constant 0 : index
    %c0_34 = arith.constant 0 : index
    %39 = vector.load %arg2[%c5_32, %c0_33, %c0_34] : memref<10x128x128xbf16, #tpu.memory_space<vmem>>, vector<1x128x128xbf16>
    %40 = vector.shape_cast %39 : vector<1x128x128xbf16> to vector<128x128xbf16>
    %cst_35 = arith.constant dense<0.000000e+00> : vector<149x128xf32>
    %41 = tpu.matmul %38, %40, %cst_35 {dimension_numbers = #tpu.dot_dimension_numbers<[1], [0], [0], [1], [0, 0, 1, 1], [], []>} : vector<149x128xbf16>, vector<128x128xbf16>, vector<149x128xf32> -> vector<149x128xf32>
    %42 = arith.addf %35, %41 : vector<149x128xf32>
    %c0_36 = arith.constant 0 : index
    %c6 = arith.constant 6 : index
    %c0_37 = arith.constant 0 : index
    %43 = tpu.strided_load %arg1[%c0_36, %c6, %c0_37] {strides = array<i32: 1, 2, 1>} : memref<1x306x128xf32, #tpu.memory_space<vmem>>, vector<1x149x128xf32>
    %44 = vector.shape_cast %43 : vector<1x149x128xf32> to vector<149x128xf32>
    %45 = arith.truncf %44 : vector<149x128xf32> to vector<149x128xbf16>
    %c6_38 = arith.constant 6 : index
    %c0_39 = arith.constant 0 : index
    %c0_40 = arith.constant 0 : index
    %46 = vector.load %arg2[%c6_38, %c0_39, %c0_40] : memref<10x128x128xbf16, #tpu.memory_space<vmem>>, vector<1x128x128xbf16>
    %47 = vector.shape_cast %46 : vector<1x128x128xbf16> to vector<128x128xbf16>
    %cst_41 = arith.constant dense<0.000000e+00> : vector<149x128xf32>
    %48 = tpu.matmul %45, %47, %cst_41 {dimension_numbers = #tpu.dot_dimension_numbers<[1], [0], [0], [1], [0, 0, 1, 1], [], []>} : vector<149x128xbf16>, vector<128x128xbf16>, vector<149x128xf32> -> vector<149x128xf32>
    %49 = arith.addf %42, %48 : vector<149x128xf32>
    %c0_42 = arith.constant 0 : index
    %c7 = arith.constant 7 : index
    %c0_43 = arith.constant 0 : index
    %50 = tpu.strided_load %arg1[%c0_42, %c7, %c0_43] {strides = array<i32: 1, 2, 1>} : memref<1x306x128xf32, #tpu.memory_space<vmem>>, vector<1x149x128xf32>
    %51 = vector.shape_cast %50 : vector<1x149x128xf32> to vector<149x128xf32>
    %52 = arith.truncf %51 : vector<149x128xf32> to vector<149x128xbf16>
    %c7_44 = arith.constant 7 : index
    %c0_45 = arith.constant 0 : index
    %c0_46 = arith.constant 0 : index
    %53 = vector.load %arg2[%c7_44, %c0_45, %c0_46] : memref<10x128x128xbf16, #tpu.memory_space<vmem>>, vector<1x128x128xbf16>
    %54 = vector.shape_cast %53 : vector<1x128x128xbf16> to vector<128x128xbf16>
    %cst_47 = arith.constant dense<0.000000e+00> : vector<149x128xf32>
    %55 = tpu.matmul %52, %54, %cst_47 {dimension_numbers = #tpu.dot_dimension_numbers<[1], [0], [0], [1], [0, 0, 1, 1], [], []>} : vector<149x128xbf16>, vector<128x128xbf16>, vector<149x128xf32> -> vector<149x128xf32>
    %56 = arith.addf %49, %55 : vector<149x128xf32>
    %c0_48 = arith.constant 0 : index
    %c8 = arith.constant 8 : index
    %c0_49 = arith.constant 0 : index
    %57 = tpu.strided_load %arg1[%c0_48, %c8, %c0_49] {strides = array<i32: 1, 2, 1>} : memref<1x306x128xf32, #tpu.memory_space<vmem>>, vector<1x149x128xf32>
    %58 = vector.shape_cast %57 : vector<1x149x128xf32> to vector<149x128xf32>
    %59 = arith.truncf %58 : vector<149x128xf32> to vector<149x128xbf16>
    %c8_50 = arith.constant 8 : index
    %c0_51 = arith.constant 0 : index
    %c0_52 = arith.constant 0 : index
    %60 = vector.load %arg2[%c8_50, %c0_51, %c0_52] : memref<10x128x128xbf16, #tpu.memory_space<vmem>>, vector<1x128x128xbf16>
    %61 = vector.shape_cast %60 : vector<1x128x128xbf16> to vector<128x128xbf16>
    %cst_53 = arith.constant dense<0.000000e+00> : vector<149x128xf32>
    %62 = tpu.matmul %59, %61, %cst_53 {dimension_numbers = #tpu.dot_dimension_numbers<[1], [0], [0], [1], [0, 0, 1, 1], [], []>} : vector<149x128xbf16>, vector<128x128xbf16>, vector<149x128xf32> -> vector<149x128xf32>
    %63 = arith.addf %56, %62 : vector<149x128xf32>
    %c0_54 = arith.constant 0 : index
    %c9 = arith.constant 9 : index
    %c0_55 = arith.constant 0 : index
    %64 = tpu.strided_load %arg1[%c0_54, %c9, %c0_55] {strides = array<i32: 1, 2, 1>} : memref<1x306x128xf32, #tpu.memory_space<vmem>>, vector<1x149x128xf32>
    %65 = vector.shape_cast %64 : vector<1x149x128xf32> to vector<149x128xf32>
    %66 = arith.truncf %65 : vector<149x128xf32> to vector<149x128xbf16>
    %c9_56 = arith.constant 9 : index
    %c0_57 = arith.constant 0 : index
    %c0_58 = arith.constant 0 : index
    %67 = vector.load %arg2[%c9_56, %c0_57, %c0_58] : memref<10x128x128xbf16, #tpu.memory_space<vmem>>, vector<1x128x128xbf16>
    %68 = vector.shape_cast %67 : vector<1x128x128xbf16> to vector<128x128xbf16>
    %cst_59 = arith.constant dense<0.000000e+00> : vector<149x128xf32>
    %69 = tpu.matmul %66, %68, %cst_59 {dimension_numbers = #tpu.dot_dimension_numbers<[1], [0], [0], [1], [0, 0, 1, 1], [], []>} : vector<149x128xbf16>, vector<128x128xbf16>, vector<149x128xf32> -> vector<149x128xf32>
    %70 = arith.addf %63, %69 : vector<149x128xf32>
    %c0_60 = arith.constant 0 : index
    %c0_61 = arith.constant 0 : index
    %71 = vector.load %arg3[%c0_60, %c0_61] : memref<1x128xf32, #tpu.memory_space<vmem>>, vector<1x128xf32>
    %72 = vector.broadcast %71 : vector<1x128xf32> to vector<149x128xf32>
    %73 = arith.addf %70, %72 : vector<149x128xf32>
    %c0_62 = arith.constant 0 : index
    %c0_63 = arith.constant 0 : index
    %74 = vector.load %arg17[%c0_62, %c0_63] : memref<149x128xf32, #tpu.memory_space<vmem>>, vector<149x128xf32>
    tpu.vector_store %arg17[%c0_62, %c0_63], %73 {strides = array<i32>} : memref<149x128xf32, #tpu.memory_space<vmem>>, vector<149x128xf32>,
    %c0_64 = arith.constant 0 : index
    %c0_65 = arith.constant 0 : index
    %75 = tpu.strided_load %arg17[%c0_64, %c0_65] {strides = array<i32: 2, 1>} : memref<149x128xf32, #tpu.memory_space<vmem>>, vector<70x128xf32>
    %c1_66 = arith.constant 1 : index
    %c0_67 = arith.constant 0 : index
    %76 = tpu.strided_load %arg17[%c1_66, %c0_67] {strides = array<i32: 2, 1>} : memref<149x128xf32, #tpu.memory_space<vmem>>, vector<70x128xf32>
    %77 = arith.maximumf %75, %76 : vector<70x128xf32>
    %c2_68 = arith.constant 2 : index
    %c0_69 = arith.constant 0 : index
    %78 = tpu.strided_load %arg17[%c2_68, %c0_69] {strides = array<i32: 2, 1>} : memref<149x128xf32, #tpu.memory_space<vmem>>, vector<70x128xf32>
    %79 = arith.maximumf %77, %78 : vector<70x128xf32>
    %c3_70 = arith.constant 3 : index
    %c0_71 = arith.constant 0 : index
    %80 = tpu.strided_load %arg17[%c3_70, %c0_71] {strides = array<i32: 2, 1>} : memref<149x128xf32, #tpu.memory_space<vmem>>, vector<70x128xf32>
    %81 = arith.maximumf %79, %80 : vector<70x128xf32>
    %c4_72 = arith.constant 4 : index
    %c0_73 = arith.constant 0 : index
    %82 = tpu.strided_load %arg17[%c4_72, %c0_73] {strides = array<i32: 2, 1>} : memref<149x128xf32, #tpu.memory_space<vmem>>, vector<70x128xf32>
    %83 = arith.maximumf %81, %82 : vector<70x128xf32>
    %c5_74 = arith.constant 5 : index
    %c0_75 = arith.constant 0 : index
    %84 = tpu.strided_load %arg17[%c5_74, %c0_75] {strides = array<i32: 2, 1>} : memref<149x128xf32, #tpu.memory_space<vmem>>, vector<70x128xf32>
    %85 = arith.maximumf %83, %84 : vector<70x128xf32>
    %c6_76 = arith.constant 6 : index
    %c0_77 = arith.constant 0 : index
    %86 = tpu.strided_load %arg17[%c6_76, %c0_77] {strides = array<i32: 2, 1>} : memref<149x128xf32, #tpu.memory_space<vmem>>, vector<70x128xf32>
    %87 = arith.maximumf %85, %86 : vector<70x128xf32>
    %c7_78 = arith.constant 7 : index
    %c0_79 = arith.constant 0 : index
    %88 = tpu.strided_load %arg17[%c7_78, %c0_79] {strides = array<i32: 2, 1>} : memref<149x128xf32, #tpu.memory_space<vmem>>, vector<70x128xf32>
    %89 = arith.maximumf %87, %88 : vector<70x128xf32>
    %c8_80 = arith.constant 8 : index
    %c0_81 = arith.constant 0 : index
    %90 = tpu.strided_load %arg17[%c8_80, %c0_81] {strides = array<i32: 2, 1>} : memref<149x128xf32, #tpu.memory_space<vmem>>, vector<70x128xf32>
    %91 = arith.maximumf %89, %90 : vector<70x128xf32>
    %c9_82 = arith.constant 9 : index
    %c0_83 = arith.constant 0 : index
    %92 = tpu.strided_load %arg17[%c9_82, %c0_83] {strides = array<i32: 2, 1>} : memref<149x128xf32, #tpu.memory_space<vmem>>, vector<70x128xf32>
    %93 = arith.maximumf %91, %92 : vector<70x128xf32>
    %cst_84 = arith.constant 5.000000e-01 : f32
    %94 = vector.broadcast %cst_84 : f32 to vector<70x128xf32>
    %95 = arith.mulf %94, %93 : vector<70x128xf32>
    %cst_85 = arith.constant 0.707106769 : f32
    %96 = vector.broadcast %cst_85 : f32 to vector<70x128xf32>
    %97 = arith.mulf %93, %96 : vector<70x128xf32>
    %98 = math.absf %97 : vector<70x128xf32>
    %cst_86 = arith.constant 0.327591091 : f32
    %99 = vector.broadcast %cst_86 : f32 to vector<70x128xf32>
    %100 = arith.mulf %99, %98 : vector<70x128xf32>
    %cst_87 = arith.constant 1.000000e+00 : f32
    %101 = vector.broadcast %cst_87 : f32 to vector<70x128xf32>
    %102 = arith.addf %101, %100 : vector<70x128xf32>
    %103 = tpu.reciprocal %102 {approx = true} : vector<70x128xf32> -> vector<70x128xf32>
    %cst_88 = arith.constant 1.06140542 : f32
    %104 = vector.broadcast %cst_88 : f32 to vector<70x128xf32>
    %105 = arith.mulf %104, %103 : vector<70x128xf32>
    %cst_89 = arith.constant -1.45315206 : f32
    %106 = vector.broadcast %cst_89 : f32 to vector<70x128xf32>
    %107 = arith.addf %105, %106 : vector<70x128xf32>
    %108 = arith.mulf %107, %103 : vector<70x128xf32>
    %cst_90 = arith.constant 1.42141378 : f32
    %109 = vector.broadcast %cst_90 : f32 to vector<70x128xf32>
    %110 = arith.addf %108, %109 : vector<70x128xf32>
    %111 = arith.mulf %110, %103 : vector<70x128xf32>
    %cst_91 = arith.constant -0.284496725 : f32
    %112 = vector.broadcast %cst_91 : f32 to vector<70x128xf32>
    %113 = arith.addf %111, %112 : vector<70x128xf32>
    %114 = arith.mulf %113, %103 : vector<70x128xf32>
    %cst_92 = arith.constant 0.254829586 : f32
    %115 = vector.broadcast %cst_92 : f32 to vector<70x128xf32>
    %116 = arith.addf %114, %115 : vector<70x128xf32>
    %117 = arith.mulf %116, %103 : vector<70x128xf32>
    %cst_93 = arith.constant 0.000000e+00 : f32
    %118 = vector.broadcast %cst_93 : f32 to vector<70x128xf32>
    %119 = arith.subf %118, %98 : vector<70x128xf32>
    %120 = arith.mulf %119, %98 : vector<70x128xf32>
    %121 = math.exp %120 : vector<70x128xf32>
    %122 = arith.mulf %117, %121 : vector<70x128xf32>
    %cst_94 = arith.constant 1.000000e+00 : f32
    %123 = vector.broadcast %cst_94 : f32 to vector<70x128xf32>
    %124 = arith.subf %123, %122 : vector<70x128xf32>
    %cst_95 = arith.constant 0.000000e+00 : f32
    %125 = vector.broadcast %cst_95 : f32 to vector<70x128xf32>
    %126 = arith.cmpf oge, %97, %125 : vector<70x128xf32>
    %cst_96 = arith.constant 0.000000e+00 : f32
    %127 = vector.broadcast %cst_96 : f32 to vector<70x128xf32>
    %128 = arith.subf %127, %124 : vector<70x128xf32>
    %129 = arith.select %126, %124, %128 : vector<70x128xi1>, vector<70x128xf32>
    %cst_97 = arith.constant 1.000000e+00 : f32
    %130 = vector.broadcast %cst_97 : f32 to vector<70x128xf32>
    %131 = arith.addf %130, %129 : vector<70x128xf32>
    %132 = arith.mulf %95, %131 : vector<70x128xf32>
    %c0_98 = arith.constant 0 : index
    %c0_99 = arith.constant 0 : index
    %133 = vector.load %arg4[%c0_98, %c0_99] : memref<1x128xf32, #tpu.memory_space<vmem>>, vector<1x128xf32>
    %134 = vector.broadcast %133 : vector<1x128xf32> to vector<70x128xf32>
    %135 = arith.mulf %132, %134 : vector<70x128xf32>
    %c0_100 = arith.constant 0 : index
    %c0_101 = arith.constant 0 : index
    %136 = vector.load %arg5[%c0_100, %c0_101] : memref<1x128xf32, #tpu.memory_space<vmem>>, vector<1x128xf32>
    %137 = vector.broadcast %136 : vector<1x128xf32> to vector<70x128xf32>
    %138 = arith.addf %135, %137 : vector<70x128xf32>
    %cst_102 = arith.constant 0.000000e+00 : f32
    %139 = vector.broadcast %cst_102 : f32 to vector<80x128xf32>
    %c0_103 = arith.constant 0 : index
    %c0_104 = arith.constant 0 : index
    %140 = vector.load %arg18[%c0_103, %c0_104] : memref<80x128xf32, #tpu.memory_space<vmem>>, vector<80x128xf32>
    tpu.vector_store %arg18[%c0_103, %c0_104], %139 {strides = array<i32>} : memref<80x128xf32, #tpu.memory_space<vmem>>, vector<80x128xf32>,
    %c8_105 = arith.constant 8 : index
    %c0_106 = arith.constant 0 : index
    %141 = vector.load %arg18[%c8_105, %c0_106] : memref<80x128xf32, #tpu.memory_space<vmem>>, vector<70x128xf32>
    tpu.vector_store %arg18[%c8_105, %c0_106], %138 {strides = array<i32>} : memref<80x128xf32, #tpu.memory_space<vmem>>, vector<70x128xf32>,
    %cst_107 = arith.constant 0.000000e+00 : f32
    %142 = vector.broadcast %cst_107 : f32 to vector<36x128xf32>
    %c6_108 = arith.constant 6 : index
    %c0_109 = arith.constant 0 : index
    %143 = tpu.strided_load %arg18[%c6_108, %c0_109] {strides = array<i32: 2, 1>} : memref<80x128xf32, #tpu.memory_space<vmem>>, vector<36x128xf32>
    %144 = arith.truncf %143 : vector<36x128xf32> to vector<36x128xbf16>
    %c0_110 = arith.constant 0 : index
    %c0_111 = arith.constant 0 : index
    %c0_112 = arith.constant 0 : index
    %145 = vector.load %arg6[%c0_110, %c0_111, %c0_112] : memref<4x128x128xbf16, #tpu.memory_space<vmem>>, vector<1x128x128xbf16>
    %146 = vector.shape_cast %145 : vector<1x128x128xbf16> to vector<128x128xbf16>
    %cst_113 = arith.constant dense<0.000000e+00> : vector<36x128xf32>
    %147 = tpu.matmul %144, %146, %cst_113 {dimension_numbers = #tpu.dot_dimension_numbers<[1], [0], [0], [1], [0, 0, 1, 1], [], []>} : vector<36x128xbf16>, vector<128x128xbf16>, vector<36x128xf32> -> vector<36x128xf32>
    %148 = arith.addf %142, %147 : vector<36x128xf32>
    %c7_114 = arith.constant 7 : index
    %c0_115 = arith.constant 0 : index
    %149 = tpu.strided_load %arg18[%c7_114, %c0_115] {strides = array<i32: 2, 1>} : memref<80x128xf32, #tpu.memory_space<vmem>>, vector<36x128xf32>
    %150 = arith.truncf %149 : vector<36x128xf32> to vector<36x128xbf16>
    %c1_116 = arith.constant 1 : index
    %c0_117 = arith.constant 0 : index
    %c0_118 = arith.constant 0 : index
    %151 = vector.load %arg6[%c1_116, %c0_117, %c0_118] : memref<4x128x128xbf16, #tpu.memory_space<vmem>>, vector<1x128x128xbf16>
    %152 = vector.shape_cast %151 : vector<1x128x128xbf16> to vector<128x128xbf16>
    %cst_119 = arith.constant dense<0.000000e+00> : vector<36x128xf32>
    %153 = tpu.matmul %150, %152, %cst_119 {dimension_numbers = #tpu.dot_dimension_numbers<[1], [0], [0], [1], [0, 0, 1, 1], [], []>} : vector<36x128xbf16>, vector<128x128xbf16>, vector<36x128xf32> -> vector<36x128xf32>
    %154 = arith.addf %148, %153 : vector<36x128xf32>
    %c8_120 = arith.constant 8 : index
    %c0_121 = arith.constant 0 : index
    %155 = tpu.strided_load %arg18[%c8_120, %c0_121] {strides = array<i32: 2, 1>} : memref<80x128xf32, #tpu.memory_space<vmem>>, vector<36x128xf32>
    %156 = arith.truncf %155 : vector<36x128xf32> to vector<36x128xbf16>
    %c2_122 = arith.constant 2 : index
    %c0_123 = arith.constant 0 : index
    %c0_124 = arith.constant 0 : index
    %157 = vector.load %arg6[%c2_122, %c0_123, %c0_124] : memref<4x128x128xbf16, #tpu.memory_space<vmem>>, vector<1x128x128xbf16>
    %158 = vector.shape_cast %157 : vector<1x128x128xbf16> to vector<128x128xbf16>
    %cst_125 = arith.constant dense<0.000000e+00> : vector<36x128xf32>
    %159 = tpu.matmul %156, %158, %cst_125 {dimension_numbers = #tpu.dot_dimension_numbers<[1], [0], [0], [1], [0, 0, 1, 1], [], []>} : vector<36x128xbf16>, vector<128x128xbf16>, vector<36x128xf32> -> vector<36x128xf32>
    %160 = arith.addf %154, %159 : vector<36x128xf32>
    %c9_126 = arith.constant 9 : index
    %c0_127 = arith.constant 0 : index
    %161 = tpu.strided_load %arg18[%c9_126, %c0_127] {strides = array<i32: 2, 1>} : memref<80x128xf32, #tpu.memory_space<vmem>>, vector<36x128xf32>
    %162 = arith.truncf %161 : vector<36x128xf32> to vector<36x128xbf16>
    %c3_128 = arith.constant 3 : index
    %c0_129 = arith.constant 0 : index
    %c0_130 = arith.constant 0 : index
    %163 = vector.load %arg6[%c3_128, %c0_129, %c0_130] : memref<4x128x128xbf16, #tpu.memory_space<vmem>>, vector<1x128x128xbf16>
    %164 = vector.shape_cast %163 : vector<1x128x128xbf16> to vector<128x128xbf16>
    %cst_131 = arith.constant dense<0.000000e+00> : vector<36x128xf32>
    %165 = tpu.matmul %162, %164, %cst_131 {dimension_numbers = #tpu.dot_dimension_numbers<[1], [0], [0], [1], [0, 0, 1, 1], [], []>} : vector<36x128xbf16>, vector<128x128xbf16>, vector<36x128xf32> -> vector<36x128xf32>
    %166 = arith.addf %160, %165 : vector<36x128xf32>
    %c0_132 = arith.constant 0 : index
    %c0_133 = arith.constant 0 : index
    %167 = vector.load %arg7[%c0_132, %c0_133] : memref<1x128xf32, #tpu.memory_space<vmem>>, vector<1x128xf32>
    %168 = vector.broadcast %167 : vector<1x128xf32> to vector<36x128xf32>
    %169 = arith.addf %166, %168 : vector<36x128xf32>
    %c0_134 = arith.constant 0 : index
    %c0_135 = arith.constant 0 : index
    %170 = vector.load %arg19[%c0_134, %c0_135] : memref<36x128xf32, #tpu.memory_space<vmem>>, vector<36x128xf32>
    tpu.vector_store %arg19[%c0_134, %c0_135], %169 {strides = array<i32>} : memref<36x128xf32, #tpu.memory_space<vmem>>, vector<36x128xf32>,
    %c0_136 = arith.constant 0 : index
    %c0_137 = arith.constant 0 : index
    %171 = tpu.strided_load %arg19[%c0_136, %c0_137] {strides = array<i32: 2, 1>} : memref<36x128xf32, #tpu.memory_space<vmem>>, vector<17x128xf32>
    %c1_138 = arith.constant 1 : index
    %c0_139 = arith.constant 0 : index
    %172 = tpu.strided_load %arg19[%c1_138, %c0_139] {strides = array<i32: 2, 1>} : memref<36x128xf32, #tpu.memory_space<vmem>>, vector<17x128xf32>
    %173 = arith.maximumf %171, %172 : vector<17x128xf32>
    %c2_140 = arith.constant 2 : index
    %c0_141 = arith.constant 0 : index
    %174 = tpu.strided_load %arg19[%c2_140, %c0_141] {strides = array<i32: 2, 1>} : memref<36x128xf32, #tpu.memory_space<vmem>>, vector<17x128xf32>
    %175 = arith.maximumf %173, %174 : vector<17x128xf32>
    %c3_142 = arith.constant 3 : index
    %c0_143 = arith.constant 0 : index
    %176 = tpu.strided_load %arg19[%c3_142, %c0_143] {strides = array<i32: 2, 1>} : memref<36x128xf32, #tpu.memory_space<vmem>>, vector<17x128xf32>
    %177 = arith.maximumf %175, %176 : vector<17x128xf32>
    %cst_144 = arith.constant 5.000000e-01 : f32
    %178 = vector.broadcast %cst_144 : f32 to vector<17x128xf32>
    %179 = arith.mulf %178, %177 : vector<17x128xf32>
    %cst_145 = arith.constant 0.707106769 : f32
    %180 = vector.broadcast %cst_145 : f32 to vector<17x128xf32>
    %181 = arith.mulf %177, %180 : vector<17x128xf32>
    %182 = math.absf %181 : vector<17x128xf32>
    %cst_146 = arith.constant 0.327591091 : f32
    %183 = vector.broadcast %cst_146 : f32 to vector<17x128xf32>
    %184 = arith.mulf %183, %182 : vector<17x128xf32>
    %cst_147 = arith.constant 1.000000e+00 : f32
    %185 = vector.broadcast %cst_147 : f32 to vector<17x128xf32>
    %186 = arith.addf %185, %184 : vector<17x128xf32>
    %187 = tpu.reciprocal %186 {approx = true} : vector<17x128xf32> -> vector<17x128xf32>
    %cst_148 = arith.constant 1.06140542 : f32
    %188 = vector.broadcast %cst_148 : f32 to vector<17x128xf32>
    %189 = arith.mulf %188, %187 : vector<17x128xf32>
    %cst_149 = arith.constant -1.45315206 : f32
    %190 = vector.broadcast %cst_149 : f32 to vector<17x128xf32>
    %191 = arith.addf %189, %190 : vector<17x128xf32>
    %192 = arith.mulf %191, %187 : vector<17x128xf32>
    %cst_150 = arith.constant 1.42141378 : f32
    %193 = vector.broadcast %cst_150 : f32 to vector<17x128xf32>
    %194 = arith.addf %192, %193 : vector<17x128xf32>
    %195 = arith.mulf %194, %187 : vector<17x128xf32>
    %cst_151 = arith.constant -0.284496725 : f32
    %196 = vector.broadcast %cst_151 : f32 to vector<17x128xf32>
    %197 = arith.addf %195, %196 : vector<17x128xf32>
    %198 = arith.mulf %197, %187 : vector<17x128xf32>
    %cst_152 = arith.constant 0.254829586 : f32
    %199 = vector.broadcast %cst_152 : f32 to vector<17x128xf32>
    %200 = arith.addf %198, %199 : vector<17x128xf32>
    %201 = arith.mulf %200, %187 : vector<17x128xf32>
    %cst_153 = arith.constant 0.000000e+00 : f32
    %202 = vector.broadcast %cst_153 : f32 to vector<17x128xf32>
    %203 = arith.subf %202, %182 : vector<17x128xf32>
    %204 = arith.mulf %203, %182 : vector<17x128xf32>
    %205 = math.exp %204 : vector<17x128xf32>
    %206 = arith.mulf %201, %205 : vector<17x128xf32>
    %cst_154 = arith.constant 1.000000e+00 : f32
    %207 = vector.broadcast %cst_154 : f32 to vector<17x128xf32>
    %208 = arith.subf %207, %206 : vector<17x128xf32>
    %cst_155 = arith.constant 0.000000e+00 : f32
    %209 = vector.broadcast %cst_155 : f32 to vector<17x128xf32>
    %210 = arith.cmpf oge, %181, %209 : vector<17x128xf32>
    %cst_156 = arith.constant 0.000000e+00 : f32
    %211 = vector.broadcast %cst_156 : f32 to vector<17x128xf32>
    %212 = arith.subf %211, %208 : vector<17x128xf32>
    %213 = arith.select %210, %208, %212 : vector<17x128xi1>, vector<17x128xf32>
    %cst_157 = arith.constant 1.000000e+00 : f32
    %214 = vector.broadcast %cst_157 : f32 to vector<17x128xf32>
    %215 = arith.addf %214, %213 : vector<17x128xf32>
    %216 = arith.mulf %179, %215 : vector<17x128xf32>
    %c0_158 = arith.constant 0 : index
    %c0_159 = arith.constant 0 : index
    %217 = vector.load %arg8[%c0_158, %c0_159] : memref<1x128xf32, #tpu.memory_space<vmem>>, vector<1x128xf32>
    %218 = vector.broadcast %217 : vector<1x128xf32> to vector<17x128xf32>
    %219 = arith.mulf %216, %218 : vector<17x128xf32>
    %c0_160 = arith.constant 0 : index
    %c0_161 = arith.constant 0 : index
    %220 = vector.load %arg9[%c0_160, %c0_161] : memref<1x128xf32, #tpu.memory_space<vmem>>, vector<1x128xf32>
    %221 = vector.broadcast %220 : vector<1x128xf32> to vector<17x128xf32>
    %222 = arith.addf %219, %221 : vector<17x128xf32>
    %c0_162 = arith.constant 0 : index
    %c0_163 = arith.constant 0 : index
    %223 = vector.load %arg20[%c0_162, %c0_163] : memref<17x128xf32, #tpu.memory_space<vmem>>, vector<17x128xf32>
    tpu.vector_store %arg20[%c0_162, %c0_163], %222 {strides = array<i32>} : memref<17x128xf32, #tpu.memory_space<vmem>>, vector<17x128xf32>,
    %cst_164 = arith.constant 0.000000e+00 : f32
    %224 = vector.broadcast %cst_164 : f32 to vector<1x256xf32>
    %c0_165 = arith.constant 0 : index
    %c0_166 = arith.constant 0 : index
    %225 = vector.load %arg20[%c0_165, %c0_166] : memref<17x128xf32, #tpu.memory_space<vmem>>, vector<1x128xf32>
    %226 = arith.truncf %225 : vector<1x128xf32> to vector<1x128xbf16>
    %c0_167 = arith.constant 0 : index
    %c0_168 = arith.constant 0 : index
    %c0_169 = arith.constant 0 : index
    %227 = vector.load %arg10[%c0_167, %c0_168, %c0_169] : memref<17x128x256xbf16, #tpu.memory_space<vmem>>, vector<1x128x256xbf16>
    %228 = vector.shape_cast %227 : vector<1x128x256xbf16> to vector<128x256xbf16>
    %cst_170 = arith.constant dense<0.000000e+00> : vector<1x256xf32>
    %229 = tpu.matmul %226, %228, %cst_170 {dimension_numbers = #tpu.dot_dimension_numbers<[1], [0], [0], [1], [0, 0, 1, 1], [], []>} : vector<1x128xbf16>, vector<128x256xbf16>, vector<1x256xf32> -> vector<1x256xf32>
    %230 = arith.addf %224, %229 : vector<1x256xf32>
    %c1_171 = arith.constant 1 : index
    %c0_172 = arith.constant 0 : index
    %231 = vector.load %arg20[%c1_171, %c0_172] : memref<17x128xf32, #tpu.memory_space<vmem>>, vector<1x128xf32>
    %232 = arith.truncf %231 : vector<1x128xf32> to vector<1x128xbf16>
    %c1_173 = arith.constant 1 : index
    %c0_174 = arith.constant 0 : index
    %c0_175 = arith.constant 0 : index
    %233 = vector.load %arg10[%c1_173, %c0_174, %c0_175] : memref<17x128x256xbf16, #tpu.memory_space<vmem>>, vector<1x128x256xbf16>
    %234 = vector.shape_cast %233 : vector<1x128x256xbf16> to vector<128x256xbf16>
    %cst_176 = arith.constant dense<0.000000e+00> : vector<1x256xf32>
    %235 = tpu.matmul %232, %234, %cst_176 {dimension_numbers = #tpu.dot_dimension_numbers<[1], [0], [0], [1], [0, 0, 1, 1], [], []>} : vector<1x128xbf16>, vector<128x256xbf16>, vector<1x256xf32> -> vector<1x256xf32>
    %236 = arith.addf %230, %235 : vector<1x256xf32>
    %c2_177 = arith.constant 2 : index
    %c0_178 = arith.constant 0 : index
    %237 = vector.load %arg20[%c2_177, %c0_178] : memref<17x128xf32, #tpu.memory_space<vmem>>, vector<1x128xf32>
    %238 = arith.truncf %237 : vector<1x128xf32> to vector<1x128xbf16>
    %c2_179 = arith.constant 2 : index
    %c0_180 = arith.constant 0 : index
    %c0_181 = arith.constant 0 : index
    %239 = vector.load %arg10[%c2_179, %c0_180, %c0_181] : memref<17x128x256xbf16, #tpu.memory_space<vmem>>, vector<1x128x256xbf16>
    %240 = vector.shape_cast %239 : vector<1x128x256xbf16> to vector<128x256xbf16>
    %cst_182 = arith.constant dense<0.000000e+00> : vector<1x256xf32>
    %241 = tpu.matmul %238, %240, %cst_182 {dimension_numbers = #tpu.dot_dimension_numbers<[1], [0], [0], [1], [0, 0, 1, 1], [], []>} : vector<1x128xbf16>, vector<128x256xbf16>, vector<1x256xf32> -> vector<1x256xf32>
    %242 = arith.addf %236, %241 : vector<1x256xf32>
    %c3_183 = arith.constant 3 : index
    %c0_184 = arith.constant 0 : index
    %243 = vector.load %arg20[%c3_183, %c0_184] : memref<17x128xf32, #tpu.memory_space<vmem>>, vector<1x128xf32>
    %244 = arith.truncf %243 : vector<1x128xf32> to vector<1x128xbf16>
    %c3_185 = arith.constant 3 : index
    %c0_186 = arith.constant 0 : index
    %c0_187 = arith.constant 0 : index
    %245 = vector.load %arg10[%c3_185, %c0_186, %c0_187] : memref<17x128x256xbf16, #tpu.memory_space<vmem>>, vector<1x128x256xbf16>
    %246 = vector.shape_cast %245 : vector<1x128x256xbf16> to vector<128x256xbf16>
    %cst_188 = arith.constant dense<0.000000e+00> : vector<1x256xf32>
    %247 = tpu.matmul %244, %246, %cst_188 {dimension_numbers = #tpu.dot_dimension_numbers<[1], [0], [0], [1], [0, 0, 1, 1], [], []>} : vector<1x128xbf16>, vector<128x256xbf16>, vector<1x256xf32> -> vector<1x256xf32>
    %248 = arith.addf %242, %247 : vector<1x256xf32>
    %c4_189 = arith.constant 4 : index
    %c0_190 = arith.constant 0 : index
    %249 = vector.load %arg20[%c4_189, %c0_190] : memref<17x128xf32, #tpu.memory_space<vmem>>, vector<1x128xf32>
    %250 = arith.truncf %249 : vector<1x128xf32> to vector<1x128xbf16>
    %c4_191 = arith.constant 4 : index
    %c0_192 = arith.constant 0 : index
    %c0_193 = arith.constant 0 : index
    %251 = vector.load %arg10[%c4_191, %c0_192, %c0_193] : memref<17x128x256xbf16, #tpu.memory_space<vmem>>, vector<1x128x256xbf16>
    %252 = vector.shape_cast %251 : vector<1x128x256xbf16> to vector<128x256xbf16>
    %cst_194 = arith.constant dense<0.000000e+00> : vector<1x256xf32>
    %253 = tpu.matmul %250, %252, %cst_194 {dimension_numbers = #tpu.dot_dimension_numbers<[1], [0], [0], [1], [0, 0, 1, 1], [], []>} : vector<1x128xbf16>, vector<128x256xbf16>, vector<1x256xf32> -> vector<1x256xf32>
    %254 = arith.addf %248, %253 : vector<1x256xf32>
    %c5_195 = arith.constant 5 : index
    %c0_196 = arith.constant 0 : index
    %255 = vector.load %arg20[%c5_195, %c0_196] : memref<17x128xf32, #tpu.memory_space<vmem>>, vector<1x128xf32>
    %256 = arith.truncf %255 : vector<1x128xf32> to vector<1x128xbf16>
    %c5_197 = arith.constant 5 : index
    %c0_198 = arith.constant 0 : index
    %c0_199 = arith.constant 0 : index
    %257 = vector.load %arg10[%c5_197, %c0_198, %c0_199] : memref<17x128x256xbf16, #tpu.memory_space<vmem>>, vector<1x128x256xbf16>
    %258 = vector.shape_cast %257 : vector<1x128x256xbf16> to vector<128x256xbf16>
    %cst_200 = arith.constant dense<0.000000e+00> : vector<1x256xf32>
    %259 = tpu.matmul %256, %258, %cst_200 {dimension_numbers = #tpu.dot_dimension_numbers<[1], [0], [0], [1], [0, 0, 1, 1], [], []>} : vector<1x128xbf16>, vector<128x256xbf16>, vector<1x256xf32> -> vector<1x256xf32>
    %260 = arith.addf %254, %259 : vector<1x256xf32>
    %c6_201 = arith.constant 6 : index
    %c0_202 = arith.constant 0 : index
    %261 = vector.load %arg20[%c6_201, %c0_202] : memref<17x128xf32, #tpu.memory_space<vmem>>, vector<1x128xf32>
    %262 = arith.truncf %261 : vector<1x128xf32> to vector<1x128xbf16>
    %c6_203 = arith.constant 6 : index
    %c0_204 = arith.constant 0 : index
    %c0_205 = arith.constant 0 : index
    %263 = vector.load %arg10[%c6_203, %c0_204, %c0_205] : memref<17x128x256xbf16, #tpu.memory_space<vmem>>, vector<1x128x256xbf16>
    %264 = vector.shape_cast %263 : vector<1x128x256xbf16> to vector<128x256xbf16>
    %cst_206 = arith.constant dense<0.000000e+00> : vector<1x256xf32>
    %265 = tpu.matmul %262, %264, %cst_206 {dimension_numbers = #tpu.dot_dimension_numbers<[1], [0], [0], [1], [0, 0, 1, 1], [], []>} : vector<1x128xbf16>, vector<128x256xbf16>, vector<1x256xf32> -> vector<1x256xf32>
    %266 = arith.addf %260, %265 : vector<1x256xf32>
    %c7_207 = arith.constant 7 : index
    %c0_208 = arith.constant 0 : index
    %267 = vector.load %arg20[%c7_207, %c0_208] : memref<17x128xf32, #tpu.memory_space<vmem>>, vector<1x128xf32>
    %268 = arith.truncf %267 : vector<1x128xf32> to vector<1x128xbf16>
    %c7_209 = arith.constant 7 : index
    %c0_210 = arith.constant 0 : index
    %c0_211 = arith.constant 0 : index
    %269 = vector.load %arg10[%c7_209, %c0_210, %c0_211] : memref<17x128x256xbf16, #tpu.memory_space<vmem>>, vector<1x128x256xbf16>
    %270 = vector.shape_cast %269 : vector<1x128x256xbf16> to vector<128x256xbf16>
    %cst_212 = arith.constant dense<0.000000e+00> : vector<1x256xf32>
    %271 = tpu.matmul %268, %270, %cst_212 {dimension_numbers = #tpu.dot_dimension_numbers<[1], [0], [0], [1], [0, 0, 1, 1], [], []>} : vector<1x128xbf16>, vector<128x256xbf16>, vector<1x256xf32> -> vector<1x256xf32>
    %272 = arith.addf %266, %271 : vector<1x256xf32>
    %c8_213 = arith.constant 8 : index
    %c0_214 = arith.constant 0 : index
    %273 = vector.load %arg20[%c8_213, %c0_214] : memref<17x128xf32, #tpu.memory_space<vmem>>, vector<1x128xf32>
    %274 = arith.truncf %273 : vector<1x128xf32> to vector<1x128xbf16>
    %c8_215 = arith.constant 8 : index
    %c0_216 = arith.constant 0 : index
    %c0_217 = arith.constant 0 : index
    %275 = vector.load %arg10[%c8_215, %c0_216, %c0_217] : memref<17x128x256xbf16, #tpu.memory_space<vmem>>, vector<1x128x256xbf16>
    %276 = vector.shape_cast %275 : vector<1x128x256xbf16> to vector<128x256xbf16>
    %cst_218 = arith.constant dense<0.000000e+00> : vector<1x256xf32>
    %277 = tpu.matmul %274, %276, %cst_218 {dimension_numbers = #tpu.dot_dimension_numbers<[1], [0], [0], [1], [0, 0, 1, 1], [], []>} : vector<1x128xbf16>, vector<128x256xbf16>, vector<1x256xf32> -> vector<1x256xf32>
    %278 = arith.addf %272, %277 : vector<1x256xf32>
    %c9_219 = arith.constant 9 : index
    %c0_220 = arith.constant 0 : index
    %279 = vector.load %arg20[%c9_219, %c0_220] : memref<17x128xf32, #tpu.memory_space<vmem>>, vector<1x128xf32>
    %280 = arith.truncf %279 : vector<1x128xf32> to vector<1x128xbf16>
    %c9_221 = arith.constant 9 : index
    %c0_222 = arith.constant 0 : index
    %c0_223 = arith.constant 0 : index
    %281 = vector.load %arg10[%c9_221, %c0_222, %c0_223] : memref<17x128x256xbf16, #tpu.memory_space<vmem>>, vector<1x128x256xbf16>
    %282 = vector.shape_cast %281 : vector<1x128x256xbf16> to vector<128x256xbf16>
    %cst_224 = arith.constant dense<0.000000e+00> : vector<1x256xf32>
    %283 = tpu.matmul %280, %282, %cst_224 {dimension_numbers = #tpu.dot_dimension_numbers<[1], [0], [0], [1], [0, 0, 1, 1], [], []>} : vector<1x128xbf16>, vector<128x256xbf16>, vector<1x256xf32> -> vector<1x256xf32>
    %284 = arith.addf %278, %283 : vector<1x256xf32>
    %c10 = arith.constant 10 : index
    %c0_225 = arith.constant 0 : index
    %285 = vector.load %arg20[%c10, %c0_225] : memref<17x128xf32, #tpu.memory_space<vmem>>, vector<1x128xf32>
    %286 = arith.truncf %285 : vector<1x128xf32> to vector<1x128xbf16>
    %c10_226 = arith.constant 10 : index
    %c0_227 = arith.constant 0 : index
    %c0_228 = arith.constant 0 : index
    %287 = vector.load %arg10[%c10_226, %c0_227, %c0_228] : memref<17x128x256xbf16, #tpu.memory_space<vmem>>, vector<1x128x256xbf16>
    %288 = vector.shape_cast %287 : vector<1x128x256xbf16> to vector<128x256xbf16>
    %cst_229 = arith.constant dense<0.000000e+00> : vector<1x256xf32>
    %289 = tpu.matmul %286, %288, %cst_229 {dimension_numbers = #tpu.dot_dimension_numbers<[1], [0], [0], [1], [0, 0, 1, 1], [], []>} : vector<1x128xbf16>, vector<128x256xbf16>, vector<1x256xf32> -> vector<1x256xf32>
    %290 = arith.addf %284, %289 : vector<1x256xf32>
    %c11 = arith.constant 11 : index
    %c0_230 = arith.constant 0 : index
    %291 = vector.load %arg20[%c11, %c0_230] : memref<17x128xf32, #tpu.memory_space<vmem>>, vector<1x128xf32>
    %292 = arith.truncf %291 : vector<1x128xf32> to vector<1x128xbf16>
    %c11_231 = arith.constant 11 : index
    %c0_232 = arith.constant 0 : index
    %c0_233 = arith.constant 0 : index
    %293 = vector.load %arg10[%c11_231, %c0_232, %c0_233] : memref<17x128x256xbf16, #tpu.memory_space<vmem>>, vector<1x128x256xbf16>
    %294 = vector.shape_cast %293 : vector<1x128x256xbf16> to vector<128x256xbf16>
    %cst_234 = arith.constant dense<0.000000e+00> : vector<1x256xf32>
    %295 = tpu.matmul %292, %294, %cst_234 {dimension_numbers = #tpu.dot_dimension_numbers<[1], [0], [0], [1], [0, 0, 1, 1], [], []>} : vector<1x128xbf16>, vector<128x256xbf16>, vector<1x256xf32> -> vector<1x256xf32>
    %296 = arith.addf %290, %295 : vector<1x256xf32>
    %c12 = arith.constant 12 : index
    %c0_235 = arith.constant 0 : index
    %297 = vector.load %arg20[%c12, %c0_235] : memref<17x128xf32, #tpu.memory_space<vmem>>, vector<1x128xf32>
    %298 = arith.truncf %297 : vector<1x128xf32> to vector<1x128xbf16>
    %c12_236 = arith.constant 12 : index
    %c0_237 = arith.constant 0 : index
    %c0_238 = arith.constant 0 : index
    %299 = vector.load %arg10[%c12_236, %c0_237, %c0_238] : memref<17x128x256xbf16, #tpu.memory_space<vmem>>, vector<1x128x256xbf16>
    %300 = vector.shape_cast %299 : vector<1x128x256xbf16> to vector<128x256xbf16>
    %cst_239 = arith.constant dense<0.000000e+00> : vector<1x256xf32>
    %301 = tpu.matmul %298, %300, %cst_239 {dimension_numbers = #tpu.dot_dimension_numbers<[1], [0], [0], [1], [0, 0, 1, 1], [], []>} : vector<1x128xbf16>, vector<128x256xbf16>, vector<1x256xf32> -> vector<1x256xf32>
    %302 = arith.addf %296, %301 : vector<1x256xf32>
    %c13 = arith.constant 13 : index
    %c0_240 = arith.constant 0 : index
    %303 = vector.load %arg20[%c13, %c0_240] : memref<17x128xf32, #tpu.memory_space<vmem>>, vector<1x128xf32>
    %304 = arith.truncf %303 : vector<1x128xf32> to vector<1x128xbf16>
    %c13_241 = arith.constant 13 : index
    %c0_242 = arith.constant 0 : index
    %c0_243 = arith.constant 0 : index
    %305 = vector.load %arg10[%c13_241, %c0_242, %c0_243] : memref<17x128x256xbf16, #tpu.memory_space<vmem>>, vector<1x128x256xbf16>
    %306 = vector.shape_cast %305 : vector<1x128x256xbf16> to vector<128x256xbf16>
    %cst_244 = arith.constant dense<0.000000e+00> : vector<1x256xf32>
    %307 = tpu.matmul %304, %306, %cst_244 {dimension_numbers = #tpu.dot_dimension_numbers<[1], [0], [0], [1], [0, 0, 1, 1], [], []>} : vector<1x128xbf16>, vector<128x256xbf16>, vector<1x256xf32> -> vector<1x256xf32>
    %308 = arith.addf %302, %307 : vector<1x256xf32>
    %c14 = arith.constant 14 : index
    %c0_245 = arith.constant 0 : index
    %309 = vector.load %arg20[%c14, %c0_245] : memref<17x128xf32, #tpu.memory_space<vmem>>, vector<1x128xf32>
    %310 = arith.truncf %309 : vector<1x128xf32> to vector<1x128xbf16>
    %c14_246 = arith.constant 14 : index
    %c0_247 = arith.constant 0 : index
    %c0_248 = arith.constant 0 : index
    %311 = vector.load %arg10[%c14_246, %c0_247, %c0_248] : memref<17x128x256xbf16, #tpu.memory_space<vmem>>, vector<1x128x256xbf16>
    %312 = vector.shape_cast %311 : vector<1x128x256xbf16> to vector<128x256xbf16>
    %cst_249 = arith.constant dense<0.000000e+00> : vector<1x256xf32>
    %313 = tpu.matmul %310, %312, %cst_249 {dimension_numbers = #tpu.dot_dimension_numbers<[1], [0], [0], [1], [0, 0, 1, 1], [], []>} : vector<1x128xbf16>, vector<128x256xbf16>, vector<1x256xf32> -> vector<1x256xf32>
    %314 = arith.addf %308, %313 : vector<1x256xf32>
    %c15 = arith.constant 15 : index
    %c0_250 = arith.constant 0 : index
    %315 = vector.load %arg20[%c15, %c0_250] : memref<17x128xf32, #tpu.memory_space<vmem>>, vector<1x128xf32>
    %316 = arith.truncf %315 : vector<1x128xf32> to vector<1x128xbf16>
    %c15_251 = arith.constant 15 : index
    %c0_252 = arith.constant 0 : index
    %c0_253 = arith.constant 0 : index
    %317 = vector.load %arg10[%c15_251, %c0_252, %c0_253] : memref<17x128x256xbf16, #tpu.memory_space<vmem>>, vector<1x128x256xbf16>
    %318 = vector.shape_cast %317 : vector<1x128x256xbf16> to vector<128x256xbf16>
    %cst_254 = arith.constant dense<0.000000e+00> : vector<1x256xf32>
    %319 = tpu.matmul %316, %318, %cst_254 {dimension_numbers = #tpu.dot_dimension_numbers<[1], [0], [0], [1], [0, 0, 1, 1], [], []>} : vector<1x128xbf16>, vector<128x256xbf16>, vector<1x256xf32> -> vector<1x256xf32>
    %320 = arith.addf %314, %319 : vector<1x256xf32>
    %c16 = arith.constant 16 : index
    %c0_255 = arith.constant 0 : index
    %321 = vector.load %arg20[%c16, %c0_255] : memref<17x128xf32, #tpu.memory_space<vmem>>, vector<1x128xf32>
    %322 = arith.truncf %321 : vector<1x128xf32> to vector<1x128xbf16>
    %c16_256 = arith.constant 16 : index
    %c0_257 = arith.constant 0 : index
    %c0_258 = arith.constant 0 : index
    %323 = vector.load %arg10[%c16_256, %c0_257, %c0_258] : memref<17x128x256xbf16, #tpu.memory_space<vmem>>, vector<1x128x256xbf16>
    %324 = vector.shape_cast %323 : vector<1x128x256xbf16> to vector<128x256xbf16>
    %cst_259 = arith.constant dense<0.000000e+00> : vector<1x256xf32>
    %325 = tpu.matmul %322, %324, %cst_259 {dimension_numbers = #tpu.dot_dimension_numbers<[1], [0], [0], [1], [0, 0, 1, 1], [], []>} : vector<1x128xbf16>, vector<128x256xbf16>, vector<1x256xf32> -> vector<1x256xf32>
    %326 = arith.addf %320, %325 : vector<1x256xf32>
    %c0_260 = arith.constant 0 : index
    %c0_261 = arith.constant 0 : index
    %327 = vector.load %arg11[%c0_260, %c0_261] : memref<1x256xf32, #tpu.memory_space<vmem>>, vector<1x256xf32>
    %328 = arith.addf %326, %327 : vector<1x256xf32>
    %cst_262 = arith.constant dense<0.000000e+00> : vector<1xf32>
    %329 = vector.multi_reduction <add>, %328, %cst_262 [1] : vector<1x256xf32> to vector<1xf32>
    %330 = vector.shape_cast %329 : vector<1xf32> to vector<1x1xf32>
    %cst_263 = arith.constant 2.560000e+02 : f32
    %331 = vector.broadcast %cst_263 : f32 to vector<1x1xf32>
    %332 = arith.divf %330, %331 : vector<1x1xf32>
    %333 = vector.broadcast %332 : vector<1x1xf32> to vector<1x256xf32>
    %334 = arith.subf %328, %333 : vector<1x256xf32>
    %335 = arith.mulf %334, %334 : vector<1x256xf32>
    %cst_264 = arith.constant dense<0.000000e+00> : vector<1xf32>
    %336 = vector.multi_reduction <add>, %335, %cst_264 [1] : vector<1x256xf32> to vector<1xf32>
    %337 = vector.shape_cast %336 : vector<1xf32> to vector<1x1xf32>
    %cst_265 = arith.constant 2.560000e+02 : f32
    %338 = vector.broadcast %cst_265 : f32 to vector<1x1xf32>
    %339 = arith.divf %337, %338 : vector<1x1xf32>
    %cst_266 = arith.constant 9.99999974E-6 : f32
    %340 = vector.broadcast %cst_266 : f32 to vector<1x1xf32>
    %341 = arith.addf %339, %340 : vector<1x1xf32>
    %342 = math.rsqrt %341 : vector<1x1xf32>
    %343 = vector.broadcast %342 : vector<1x1xf32> to vector<1x256xf32>
    %344 = arith.mulf %334, %343 : vector<1x256xf32>
    %c0_267 = arith.constant 0 : index
    %c0_268 = arith.constant 0 : index
    %345 = vector.load %arg12[%c0_267, %c0_268] : memref<1x256xf32, #tpu.memory_space<vmem>>, vector<1x256xf32>
    %346 = arith.mulf %344, %345 : vector<1x256xf32>
    %c0_269 = arith.constant 0 : index
    %c0_270 = arith.constant 0 : index
    %347 = vector.load %arg13[%c0_269, %c0_270] : memref<1x256xf32, #tpu.memory_space<vmem>>, vector<1x256xf32>
    %348 = arith.addf %346, %347 : vector<1x256xf32>
    %cst_271 = arith.constant 0.000000e+00 : f32
    %349 = vector.broadcast %cst_271 : f32 to vector<1x256xf32>
    %350 = arith.subf %349, %348 : vector<1x256xf32>
    %351 = math.exp %350 : vector<1x256xf32>
    %cst_272 = arith.constant 1.000000e+00 : f32
    %352 = vector.broadcast %cst_272 : f32 to vector<1x256xf32>
    %353 = arith.addf %352, %351 : vector<1x256xf32>
    %cst_273 = arith.constant 1.000000e+00 : f32
    %354 = vector.broadcast %cst_273 : f32 to vector<1x256xf32>
    %355 = arith.divf %354, %353 : vector<1x256xf32>
    %c0_274 = arith.constant 0 : index
    %c0_275 = arith.constant 0 : index
    %356 = vector.load %arg14[%c0_274, %c0_275] : memref<256x128xf32, #tpu.memory_space<vmem>>, vector<256x128xf32>
    %cst_276 = arith.constant dense<0.000000e+00> : vector<1x128xf32>
    %357 = tpu.matmul %355, %356, %cst_276 {dimension_numbers = #tpu.dot_dimension_numbers<[1], [0], [0], [1], [0, 0, 1, 1], [], []>} : vector<1x256xf32>, vector<256x128xf32>, vector<1x128xf32> -> vector<1x128xf32>
    %c0_277 = arith.constant 0 : index
    %c0_278 = arith.constant 0 : index
    %358 = vector.load %arg15[%c0_277, %c0_278] : memref<1x128xf32, #tpu.memory_space<vmem>>, vector<1x128xf32>
    %359 = arith.addf %357, %358 : vector<1x128xf32>
    %c0_279 = arith.constant 0 : index
    %c0_280 = arith.constant 0 : index
    %c0_281 = arith.constant 0 : index
    %360 = vector.load %arg16[%c0_279, %c0_280, %c0_281] : memref<1x1x128xf32, #tpu.memory_space<vmem>>, vector<1x1x128xf32>
    %361 = vector.shape_cast %360 : vector<1x1x128xf32> to vector<1x128xf32>
    %362 = vector.shape_cast %359 : vector<1x128xf32> to vector<1x1x128xf32>
    tpu.vector_store %arg16[%c0_279, %c0_280, %c0_281], %362 {strides = array<i32>} : memref<1x1x128xf32, #tpu.memory_space<vmem>>, vector<1x1x128xf32>,
    return
  }
  func.func @transform_0(%arg0: i32) -> (i32, i32, i32) {
    %c0_i32 = arith.constant 0 : i32
    %c0_i32_0 = arith.constant 0 : i32
    %c0_i32_1 = arith.constant 0 : i32
    return %arg0, %c0_i32, %c0_i32_0 : i32, i32, i32
  }
  func.func @transform_1(%arg0: i32) -> (i32, i32, i32) {
    %c0_i32 = arith.constant 0 : i32
    %c0_i32_0 = arith.constant 0 : i32
    %c0_i32_1 = arith.constant 0 : i32
    %c0_i32_2 = arith.constant 0 : i32
    return %c0_i32, %c0_i32_0, %c0_i32_1 : i32, i32, i32
  }
  func.func @transform_2(%arg0: i32) -> (i32, i32) {
    %c0_i32 = arith.constant 0 : i32
    %c0_i32_0 = arith.constant 0 : i32
    %c0_i32_1 = arith.constant 0 : i32
    return %c0_i32, %c0_i32_0 : i32, i32
  }
  func.func @transform_3(%arg0: i32) -> (i32, i32) {
    %c0_i32 = arith.constant 0 : i32
    %c0_i32_0 = arith.constant 0 : i32
    %c0_i32_1 = arith.constant 0 : i32
    return %c0_i32, %c0_i32_0 : i32, i32
  }
  func.func @transform_4(%arg0: i32) -> (i32, i32) {
    %c0_i32 = arith.constant 0 : i32
    %c0_i32_0 = arith.constant 0 : i32
    %c0_i32_1 = arith.constant 0 : i32
    return %c0_i32, %c0_i32_0 : i32, i32
  }
  func.func @transform_5(%arg0: i32) -> (i32, i32, i32) {
    %c0_i32 = arith.constant 0 : i32
    %c0_i32_0 = arith.constant 0 : i32
    %c0_i32_1 = arith.constant 0 : i32
    %c0_i32_2 = arith.constant 0 : i32
    return %c0_i32, %c0_i32_0, %c0_i32_1 : i32, i32, i32
  }
  func.func @transform_6(%arg0: i32) -> (i32, i32) {
    %c0_i32 = arith.constant 0 : i32
    %c0_i32_0 = arith.constant 0 : i32
    %c0_i32_1 = arith.constant 0 : i32
    return %c0_i32, %c0_i32_0 : i32, i32
  }
  func.func @transform_7(%arg0: i32) -> (i32, i32) {
    %c0_i32 = arith.constant 0 : i32
    %c0_i32_0 = arith.constant 0 : i32
    %c0_i32_1 = arith.constant 0 : i32
    return %c0_i32, %c0_i32_0 : i32, i32
  }
  func.func @transform_8(%arg0: i32) -> (i32, i32) {
    %c0_i32 = arith.constant 0 : i32
    %c0_i32_0 = arith.constant 0 : i32
    %c0_i32_1 = arith.constant 0 : i32
    return %c0_i32, %c0_i32_0 : i32, i32
  }
  func.func @transform_9(%arg0: i32) -> (i32, i32, i32) {
    %c0_i32 = arith.constant 0 : i32
    %c0_i32_0 = arith.constant 0 : i32
    %c0_i32_1 = arith.constant 0 : i32
    %c0_i32_2 = arith.constant 0 : i32
    return %c0_i32, %c0_i32_0, %c0_i32_1 : i32, i32, i32
  }
  func.func @transform_10(%arg0: i32) -> (i32, i32) {
    %c0_i32 = arith.constant 0 : i32
    %c0_i32_0 = arith.constant 0 : i32
    %c0_i32_1 = arith.constant 0 : i32
    return %c0_i32, %c0_i32_0 : i32, i32
  }
  func.func @transform_11(%arg0: i32) -> (i32, i32) {
    %c0_i32 = arith.constant 0 : i32
    %c0_i32_0 = arith.constant 0 : i32
    %c0_i32_1 = arith.constant 0 : i32
    return %c0_i32, %c0_i32_0 : i32, i32
  }
  func.func @transform_12(%arg0: i32) -> (i32, i32) {
    %c0_i32 = arith.constant 0 : i32
    %c0_i32_0 = arith.constant 0 : i32
    %c0_i32_1 = arith.constant 0 : i32
    return %c0_i32, %c0_i32_0 : i32, i32
  }
  func.func @transform_13(%arg0: i32) -> (i32, i32) {
    %c0_i32 = arith.constant 0 : i32
    %c0_i32_0 = arith.constant 0 : i32
    %c0_i32_1 = arith.constant 0 : i32
    return %c0_i32, %c0_i32_0 : i32, i32
  }
  func.func @transform_14(%arg0: i32) -> (i32, i32) {
    %c0_i32 = arith.constant 0 : i32
    %c0_i32_0 = arith.constant 0 : i32
    %c0_i32_1 = arith.constant 0 : i32
    return %c0_i32, %c0_i32_0 : i32, i32
  }
  func.func @transform_15(%arg0: i32) -> (i32, i32, i32) {
    %c0_i32 = arith.constant 0 : i32
    %c0_i32_0 = arith.constant 0 : i32
    %c0_i32_1 = arith.constant 0 : i32
    return %arg0, %c0_i32, %c0_i32_0 : i32, i32, i32
  }
}

</mosaic_0001>

<bundles_post_ra>
// kernel: wwd_forward.1
= control target key start
LH: loop header
LB: loop body
LE: loop exit
PB: predicated region body
PF: predicated region fallthrough
CT: control target
= control target key end

     0   :  { %s11507_s0 = inlined_call_operand.vmem [shape: f32[2,306,128], index: 0, kind: input, shape index: {}]   ;;  %s11508_s1 = inlined_call_operand.vmem [shape: bf16[10,128,128], index: 1, kind: input, shape index: {}]   ;;  %s11509_s2 = inlined_call_operand.vmem [shape: f32[1,128], index: 2, kind: input, shape index: {}]   ;;  %s11510_s3 = inlined_call_operand.vmem [shape: f32[1,128], index: 3, kind: input, shape index: {}]   ;;  %s11511_s4 = inlined_call_operand.vmem [shape: f32[1,128], index: 4, kind: input, shape index: {}]   ;;  %s11512_s5 = inlined_call_operand.vmem [shape: bf16[4,128,128], index: 5, kind: input, shape index: {}]   ;;  %s11513_s6 = inlined_call_operand.vmem [shape: f32[1,128], index: 6, kind: input, shape index: {}]   ;;  %s11514_s7 = inlined_call_operand.vmem [shape: f32[1,128], index: 7, kind: input, shape index: {}]   ;;  %s11515_s8 = inlined_call_operand.vmem [shape: f32[1,128], index: 8, kind: input, shape index: {}]   ;;  %s11516_s9 = inlined_call_operand.vmem [shape: bf16[17,128,256], index: 9, kind: input, shape index: {}]   ;;  %s11517_s10 = inlined_call_operand.vmem [shape: f32[1,256], index: 10, kind: input, shape index: {}]   ;;  %s11518_s11 = inlined_call_operand.vmem [shape: f32[1,256], index: 11, kind: input, shape index: {}]   ;;  %s11519_s12 = inlined_call_operand.vmem [shape: f32[1,256], index: 12, kind: input, shape index: {}]   ;;  %s11520_s13 = inlined_call_operand.vmem [shape: f32[256,128], index: 13, kind: input, shape index: {}]   ;;  %s11521_s14 = inlined_call_operand.vmem [shape: f32[1,128], index: 14, kind: input, shape index: {}]   ;;  %s11522_s15 = inlined_call_operand.hbm [shape: f32[2,1,128], index: 15, kind: output, shape index: {}]  }
   0x1   :  { %11527 = sst [smem:[#allocation13_spill]] %s11507_s0 }
   0x2   :  { %20 = vsyncpa [#allocation7], 0 }
   0x3   :  { %22 = vsyncpa [#allocation7 + $0x1], 0  ;;  %s9547_s18 = smov 0   ;;  %s9549_s19 = smov 0  }
   0x4   :  { %s9551_s20 = smov 0   ;;  %s9553_s21 = smov 0  }
   0x5 LB: > { %11528 = sst [smem:[#allocation9_spill]] %s9457_s20  ;;  %s9568_s22 = sadd.s32 4294967295, %s9461_s21   ;;  %s9461_s21 = sphi %s9553_s21, %s11536_s21   ;;  %s9457_s20 = sphi %s9551_s20, %s11538_s20   ;;  %s9453_s19 = sphi %s9549_s19, %s11540_s19   ;;  %s9449_s18 = sphi %s9547_s18, %s11539_s18  }
   0x6   : > { %s6835_s23 = sadd.s32 4294967294, %s9461_s21   ;;  %s9572_s24 = sadd.s32 1, %s9461_s21  }
   0x7   : > { %11529 = sst [smem:[#allocation10_spill]] %s9572_s24  ;;  %s355_s25 = sadd.s32 1, %s9457_s20 }
   0x8   : > { %s352_s26 = ssub.s32 %s9461_s21, %s9572_s24  ;;  %p365_p0 = scmp.ne.s32.totalorder %s9457_s20, %s9453_s19 }
   0x9   : > { %p353_p1 = scmp.eq.s32.totalorder %s352_s26, 0  ;;  %p366_p2 = scmp.eq.s32.totalorder %s9568_s22, 1 }
   0xa   : > { %p371_p3 = scmp.ne.s32.totalorder %s9453_s19, %s9449_s18  ;;  %p372_p4 = scmp.eq.s32.totalorder %s6835_s23, 1 }
   0xb   : > { %s9583_s27 = scalar_select %p353_p1, %s9457_s20, %s355_s25  }
   0xc   : > { %p9585_p5 = por %p366_p2, %p365_p0  ;;  %p9589_p6 = por %p372_p4, %p371_p3 }
   0xd   : > { %11530 = sst [smem:[#allocation11_spill]] %s9583_s27  ;;  %p6838_p7 = scmp.ge.s32.totalorder %s9461_s21, 1 }
   0xe   : > { %s11532_s29 = scalar_select %p9589_p6, 1, 0 }
   0xf   : > { %p440_p8 = scmp.lt.s32.totalorder %s9461_s21, 3 }
  0x10   : > { %11533 = sst [smem:[#allocation12_spill]] %s11532_s29 }
  0x11   : > { %p441_p9 = pnand %p6838_p7, %p440_p8 }
  0x12   : > { %v8820_v0 = vld [vmem:[%s11508_s1 + $0x40] sm:$0xff] (!%p441_p9)   ;;  %p487_p10 = scmp.lt.s32.totalorder (!%p441_p9), %s9568_s22, 1  ;;  %v8821_v1 = vld [vmem:[%s11508_s1 + $0x48] sm:$0xff] (!%p441_p9)   ;;  %v8822_v2 = vld [vmem:[%s11508_s1 + $0x50] sm:$0xff] (!%p441_p9)   ;;  %s11534_s0 = sld [smem:[#allocation13_spill]] (!%p441_p9)  ;;  %vm9464_vm0 = vmmov (!%p441_p9), 0  }
  0x13   : > { %444 = sbr.rel (%p441_p9) target bundleno = 2324 (0x914), region = 80  ;;  %8129 = vmatprep.subr.bf16.mxu0 (!%p441_p9), %v8820_v0  ;;  %v8823_v3 = vld [vmem:[%s11508_s1 + $0x58] sm:$0xff] (!%p441_p9)   ;;  %v8824_v7 = vld [vmem:[%s11508_s1 + $0x60] sm:$0xff] (!%p441_p9)   ;;  %v8825_v8 = vld [vmem:[%s11508_s1 + $0x68] sm:$0xff] (!%p441_p9)   ;;  %vm6601_vm13 = vcmask (!%p441_p9), 1040384   ;;  %s485_s26 = sand.u32 (!%p441_p9), 1, %s9453_s19  }
  0x14   : > { %8130 = vmatpush3.bf16.msra.mxu0 (!%p441_p9), %v8820_v0  ;;  %v8826_v9 = vld [vmem:[%s11508_s1 + $0x70] sm:$0xff] (!%p441_p9)   ;;  %v8827_v10 = vld [vmem:[%s11508_s1 + $0x78] sm:$0xff] (!%p441_p9)   ;;  %v8828_v13 = vld [vmem:[%s11508_s1] sm:$0xff] (!%p441_p9)   ;;  %s7867_s17 = sshll.u32 (!%p441_p9), %s9568_s22, 4  ;;  %s486_s27 = scalar_lea.vmem (!%p441_p9), [#allocation6], %s485_s26 }
  0x15   : > { %8131 = vmatprep.subr.bf16.mxu0 (!%p441_p9), %v8821_v1  ;;  %v8829_v18 = vld [vmem:[%s11508_s1 + $0x8] sm:$0xff] (!%p441_p9)   ;;  %v8830_v21 = vld [vmem:[%s11508_s1 + $0x10] sm:$0xff] (!%p441_p9)   ;;  %v8831_v26 = vld [vmem:[%s11508_s1 + $0x18] sm:$0xff] (!%p441_p9)   ;;  %s11465_s29 = scalar_lea.hbm (!%p441_p9), %s11522_s15, %s7867_s17  ;;  %s6768_s23 = scalar_lea.sflag (!%p441_p9), [#allocation7], %s485_s26 }
  0x16   : > { %v8832_v29 = vld [vmem:[%s11508_s1 + $0x20] sm:$0xff] (!%p441_p9)   ;;  %v8833_v34 = vld [vmem:[%s11508_s1 + $0x28] sm:$0xff] (!%p441_p9)   ;;  %v8834_v37 = vld [vmem:[%s11508_s1 + $0x30] sm:$0xff] (!%p441_p9)  }
  0x17   : > { %v8835_v42 = vld [vmem:[%s11508_s1 + $0x38] sm:$0xff] (!%p441_p9)   ;;  %v8836_v46 = vld [vmem:[%s11508_s1 + $0x80] sm:$0xff] (!%p441_p9)   ;;  %v8837_v54 = vld [vmem:[%s11508_s1 + $0x88] sm:$0xff] (!%p441_p9)  }
  0x18   : > { %8132 = vmatpush3.bf16.msra.mxu0 (!%p441_p9), %v8821_v1  ;;  %v8838_v58 = vld [vmem:[%s11508_s1 + $0x90] sm:$0xff] (!%p441_p9)   ;;  %v8839_v62 = vld [vmem:[%s11508_s1 + $0x98] sm:$0xff] (!%p441_p9)  }
  0x19   : > { %8133 = vmatprep.subr.bf16.mxu0 (!%p441_p9), %v8822_v2 }
  0x1a   : > { %s488_s25 = scalar_select %p487_p10, %s9568_s22, 1 }
  0x1b   : > { %s9466_s22 = smov [#allocation6]  }
  0x1c   : > { %s8777_s20 = smul.u32 312, %s488_s25  ;;  %8134 = vmatpush3.bf16.msra.mxu0 %v8822_v2  ;;  %v8840_v2 = vld [vmem:[%s11508_s1 + $0xa0] sm:$0xff]   ;;  %s9403_s16 = sshll.u32 %s9466_s22, 4  ;;  %s9404_s16 = int_to_ptr.vmem [resolvable:$false] %s9403_s16 }
  0x1d   : > { %8135 = vmatprep.subr.bf16.mxu0 %v8823_v3 }
  0x1e   : > { %s9609_s30 = scalar_lea.vmem %s11534_s0, %s8777_s20  ;;  %s6780_s0 = sshll.u32 %s486_s27, 4  ;;  %s11467_s0 = int_to_ptr.vmem [resolvable:$true] %s6780_s0 }
  0x1f   : > { %v6858_v4 = vld [vmem:[%s9609_s30 + $0x1] ss:$2 sm:$0xff]  ;;  %v6859_v5 = vld [vmem:[%s9609_s30 + $0x11] ss:$2 sm:$0xff]  ;;  %v493_v44 = vld [vmem:[%s9609_s30] ss:$2 sm:$0xff]  ;;  %p9406_p0 = scmp.lt.s32.totalorder %s11467_s0, %s9404_s16 }
  0x20   : > { %v594_v6 = vpack.c.bf16 %v6859_v5, %v6858_v4  ;;  %8136 = vmatpush3.bf16.msra.mxu0 %v8823_v3  ;;  %v6860_v11 = vld [vmem:[%s9609_s30 + $0x21] ss:$2 sm:$0xff]  ;;  %v6861_v12 = vld [vmem:[%s9609_s30 + $0x31] ss:$2 sm:$0xff]  ;;  %v6840_v45 = vld [vmem:[%s9609_s30 + $0x10] ss:$2 sm:$0xff] }
  0x21   : > { %8137 = vmatprep.subr.bf16.mxu0 %v8824_v7  ;;  %v6862_v14 = vld [vmem:[%s9609_s30 + $0x41] ss:$2 sm:$0xff]  ;;  %v6863_v15 = vld [vmem:[%s9609_s30 + $0x51] ss:$2 sm:$0xff]  ;;  %v595_v16 = vpack.c.bf16 %v6861_v12, %v6860_v11  ;;  %v530_v48 = vpack.c.bf16 %v6840_v45, %v493_v44  ;;  %v6841_v49 = vld [vmem:[%s9609_s30 + $0x20] ss:$2 sm:$0xff] }
  0x22   : > { %8145 = vmatprep.mubr.bf16.mxu0 %v594_v6  ;;  %v596_v17 = vpack.c.bf16 %v6863_v15, %v6862_v14  ;;  %v6864_v19 = vld [vmem:[%s9609_s30 + $0x61] ss:$2 sm:$0xff]  ;;  %v6865_v20 = vld [vmem:[%s9609_s30 + $0x71] ss:$2 sm:$0xff]  ;;  %v6842_v50 = vld [vmem:[%s9609_s30 + $0x30] ss:$2 sm:$0xff] }
  0x23   : > { %v6866_v22 = vld [vmem:[%s9609_s30 + $0x81] ss:$2 sm:$0xff]  ;;  %v6867_v23 = vld [vmem:[%s9609_s30 + $0x91] ss:$2 sm:$0xff]  ;;  %v597_v24 = vpack.c.bf16 %v6865_v20, %v6864_v19  ;;  %v6843_v51 = vld [vmem:[%s9609_s30 + $0x40] ss:$2 sm:$0xff]  ;;  %v531_v53 = vpack.c.bf16 %v6842_v50, %v6841_v49 }
  0x24   : > { %8138 = vmatpush3.bf16.msra.mxu0 %v8824_v7  ;;  %v598_v25 = vpack.c.bf16 %v6867_v23, %v6866_v22  ;;  %v6868_v27 = vld [vmem:[%s9609_s30 + $0xa1] ss:$2 sm:$0xff]  ;;  %v6869_v28 = vld [vmem:[%s9609_s30 + $0xb1] ss:$2 sm:$0xff]  ;;  %v6844_v52 = vld [vmem:[%s9609_s30 + $0x50] ss:$2 sm:$0xff] }
  0x25   : > { %8139 = vmatprep.subr.bf16.mxu0 %v8825_v8  ;;  %v6870_v30 = vld [vmem:[%s9609_s30 + $0xc1] ss:$2 sm:$0xff]  ;;  %v6871_v31 = vld [vmem:[%s9609_s30 + $0xd1] ss:$2 sm:$0xff]  ;;  %v599_v32 = vpack.c.bf16 %v6869_v28, %v6868_v27  ;;  %v532_v55 = vpack.c.bf16 %v6844_v52, %v6843_v51  ;;  %v6845_v56 = vld [vmem:[%s9609_s30 + $0x60] ss:$2 sm:$0xff] }
  0x26   : > { %v600_v33 = vpack.c.bf16 %v6871_v31, %v6870_v30  ;;  %v6872_v35 = vld [vmem:[%s9609_s30 + $0xe1] ss:$2 sm:$0xff]  ;;  %v6873_v36 = vld [vmem:[%s9609_s30 + $0xf1] ss:$2 sm:$0xff]  ;;  %v6846_v57 = vld [vmem:[%s9609_s30 + $0x70] ss:$2 sm:$0xff] }
  0x27   : > { %v6874_v38 = vld [vmem:[%s9609_s30 + $0x101] ss:$2 sm:$0xff]  ;;  %v6875_v39 = vld [vmem:[%s9609_s30 + $0x111] ss:$2 sm:$0xff]  ;;  %v601_v40 = vpack.c.bf16 %v6873_v36, %v6872_v35  ;;  %v6847_v59 = vld [vmem:[%s9609_s30 + $0x80] ss:$2 sm:$0xff]  ;;  %v533_v61 = vpack.c.bf16 %v6846_v57, %v6845_v56 }
  0x28   : > { %8140 = vmatpush3.bf16.msra.mxu0 %v8825_v8  ;;  %v602_v41 = vpack.c.bf16 %v6875_v39, %v6874_v38  ;;  %v6876_v43 = vld [vmem:[%s9609_s30 + $0x121] ss:$2 sm:$0x1f]  ;;  %v6848_v60 = vld [vmem:[%s9609_s30 + $0x90] ss:$2 sm:$0xff]  ;;  %s9399_s25 = scalar_lea.vmem %s11467_s0, 16 }
  0x29   : > { %8141 = vmatprep.subr.bf16.mxu0 %v8826_v9  ;;  %v603_v47 = vpack.c.bf16 %v6876_v43, %v6876_v43  ;;  %v534_v63 = vpack.c.bf16 %v6848_v60, %v6847_v59  ;;  %v6849_v0 = vld [vmem:[%s9609_s30 + $0xa0] ss:$2 sm:$0xff]  ;;  %v6850_v1 = vld [vmem:[%s9609_s30 + $0xb0] ss:$2 sm:$0xff]  ;;  %v6954_v59 = vld [vmem:[%s9609_s30 + $0x23] ss:$2 sm:$0xff]  ;;  %p9400_p11 = scmp.ne.s32.totalorder %s11467_s0, %s9399_s25 }
  0x2a   : > { %v6851_v3 = vld [vmem:[%s9609_s30 + $0xc0] ss:$2 sm:$0xff]  ;;  %v6852_v4 = vld [vmem:[%s9609_s30 + $0xd0] ss:$2 sm:$0xff]  ;;  %v535_v5 = vpack.c.bf16 %v6850_v1, %v6849_v0  ;;  %v6955_v60 = vld [vmem:[%s9609_s30 + $0x33] ss:$2 sm:$0xff] }
  0x2b   : > { %v8841_v6 = vld [vmem:[%s11508_s1 + $0xa8] sm:$0xff]   ;;  %v536_v7 = vpack.c.bf16 %v6852_v4, %v6851_v3  ;;  %v6856_v12 = vld [vmem:[%s9609_s30 + $0x110] ss:$2 sm:$0xff]  ;;  %v8844_v19 = vld [vmem:[%s11508_s1 + $0xc0] sm:$0xff]   ;;  %p9401_p12 = pnand %p9400_p11, %p9585_p5 }
  0x2c   : > { %8142 = vmatpush3.bf16.msra.mxu0 %v8826_v9  ;;  %v6853_v8 = vld [vmem:[%s9609_s30 + $0xe0] ss:$2 sm:$0xff]  ;;  %v6854_v9 = vld [vmem:[%s9609_s30 + $0xf0] ss:$2 sm:$0xff]  ;;  %v6959_v3 = vld [vmem:[%s9609_s30 + $0x73] ss:$2 sm:$0xff] }
  0x2d   : > { %8143 = vmatprep.subr.bf16.mxu0 %v8827_v10  ;;  %v6855_v11 = vld [vmem:[%s9609_s30 + $0x100] ss:$2 sm:$0xff]  ;;  %v8843_v14 = vld [vmem:[%s11508_s1 + $0xb8] sm:$0xff]   ;;  %v8846_v31 = vld [vmem:[%s11508_s1 + $0xd0] sm:$0xff]   ;;  %p9402_p13 = pneg %p9401_p12 }
  0x2e   : > { %v538_v15 = vpack.c.bf16 %v6856_v12, %v6855_v11  ;;  %v6911_v22 = vld [vmem:[%s9609_s30 + $0x22] ss:$2 sm:$0xff]  ;;  %v6912_v23 = vld [vmem:[%s9609_s30 + $0x32] ss:$2 sm:$0xff]  ;;  %v6963_v11 = vld [vmem:[%s9609_s30 + $0xb3] ss:$2 sm:$0xff] }
  0x2f   : > { %v8845_v27 = vld [vmem:[%s11508_s1 + $0xc8] sm:$0xff]   ;;  %v6916_v30 = vld [vmem:[%s9609_s30 + $0x72] ss:$2 sm:$0xff] }
  0x30   : > { %8144 = vmatpush3.bf16.msra.mxu0 %v8827_v10  ;;  %v8842_v10 = vld [vmem:[%s11508_s1 + $0xb0] sm:$0xff]   ;;  %v8847_v35 = vld [vmem:[%s11508_s1 + $0xd8] sm:$0xff]   ;;  %v8848_v39 = vld [vmem:[%s11508_s1 + $0xe0] sm:$0xff]  }
  0x31   : > { %8165 = vmatprep.subr.bf16.mxu0 %v8828_v13  ;;  %v6920_v38 = vld [vmem:[%s9609_s30 + $0xb2] ss:$2 sm:$0xff]  ;;  %v8849_v43 = vld [vmem:[%s11508_s1 + $0xe8] sm:$0xff]  }
  0x32   : > { %v6923_v45 = vld [vmem:[%s9609_s30 + $0xe2] ss:$2 sm:$0xff]  ;;  %v6926_v49 = vld [vmem:[%s9609_s30 + $0x112] ss:$2 sm:$0xff] }
  0x33   : > { %8146 = vmatmul.mubr.bf16.vlgmr.msra.gmra.mrb[0].mxu0 %v595_v16  ;;  %v6857_v16 = vld [vmem:[%s9609_s30 + $0x120] ss:$2 sm:$0x1f]  ;;  %v8851_v51 = vld [vmem:[%s11508_s1 + $0xf8] sm:$0xff]   ;;  %v8854_v4 = vld [vmem:[%s11508_s1 + $0x110] sm:$0xff]  }
  0x34   : > { %8166 = vmatpush3.bf16.msra.mxu0 %v8828_v13  ;;  %8149 = vmatprep.mubr.bf16.mxu0 %v596_v17  ;;  %v537_v13 = vpack.c.bf16 %v6854_v9, %v6853_v8  ;;  %v6909_v17 = vld [vmem:[%s9609_s30 + $0x2] ss:$2 sm:$0xff]  ;;  %v539_v20 = vpack.c.bf16 %v6857_v16, %v6857_v16  ;;  %v8855_v8 = vld [vmem:[%s11508_s1 + $0x118] sm:$0xff]  }
  0x35   : > { %8167 = vmatprep.subr.bf16.mxu0 %v8829_v18  ;;  %v8852_v56 = vld [vmem:[%s11508_s1 + $0x100] sm:$0xff]   ;;  %v8853_v0 = vld [vmem:[%s11508_s1 + $0x108] sm:$0xff]  }
  0x36   : > { %v8856_v12 = vld [vmem:[%s11508_s1 + $0x120] sm:$0xff]   ;;  %v8857_v16 = vld [vmem:[%s11508_s1 + $0x128] sm:$0xff]  }
  0x38   : > { %8168 = vmatpush3.bf16.msra.mxu0 %v8829_v18  ;;  %v6910_v18 = vld [vmem:[%s9609_s30 + $0x12] ss:$2 sm:$0xff] }
  0x39   : > { %8169 = vmatprep.subr.bf16.mxu0 %v8830_v21 }
  0x3b   : > { %8150 = vmatmul.mubr.bf16.gmra.mrb[4].mxu0 %v597_v24  ;;  %v6913_v24 = vld [vmem:[%s9609_s30 + $0x42] ss:$2 sm:$0xff] }
  0x3c   : > { %8170 = vmatpush3.bf16.msra.mxu0 %v8830_v21  ;;  %8153 = vmatprep.mubr.bf16.mxu0 %v598_v25  ;;  %v979_v21 = vpack.c.bf16 %v6910_v18, %v6909_v17  ;;  %v6914_v25 = vld [vmem:[%s9609_s30 + $0x52] ss:$2 sm:$0xff]  ;;  %v6966_v18 = vld [vmem:[%s9609_s30 + $0xe3] ss:$2 sm:$0xff] }
  0x3d   : > { %8171 = vmatprep.subr.bf16.mxu0 %v8831_v26  ;;  %v981_v28 = vpack.c.bf16 %v6914_v25, %v6913_v24  ;;  %v8859_v24 = vld [vmem:[%s11508_s1 + $0x138] sm:$0xff]  }
  0x40   : > { %8172 = vmatpush3.bf16.msra.mxu0 %v8831_v26  ;;  %v980_v26 = vpack.c.bf16 %v6912_v23, %v6911_v22  ;;  %v6969_v22 = vld [vmem:[%s9609_s30 + $0x113] ss:$2 sm:$0xff] }
  0x41   : > { %8173 = vmatprep.subr.bf16.mxu0 %v8832_v29 }
  0x43   : > { %8154 = vmatmul.mubr.bf16.gmra.mrb[8].mxu0 %v599_v32  ;;  %v6917_v32 = vld [vmem:[%s9609_s30 + $0x82] ss:$2 sm:$0xff] }
  0x44   : > { %8174 = vmatpush3.bf16.msra.mxu0 %v8832_v29  ;;  %8157 = vmatprep.mubr.bf16.mxu0 %v600_v33  ;;  %v6915_v29 = vld [vmem:[%s9609_s30 + $0x62] ss:$2 sm:$0xff]  ;;  %v6918_v33 = vld [vmem:[%s9609_s30 + $0x92] ss:$2 sm:$0xff] }
  0x45   : > { %8175 = vmatprep.subr.bf16.mxu0 %v8833_v34  ;;  %v983_v36 = vpack.c.bf16 %v6918_v33, %v6917_v32  ;;  %v6997_v32 = vld [vmem:[%s9609_s30 + $0x24] ss:$2 sm:$0xff]  ;;  %v6998_v33 = vld [vmem:[%s9609_s30 + $0x34] ss:$2 sm:$0xff] }
  0x48   : > { %8176 = vmatpush3.bf16.msra.mxu0 %v8833_v34  ;;  %v982_v34 = vpack.c.bf16 %v6916_v30, %v6915_v29  ;;  %v8860_v29 = vld [vmem:[%s11508_s1 + $0x140] sm:$0xff]  }
  0x49   : > { %8177 = vmatprep.subr.bf16.mxu0 %v8834_v37 }
  0x4b   : > { %8158 = vmatmul.mubr.bf16.gmra.mrb[12].mxu0 %v601_v40  ;;  %v6921_v40 = vld [vmem:[%s9609_s30 + $0xc2] ss:$2 sm:$0xff] }
  0x4c   : > { %8161 = vmatprep.mubr.bf16.mxu0 %v602_v41  ;;  %8178 = vmatpush3.bf16.msra.mxu0 %v8834_v37  ;;  %v6919_v37 = vld [vmem:[%s9609_s30 + $0xa2] ss:$2 sm:$0xff]  ;;  %v6922_v41 = vld [vmem:[%s9609_s30 + $0xd2] ss:$2 sm:$0xff] }
  0x4d   : > { %8179 = vmatprep.subr.bf16.mxu0 %v8835_v42  ;;  %v985_v44 = vpack.c.bf16 %v6922_v41, %v6921_v40  ;;  %v7002_v40 = vld [vmem:[%s9609_s30 + $0x74] ss:$2 sm:$0xff] }
  0x4e   : > { %v8862_v41 = vld [vmem:[%s11508_s1 + $0x150] sm:$0xff]  }
  0x50   : > { %8180 = vmatpush3.bf16.msra.mxu0 %v8835_v42  ;;  %v984_v42 = vpack.c.bf16 %v6920_v38, %v6919_v37  ;;  %v8861_v37 = vld [vmem:[%s11508_s1 + $0x148] sm:$0xff]  }
  0x51   : > { %8201 = vmatprep.subr.bf16.mxu0 %v8836_v46 }
  0x53   : > { %8162 = vmatmul.mubr.bf16.gmra.mrb[16].mxu0 %v603_v47  ;;  %v8850_v47 = vld [vmem:[%s11508_s1 + $0xf0] sm:$0xff]  }
  0x54   : > { %8181 = vmatprep.mubr.bf16.mxu0 %v530_v48  ;;  %v6925_v48 = vld [vmem:[%s9609_s30 + $0x102] ss:$2 sm:$0xff] }
  0x55   : > { %v987_v52 = vpack.c.bf16 %v6926_v49, %v6925_v48  ;;  %v7006_v48 = vld [vmem:[%s9609_s30 + $0xb4] ss:$2 sm:$0xff] }
  0x56   : > { %v8864_v49 = vld [vmem:[%s11508_s1 + $0x160] sm:$0xff]  }
  0x5b   : > { %8182 = vmatmul.mubr.bf16.vlgmr.msra.gmra.mrb[0].mxu0 %v531_v53  ;;  %v6927_v53 = vld [vmem:[%s9609_s30 + $0x122] ss:$2 sm:$0x1f] }
  0x5c   : > { %8202 = vmatpush3.bf16.msra.mxu0 %v8836_v46  ;;  %8185 = vmatprep.mubr.bf16.mxu0 %v532_v55  ;;  %v6924_v46 = vld [vmem:[%s9609_s30 + $0xf2] ss:$2 sm:$0xff]  ;;  %v6953_v55 = vld [vmem:[%s9609_s30 + $0x13] ss:$2 sm:$0xff]  ;;  %v988_v57 = vpack.c.bf16 %v6927_v53, %v6927_v53  ;;  %v8865_v53 = vld [vmem:[%s11508_s1 + $0x168] sm:$0xff]  }
  0x5d   : > { %8203 = vmatprep.subr.bf16.mxu0 %v8837_v54  ;;  %v986_v50 = vpack.c.bf16 %v6924_v46, %v6923_v45  ;;  %v8863_v45 = vld [vmem:[%s11508_s1 + $0x158] sm:$0xff]  }
  0x60   : > { %8204 = vmatpush3.bf16.msra.mxu0 %v8837_v54  ;;  %v6952_v54 = vld [vmem:[%s9609_s30 + $0x3] ss:$2 sm:$0xff] }
  0x61   : > { %8205 = vmatprep.subr.bf16.mxu0 %v8838_v58 }
  0x63   : > { %8186 = vmatmul.mubr.bf16.gmra.mrb[4].mxu0 %v533_v61  ;;  %v6956_v61 = vld [vmem:[%s9609_s30 + $0x43] ss:$2 sm:$0xff] }
  0x64   : > { %8206 = vmatpush3.bf16.msra.mxu0 %v8838_v58  ;;  %8189 = vmatprep.mubr.bf16.mxu0 %v534_v63  ;;  %v1223_v58 = vpack.c.bf16 %v6953_v55, %v6952_v54  ;;  %v1224_v63 = vpack.c.bf16 %v6955_v60, %v6954_v59  ;;  %v7009_v55 = vld [vmem:[%s9609_s30 + $0xe4] ss:$2 sm:$0xff]  ;;  %v7012_v59 = vld [vmem:[%s9609_s30 + $0x114] ss:$2 sm:$0xff] }
  0x65   : > { %8207 = vmatprep.subr.bf16.mxu0 %v8839_v62 }
  0x68   : > { %8208 = vmatpush3.bf16.msra.mxu0 %v8839_v62  ;;  %v6957_v62 = vld [vmem:[%s9609_s30 + $0x53] ss:$2 sm:$0xff] }
  0x69   : > { %8209 = vmatprep.subr.bf16.mxu0 %v8840_v2  ;;  %v1225_v1 = vpack.c.bf16 %v6957_v62, %v6956_v61  ;;  %v8867_v61 = vld [vmem:[%s11508_s1 + $0x178] sm:$0xff]  }
  0x6b   : > { %8190 = vmatmul.mubr.bf16.gmra.mrb[8].mxu0 %v535_v5  ;;  %v6960_v5 = vld [vmem:[%s9609_s30 + $0x83] ss:$2 sm:$0xff] }
  0x6c   : > { %8210 = vmatpush3.bf16.msra.mxu0 %v8840_v2  ;;  %8193 = vmatprep.mubr.bf16.mxu0 %v536_v7  ;;  %v6958_v2 = vld [vmem:[%s9609_s30 + $0x63] ss:$2 sm:$0xff] }
  0x6d   : > { %8211 = vmatprep.subr.bf16.mxu0 %v8841_v6  ;;  %v1226_v7 = vpack.c.bf16 %v6959_v3, %v6958_v2  ;;  %v8868_v2 = vld [vmem:[%s11508_s1 + $0x180] sm:$0xff]  }
  0x70   : > { %8212 = vmatpush3.bf16.msra.mxu0 %v8841_v6  ;;  %v6961_v6 = vld [vmem:[%s9609_s30 + $0x93] ss:$2 sm:$0xff] }
  0x71   : > { %8213 = vmatprep.subr.bf16.mxu0 %v8842_v10  ;;  %v1227_v9 = vpack.c.bf16 %v6961_v6, %v6960_v5  ;;  %v7040_v5 = vld [vmem:[%s9609_s30 + $0x25] ss:$2 sm:$0xff]  ;;  %v7041_v6 = vld [vmem:[%s9609_s30 + $0x35] ss:$2 sm:$0xff] }
  0x73   : > { %8194 = vmatmul.mubr.bf16.gmra.mrb[12].mxu0 %v537_v13  ;;  %v6964_v13 = vld [vmem:[%s9609_s30 + $0xc3] ss:$2 sm:$0xff] }
  0x74   : > { %8197 = vmatprep.mubr.bf16.mxu0 %v538_v15  ;;  %8214 = vmatpush3.bf16.msra.mxu0 %v8842_v10  ;;  %v6962_v10 = vld [vmem:[%s9609_s30 + $0xa3] ss:$2 sm:$0xff] }
  0x75   : > { %8215 = vmatprep.subr.bf16.mxu0 %v8843_v14  ;;  %v1228_v15 = vpack.c.bf16 %v6963_v11, %v6962_v10  ;;  %v8869_v10 = vld [vmem:[%s11508_s1 + $0x188] sm:$0xff]  }
  0x78   : > { %8216 = vmatpush3.bf16.msra.mxu0 %v8843_v14  ;;  %v6965_v14 = vld [vmem:[%s9609_s30 + $0xd3] ss:$2 sm:$0xff] }
  0x79   : > { %8237 = vmatprep.subr.bf16.mxu0 %v8844_v19  ;;  %v1229_v17 = vpack.c.bf16 %v6965_v14, %v6964_v13  ;;  %v7045_v13 = vld [vmem:[%s9609_s30 + $0x75] ss:$2 sm:$0xff] }
  0x7a   : > { %v8870_v14 = vld [vmem:[%s11508_s1 + $0x190] sm:$0xff]  }
  0x7b   : > { %8198 = vmatmul.mubr.bf16.gmra.mrb[20].mxu0 %v539_v20  ;;  %v8858_v20 = vld [vmem:[%s11508_s1 + $0x130] sm:$0xff]  }
  0x7c   : > { %8217 = vmatprep.mubr.bf16.mxu0 %v979_v21  ;;  %v6968_v21 = vld [vmem:[%s9609_s30 + $0x103] ss:$2 sm:$0xff] }
  0x7d   : > { %v1231_v25 = vpack.c.bf16 %v6969_v22, %v6968_v21  ;;  %v7049_v21 = vld [vmem:[%s9609_s30 + $0xb5] ss:$2 sm:$0xff] }
  0x7e   : > { %v8872_v22 = vld [vmem:[%s11508_s1 + $0x1a0] sm:$0xff]  }
  0x83   : > { %8218 = vmatmul.mubr.bf16.vlgmr.msra.gmra.mrb[0].mxu0 %v980_v26  ;;  %v6970_v26 = vld [vmem:[%s9609_s30 + $0x123] ss:$2 sm:$0x1f] }
  0x84   : > { %8238 = vmatpush3.bf16.msra.mxu0 %v8844_v19  ;;  %8221 = vmatprep.mubr.bf16.mxu0 %v981_v28  ;;  %v6967_v19 = vld [vmem:[%s9609_s30 + $0xf3] ss:$2 sm:$0xff]  ;;  %v6996_v28 = vld [vmem:[%s9609_s30 + $0x14] ss:$2 sm:$0xff]  ;;  %v1232_v30 = vpack.c.bf16 %v6970_v26, %v6970_v26 }
  0x85   : > { %8239 = vmatprep.subr.bf16.mxu0 %v8845_v27  ;;  %v1230_v23 = vpack.c.bf16 %v6967_v19, %v6966_v18  ;;  %v8871_v18 = vld [vmem:[%s11508_s1 + $0x198] sm:$0xff]  }
  0x88   : > { %8240 = vmatpush3.bf16.msra.mxu0 %v8845_v27  ;;  %v6995_v27 = vld [vmem:[%s9609_s30 + $0x4] ss:$2 sm:$0xff] }
  0x89   : > { %8241 = vmatprep.subr.bf16.mxu0 %v8846_v31 }
  0x8b   : > { %8222 = vmatmul.mubr.bf16.gmra.mrb[4].mxu0 %v982_v34  ;;  %v6999_v34 = vld [vmem:[%s9609_s30 + $0x44] ss:$2 sm:$0xff] }
  0x8c   : > { %8242 = vmatpush3.bf16.msra.mxu0 %v8846_v31  ;;  %8225 = vmatprep.mubr.bf16.mxu0 %v983_v36  ;;  %v1467_v31 = vpack.c.bf16 %v6996_v28, %v6995_v27  ;;  %v1468_v36 = vpack.c.bf16 %v6998_v33, %v6997_v32  ;;  %v8873_v27 = vld [vmem:[%s11508_s1 + $0x1a8] sm:$0xff]   ;;  %v7055_v32 = vld [vmem:[%s9609_s30 + $0x115] ss:$2 sm:$0xff] }
  0x8d   : > { %8243 = vmatprep.subr.bf16.mxu0 %v8847_v35  ;;  %v7052_v28 = vld [vmem:[%s9609_s30 + $0xe5] ss:$2 sm:$0xff] }
  0x90   : > { %8244 = vmatpush3.bf16.msra.mxu0 %v8847_v35  ;;  %v7000_v35 = vld [vmem:[%s9609_s30 + $0x54] ss:$2 sm:$0xff] }
  0x91   : > { %8245 = vmatprep.subr.bf16.mxu0 %v8848_v39  ;;  %v1469_v38 = vpack.c.bf16 %v7000_v35, %v6999_v34  ;;  %v8875_v35 = vld [vmem:[%s11508_s1 + $0x1b8] sm:$0xff]  }
  0x93   : > { %8226 = vmatmul.mubr.bf16.gmra.mrb[8].mxu0 %v984_v42  ;;  %v7003_v42 = vld [vmem:[%s9609_s30 + $0x84] ss:$2 sm:$0xff] }
  0x94   : > { %8246 = vmatpush3.bf16.msra.mxu0 %v8848_v39  ;;  %8229 = vmatprep.mubr.bf16.mxu0 %v985_v44  ;;  %v7001_v39 = vld [vmem:[%s9609_s30 + $0x64] ss:$2 sm:$0xff] }
  0x95   : > { %8247 = vmatprep.subr.bf16.mxu0 %v8849_v43  ;;  %v1470_v44 = vpack.c.bf16 %v7002_v40, %v7001_v39  ;;  %v8876_v39 = vld [vmem:[%s11508_s1 + $0x1c0] sm:$0xff]  }
  0x98   : > { %8248 = vmatpush3.bf16.msra.mxu0 %v8849_v43  ;;  %v7004_v43 = vld [vmem:[%s9609_s30 + $0x94] ss:$2 sm:$0xff] }
  0x99   : > { %8249 = vmatprep.subr.bf16.mxu0 %v8850_v47  ;;  %v1471_v46 = vpack.c.bf16 %v7004_v43, %v7003_v42  ;;  %v7083_v42 = vld [vmem:[%s9609_s30 + $0x26] ss:$2 sm:$0xff]  ;;  %v7084_v43 = vld [vmem:[%s9609_s30 + $0x36] ss:$2 sm:$0xff] }
  0x9b   : > { %8230 = vmatmul.mubr.bf16.gmra.mrb[12].mxu0 %v986_v50  ;;  %v7007_v50 = vld [vmem:[%s9609_s30 + $0xc4] ss:$2 sm:$0xff] }
  0x9c   : > { %8233 = vmatprep.mubr.bf16.mxu0 %v987_v52  ;;  %8250 = vmatpush3.bf16.msra.mxu0 %v8850_v47  ;;  %v7005_v47 = vld [vmem:[%s9609_s30 + $0xa4] ss:$2 sm:$0xff] }
  0x9d   : > { %8251 = vmatprep.subr.bf16.mxu0 %v8851_v51  ;;  %v1472_v52 = vpack.c.bf16 %v7006_v48, %v7005_v47  ;;  %v8877_v48 = vld [vmem:[%s11508_s1 + $0x1c8] sm:$0xff]  }
  0xa0   : > { %8252 = vmatpush3.bf16.msra.mxu0 %v8851_v51  ;;  %v7008_v51 = vld [vmem:[%s9609_s30 + $0xd4] ss:$2 sm:$0xff] }
  0xa1   : > { %8273 = vmatprep.subr.bf16.mxu0 %v8852_v56  ;;  %v1473_v54 = vpack.c.bf16 %v7008_v51, %v7007_v50  ;;  %v7088_v50 = vld [vmem:[%s9609_s30 + $0x76] ss:$2 sm:$0xff] }
  0xa2   : > { %v8878_v51 = vld [vmem:[%s11508_s1 + $0x1d0] sm:$0xff]  }
  0xa3   : > { %8234 = vmatmul.mubr.bf16.gmra.mrb[24].mxu0 %v988_v57  ;;  %v8866_v57 = vld [vmem:[%s11508_s1 + $0x170] sm:$0xff]  }
  0xa4   : > { %8253 = vmatprep.mubr.bf16.mxu0 %v1223_v58  ;;  %v7011_v58 = vld [vmem:[%s9609_s30 + $0x104] ss:$2 sm:$0xff] }
  0xa5   : > { %v1475_v62 = vpack.c.bf16 %v7012_v59, %v7011_v58 }
  0xab   : > { %8254 = vmatmul.mubr.bf16.vlgmr.msra.gmra.mrb[0].mxu0 %v1224_v63  ;;  %v7013_v63 = vld [vmem:[%s9609_s30 + $0x124] ss:$2 sm:$0x1f] }
  0xac   : > { %8274 = vmatpush3.bf16.msra.mxu0 %v8852_v56  ;;  %8257 = vmatprep.mubr.bf16.mxu0 %v1225_v1  ;;  %v7010_v56 = vld [vmem:[%s9609_s30 + $0xf4] ss:$2 sm:$0xff]  ;;  %v7039_v1 = vld [vmem:[%s9609_s30 + $0x15] ss:$2 sm:$0xff]  ;;  %v1476_v3 = vpack.c.bf16 %v7013_v63, %v7013_v63 }
  0xad   : > { %8275 = vmatprep.subr.bf16.mxu0 %v8853_v0  ;;  %v1474_v60 = vpack.c.bf16 %v7010_v56, %v7009_v55  ;;  %v8880_v63 = vld [vmem:[%s11508_s1 + $0x1e0] sm:$0xff]  }
  0xb0   : > { %8276 = vmatpush3.bf16.msra.mxu0 %v8853_v0  ;;  %v7038_v0 = vld [vmem:[%s9609_s30 + $0x5] ss:$2 sm:$0xff] }
  0xb1   : > { %8277 = vmatprep.subr.bf16.mxu0 %v8854_v4 }
  0xb3   : > { %8258 = vmatmul.mubr.bf16.gmra.mrb[4].mxu0 %v1226_v7  ;;  %v7042_v7 = vld [vmem:[%s9609_s30 + $0x45] ss:$2 sm:$0xff] }
  0xb4   : > { %8278 = vmatpush3.bf16.msra.mxu0 %v8854_v4  ;;  %8261 = vmatprep.mubr.bf16.mxu0 %v1227_v9  ;;  %v1711_v4 = vpack.c.bf16 %v7039_v1, %v7038_v0  ;;  %v1712_v9 = vpack.c.bf16 %v7041_v6, %v7040_v5  ;;  %v7093_v0 = vld [vmem:[%s9609_s30 + $0xc6] ss:$2 sm:$0xff]  ;;  %v7094_v1 = vld [vmem:[%s9609_s30 + $0xd6] ss:$2 sm:$0xff] }
  0xb5   : > { %8279 = vmatprep.subr.bf16.mxu0 %v8855_v8  ;;  %v7095_v5 = vld [vmem:[%s9609_s30 + $0xe6] ss:$2 sm:$0xff]  ;;  %v7096_v6 = vld [vmem:[%s9609_s30 + $0xf6] ss:$2 sm:$0xff] }
  0xb8   : > { %8280 = vmatpush3.bf16.msra.mxu0 %v8855_v8  ;;  %v7043_v8 = vld [vmem:[%s9609_s30 + $0x55] ss:$2 sm:$0xff] }
  0xb9   : > { %8281 = vmatprep.subr.bf16.mxu0 %v8856_v12  ;;  %v1713_v11 = vpack.c.bf16 %v7043_v8, %v7042_v7  ;;  %v8882_v7 = vld [vmem:[%s11508_s1 + $0x1f0] sm:$0xff]  }
  0xba   : > { %v7097_v8 = vld [vmem:[%s9609_s30 + $0x106] ss:$2 sm:$0xff] }
  0xbb   : > { %8262 = vmatmul.mubr.bf16.gmra.mrb[8].mxu0 %v1228_v15  ;;  %v7046_v15 = vld [vmem:[%s9609_s30 + $0x85] ss:$2 sm:$0xff] }
  0xbc   : > { %8282 = vmatpush3.bf16.msra.mxu0 %v8856_v12  ;;  %8265 = vmatprep.mubr.bf16.mxu0 %v1229_v17  ;;  %v7044_v12 = vld [vmem:[%s9609_s30 + $0x65] ss:$2 sm:$0xff] }
  0xbd   : > { %8283 = vmatprep.subr.bf16.mxu0 %v8857_v16  ;;  %v1714_v17 = vpack.c.bf16 %v7045_v13, %v7044_v12  ;;  %v8883_v12 = vld [vmem:[%s11508_s1 + $0x1f8] sm:$0xff]   ;;  %v7099_v13 = vld [vmem:[%s9609_s30 + $0x126] ss:$2 sm:$0x1f] }
  0xc0   : > { %8284 = vmatpush3.bf16.msra.mxu0 %v8857_v16  ;;  %v7047_v16 = vld [vmem:[%s9609_s30 + $0x95] ss:$2 sm:$0xff] }
  0xc1   : > { %8285 = vmatprep.subr.bf16.mxu0 %v8858_v20  ;;  %v1715_v19 = vpack.c.bf16 %v7047_v16, %v7046_v15  ;;  %v7125_v15 = vld [vmem:[%s9609_s30 + $0x17] ss:$2 sm:$0xff] }
  0xc2   : > { %v8884_v16 = vld [vmem:[%s11508_s1 + $0x200] sm:$0xff]  }
  0xc3   : > { %8266 = vmatmul.mubr.bf16.gmra.mrb[12].mxu0 %v1230_v23  ;;  %v7050_v23 = vld [vmem:[%s9609_s30 + $0xc5] ss:$2 sm:$0xff] }
  0xc4   : > { %8269 = vmatprep.mubr.bf16.mxu0 %v1231_v25  ;;  %8286 = vmatpush3.bf16.msra.mxu0 %v8858_v20  ;;  %v7048_v20 = vld [vmem:[%s9609_s30 + $0xa5] ss:$2 sm:$0xff] }
  0xc5   : > { %8287 = vmatprep.subr.bf16.mxu0 %v8859_v24  ;;  %v1716_v25 = vpack.c.bf16 %v7049_v21, %v7048_v20  ;;  %v7127_v20 = vld [vmem:[%s9609_s30 + $0x37] ss:$2 sm:$0xff]  ;;  %v7128_v21 = vld [vmem:[%s9609_s30 + $0x47] ss:$2 sm:$0xff] }
  0xc8   : > { %8288 = vmatpush3.bf16.msra.mxu0 %v8859_v24  ;;  %v7051_v24 = vld [vmem:[%s9609_s30 + $0xd5] ss:$2 sm:$0xff] }
  0xc9   : > { %8309 = vmatprep.subr.bf16.mxu0 %v8860_v29  ;;  %v1717_v26 = vpack.c.bf16 %v7051_v24, %v7050_v23 }
  0xcb   : > { %8270 = vmatmul.mubr.bf16.gmra.mrb[28].mxu0 %v1232_v30  ;;  %v8874_v30 = vld [vmem:[%s11508_s1 + $0x1b0] sm:$0xff]  }
  0xcc   : > { %8289 = vmatprep.mubr.bf16.mxu0 %v1467_v31  ;;  %v7054_v31 = vld [vmem:[%s9609_s30 + $0x105] ss:$2 sm:$0xff] }
  0xcd   : > { %v1719_v34 = vpack.c.bf16 %v7055_v32, %v7054_v31 }
  0xd3   : > { %8290 = vmatmul.mubr.bf16.vlgmr.msra.gmra.mrb[0].mxu0 %v1468_v36  ;;  %v7056_v36 = vld [vmem:[%s9609_s30 + $0x125] ss:$2 sm:$0x1f] }
  0xd4   : > { %8310 = vmatpush3.bf16.msra.mxu0 %v8860_v29  ;;  %8293 = vmatprep.mubr.bf16.mxu0 %v1469_v38  ;;  %v7053_v29 = vld [vmem:[%s9609_s30 + $0xf5] ss:$2 sm:$0xff]  ;;  %v7082_v38 = vld [vmem:[%s9609_s30 + $0x16] ss:$2 sm:$0xff]  ;;  %v1720_v40 = vpack.c.bf16 %v7056_v36, %v7056_v36 }
  0xd5   : > { %8311 = vmatprep.subr.bf16.mxu0 %v8861_v37  ;;  %v1718_v33 = vpack.c.bf16 %v7053_v29, %v7052_v28  ;;  %v8886_v28 = vld [vmem:[%s11508_s1 + $0x210] sm:$0xff]  }
  0xd6   : > { %v7132_v29 = vld [vmem:[%s9609_s30 + $0x87] ss:$2 sm:$0xff] }
  0xd8   : > { %8312 = vmatpush3.bf16.msra.mxu0 %v8861_v37  ;;  %v7081_v37 = vld [vmem:[%s9609_s30 + $0x6] ss:$2 sm:$0xff] }
  0xd9   : > { %8313 = vmatprep.subr.bf16.mxu0 %v8862_v41 }
  0xdb   : > { %8294 = vmatmul.mubr.bf16.gmra.mrb[4].mxu0 %v1470_v44  ;;  %v7085_v44 = vld [vmem:[%s9609_s30 + $0x46] ss:$2 sm:$0xff] }
  0xdc   : > { %8314 = vmatpush3.bf16.msra.mxu0 %v8862_v41  ;;  %8297 = vmatprep.mubr.bf16.mxu0 %v1471_v46  ;;  %v1955_v41 = vpack.c.bf16 %v7082_v38, %v7081_v37  ;;  %v1956_v46 = vpack.c.bf16 %v7084_v43, %v7083_v42  ;;  %v7135_v42 = vld [vmem:[%s9609_s30 + $0xb7] ss:$2 sm:$0xff] }
  0xdd   : > { %8315 = vmatprep.subr.bf16.mxu0 %v8863_v45  ;;  %v8888_v43 = vld [vmem:[%s11508_s1 + $0x220] sm:$0xff]  }
  0xe0   : > { %8316 = vmatpush3.bf16.msra.mxu0 %v8863_v45  ;;  %v7086_v45 = vld [vmem:[%s9609_s30 + $0x56] ss:$2 sm:$0xff] }
  0xe1   : > { %8317 = vmatprep.subr.bf16.mxu0 %v8864_v49  ;;  %v1957_v47 = vpack.c.bf16 %v7086_v45, %v7085_v44  ;;  %v7136_v44 = vld [vmem:[%s9609_s30 + $0xc7] ss:$2 sm:$0xff]  ;;  %v7137_v45 = vld [vmem:[%s9609_s30 + $0xd7] ss:$2 sm:$0xff] }
  0xe3   : > { %8298 = vmatmul.mubr.bf16.gmra.mrb[8].mxu0 %v1472_v52  ;;  %v7089_v52 = vld [vmem:[%s9609_s30 + $0x86] ss:$2 sm:$0xff] }
  0xe4   : > { %8318 = vmatpush3.bf16.msra.mxu0 %v8864_v49  ;;  %8301 = vmatprep.mubr.bf16.mxu0 %v1473_v54  ;;  %v7087_v49 = vld [vmem:[%s9609_s30 + $0x66] ss:$2 sm:$0xff] }
  0xe5   : > { %8319 = vmatprep.subr.bf16.mxu0 %v8865_v53  ;;  %v1958_v56 = vpack.c.bf16 %v7088_v50, %v7087_v49  ;;  %v7138_v49 = vld [vmem:[%s9609_s30 + $0xe7] ss:$2 sm:$0xff]  ;;  %v7139_v50 = vld [vmem:[%s9609_s30 + $0xf7] ss:$2 sm:$0xff] }
  0xe8   : > { %8320 = vmatpush3.bf16.msra.mxu0 %v8865_v53  ;;  %v7090_v53 = vld [vmem:[%s9609_s30 + $0x96] ss:$2 sm:$0xff] }
  0xe9   : > { %8321 = vmatprep.subr.bf16.mxu0 %v8866_v57  ;;  %v1959_v58 = vpack.c.bf16 %v7090_v53, %v7089_v52  ;;  %v7140_v52 = vld [vmem:[%s9609_s30 + $0x107] ss:$2 sm:$0xff]  ;;  %v7141_v53 = vld [vmem:[%s9609_s30 + $0x117] ss:$2 sm:$0xff] }
  0xeb   : > { %8302 = vmatmul.mubr.bf16.gmra.mrb[12].mxu0 %v1474_v60  ;;  %v8879_v60 = vld [vmem:[%s11508_s1 + $0x1d8] sm:$0xff]  }
  0xec   : > { %8305 = vmatprep.mubr.bf16.mxu0 %v1475_v62  ;;  %8322 = vmatpush3.bf16.msra.mxu0 %v8866_v57  ;;  %v7092_v62 = vld [vmem:[%s9609_s30 + $0xb6] ss:$2 sm:$0xff] }
  0xed   : > { %8323 = vmatprep.subr.bf16.mxu0 %v8867_v61 }
  0xf0   : > { %8324 = vmatpush3.bf16.msra.mxu0 %v8867_v61  ;;  %v7091_v61 = vld [vmem:[%s9609_s30 + $0xa6] ss:$2 sm:$0xff] }
  0xf1   : > { %8345 = vmatprep.subr.bf16.mxu0 %v8868_v2 }
  0xf3   : > { %8306 = vmatmul.mubr.bf16.gmra.mrb[32].mxu0 %v1476_v3  ;;  %v1961_v3 = vpack.c.bf16 %v7094_v1, %v7093_v0  ;;  %v7170_v0 = vld [vmem:[%s9609_s30 + $0x38] ss:$2 sm:$0xff]  ;;  %v7171_v1 = vld [vmem:[%s9609_s30 + $0x48] ss:$2 sm:$0xff] }
  0xf4   : > { %8325 = vmatprep.mubr.bf16.mxu0 %v1711_v4  ;;  %v8881_v4 = vld [vmem:[%s11508_s1 + $0x1e8] sm:$0xff]  }
  0xfb   : > { %8326 = vmatmul.mubr.bf16.vlgmr.msra.gmra.mrb[0].mxu0 %v1712_v9  ;;  %v7098_v9 = vld [vmem:[%s9609_s30 + $0x116] ss:$2 sm:$0xff] }
  0xfc   : > { %8346 = vmatpush3.bf16.msra.mxu0 %v8868_v2  ;;  %8329 = vmatprep.mubr.bf16.mxu0 %v1713_v11  ;;  %v1960_v2 = vpack.c.bf16 %v7092_v62, %v7091_v61  ;;  %v1963_v11 = vpack.c.bf16 %v7098_v9, %v7097_v8  ;;  %v8894_v8 = vld [vmem:[%s11508_s1 + $0x250] sm:$0xff]  }
  0xfd   : > { %8347 = vmatprep.subr.bf16.mxu0 %v8869_v10  ;;  %v7175_v9 = vld [vmem:[%s9609_s30 + $0x88] ss:$2 sm:$0xff] }
 0x100   : > { %8348 = vmatpush3.bf16.msra.mxu0 %v8869_v10  ;;  %v1962_v10 = vpack.c.bf16 %v7096_v6, %v7095_v5  ;;  %v8893_v5 = vld [vmem:[%s11508_s1 + $0x248] sm:$0xff]  }
 0x101   : > { %8349 = vmatprep.subr.bf16.mxu0 %v8870_v14  ;;  %v7173_v6 = vld [vmem:[%s9609_s30 + $0x68] ss:$2 sm:$0xff] }
 0x103   : > { %8330 = vmatmul.mubr.bf16.gmra.mrb[4].mxu0 %v1714_v17  ;;  %v1964_v17 = vpack.c.bf16 %v7099_v13, %v7099_v13 }
 0x104   : > { %8350 = vmatpush3.bf16.msra.mxu0 %v8870_v14  ;;  %8333 = vmatprep.mubr.bf16.mxu0 %v1715_v19  ;;  %v7124_v14 = vld [vmem:[%s9609_s30 + $0x7] ss:$2 sm:$0xff] }
 0x105   : > { %8351 = vmatprep.subr.bf16.mxu0 %v8871_v18  ;;  %v7126_v19 = vld [vmem:[%s9609_s30 + $0x27] ss:$2 sm:$0xff] }
 0x106   : > { %v2200_v23 = vpack.c.bf16 %v7127_v20, %v7126_v19  ;;  %v8895_v19 = vld [vmem:[%s11508_s1 + $0x258] sm:$0xff]  }
 0x108   : > { %8352 = vmatpush3.bf16.msra.mxu0 %v8871_v18  ;;  %v2199_v18 = vpack.c.bf16 %v7125_v15, %v7124_v14 }
 0x109   : > { %8353 = vmatprep.subr.bf16.mxu0 %v8872_v22 }
 0x10b   : > { %8334 = vmatmul.mubr.bf16.gmra.mrb[8].mxu0 %v1716_v25  ;;  %v8885_v25 = vld [vmem:[%s11508_s1 + $0x208] sm:$0xff]  }
 0x10c   : > { %8354 = vmatpush3.bf16.msra.mxu0 %v8872_v22  ;;  %8337 = vmatprep.mubr.bf16.mxu0 %v1717_v26  ;;  %v7129_v22 = vld [vmem:[%s9609_s30 + $0x57] ss:$2 sm:$0xff]  ;;  %v7130_v26 = vld [vmem:[%s9609_s30 + $0x67] ss:$2 sm:$0xff] }
 0x10d   : > { %8355 = vmatprep.subr.bf16.mxu0 %v8873_v27  ;;  %v2201_v24 = vpack.c.bf16 %v7129_v22, %v7128_v21  ;;  %v7177_v21 = vld [vmem:[%s9609_s30 + $0xa8] ss:$2 sm:$0xff]  ;;  %v7178_v22 = vld [vmem:[%s9609_s30 + $0xb8] ss:$2 sm:$0xff] }
 0x110   : > { %8356 = vmatpush3.bf16.msra.mxu0 %v8873_v27  ;;  %v7131_v27 = vld [vmem:[%s9609_s30 + $0x77] ss:$2 sm:$0xff] }
 0x111   : > { %8357 = vmatprep.subr.bf16.mxu0 %v8874_v30 }
 0x113   : > { %8338 = vmatmul.mubr.bf16.gmra.mrb[12].mxu0 %v1718_v33 }
 0x114   : > { %8341 = vmatprep.mubr.bf16.mxu0 %v1719_v34  ;;  %8358 = vmatpush3.bf16.msra.mxu0 %v8874_v30  ;;  %v7133_v30 = vld [vmem:[%s9609_s30 + $0x97] ss:$2 sm:$0xff]  ;;  %v2202_v34 = vpack.c.bf16 %v7131_v27, %v7130_v26  ;;  %v2448_v26 = vpack.c.bf16 %v7178_v22, %v7177_v21 }
 0x115   : > { %8359 = vmatprep.subr.bf16.mxu0 %v8875_v35  ;;  %v2203_v37 = vpack.c.bf16 %v7133_v30, %v7132_v29  ;;  %v7181_v29 = vld [vmem:[%s9609_s30 + $0xe8] ss:$2 sm:$0xff]  ;;  %v7182_v30 = vld [vmem:[%s9609_s30 + $0xf8] ss:$2 sm:$0xff] }
 0x118   : > { %8360 = vmatpush3.bf16.msra.mxu0 %v8875_v35 }
 0x119   : > { %8381 = vmatprep.subr.bf16.mxu0 %v8876_v39 }
 0x11b   : > { %8342 = vmatmul.mubr.bf16.gmra.mrb[36].mxu0 %v1720_v40 }
 0x11c   : > { %8361 = vmatprep.mubr.bf16.mxu0 %v1955_v41  ;;  %v7134_v41 = vld [vmem:[%s9609_s30 + $0xa7] ss:$2 sm:$0xff] }
 0x123   : > { %8362 = vmatmul.mubr.bf16.vlgmr.msra.gmra.mrb[0].mxu0 %v1956_v46  ;;  %v2204_v46 = vpack.c.bf16 %v7135_v42, %v7134_v41  ;;  %v7212_v42 = vld [vmem:[%s9609_s30 + $0x29] ss:$2 sm:$0xff] }
 0x124   : > { %8382 = vmatpush3.bf16.msra.mxu0 %v8876_v39  ;;  %8365 = vmatprep.mubr.bf16.mxu0 %v1957_v47  ;;  %v8887_v39 = vld [vmem:[%s11508_s1 + $0x218] sm:$0xff]   ;;  %v2205_v47 = vpack.c.bf16 %v7137_v45, %v7136_v44  ;;  %v7214_v44 = vld [vmem:[%s9609_s30 + $0x49] ss:$2 sm:$0xff] }
 0x125   : > { %8383 = vmatprep.subr.bf16.mxu0 %v8877_v48  ;;  %v7215_v45 = vld [vmem:[%s9609_s30 + $0x59] ss:$2 sm:$0xff] }
 0x126   : > { %v9903_v54 = vpop.f32.mrb[16].mxu0 }
 0x127   : > { %v9905_v55 = vpop.f32.mrb[17].mxu0 }
 0x128   : > { %v8164_v57 = vpop.f32.mrb[18].mxu0  ;;  %8384 = vmatpush3.bf16.msra.mxu0 %v8877_v48  ;;  %v8889_v48 = vld [vmem:[%s11508_s1 + $0x228] sm:$0xff]  }
 0x129   : > { %v9907_v59 = vpop.f32.mrb[19].mxu0  ;;  %8385 = vmatprep.subr.bf16.mxu0 %v8878_v51  ;;  %v7142_v57 = vld [vmem:[%s9609_s30 + $0x127] ss:$2 sm:$0x1f] }
 0x12a   : > { %v2208_v61 = vpack.c.bf16 %v7142_v57, %v7142_v57 }
 0x12b   : > { %8366 = vmatmul.mubr.bf16.gmra.mrb[4].mxu0 %v1958_v56  ;;  %v8891_v56 = vld [vmem:[%s11508_s1 + $0x238] sm:$0xff]  }
 0x12c   : > { %8386 = vmatpush3.bf16.msra.mxu0 %v8878_v51  ;;  %8369 = vmatprep.mubr.bf16.mxu0 %v1959_v58  ;;  %v8890_v51 = vld [vmem:[%s11508_s1 + $0x230] sm:$0xff]  }
 0x12d   : > { %8387 = vmatprep.subr.bf16.mxu0 %v8879_v60  ;;  %v7167_v58 = vld [vmem:[%s9609_s30 + $0x8] ss:$2 sm:$0xff] }
 0x130   : > { %8388 = vmatpush3.bf16.msra.mxu0 %v8879_v60  ;;  %v8892_v60 = vld [vmem:[%s11508_s1 + $0x240] sm:$0xff]  }
 0x131   : > { %8389 = vmatprep.subr.bf16.mxu0 %v8880_v63 }
 0x133   : > { %8370 = vmatmul.mubr.bf16.gmra.mrb[8].mxu0 %v1960_v2  ;;  %v7172_v2 = vld [vmem:[%s9609_s30 + $0x58] ss:$2 sm:$0xff] }
 0x134   : > { %8390 = vmatpush3.bf16.msra.mxu0 %v8880_v63  ;;  %8373 = vmatprep.mubr.bf16.mxu0 %v1961_v3  ;;  %v7169_v63 = vld [vmem:[%s9609_s30 + $0x28] ss:$2 sm:$0xff] }
 0x135   : > { %8391 = vmatprep.subr.bf16.mxu0 %v8881_v4  ;;  %v2444_v3 = vpack.c.bf16 %v7170_v0, %v7169_v63  ;;  %v7222_v63 = vld [vmem:[%s9609_s30 + $0xc9] ss:$2 sm:$0xff]  ;;  %v7223_v0 = vld [vmem:[%s9609_s30 + $0xd9] ss:$2 sm:$0xff] }
 0x138   : > { %8392 = vmatpush3.bf16.msra.mxu0 %v8881_v4  ;;  %v2445_v4 = vpack.c.bf16 %v7172_v2, %v7171_v1  ;;  %v2693_v2 = vpack.c.bf16 %v7223_v0, %v7222_v63  ;;  %v8907_v63 = vld [vmem:[%s11512_s5 + $0x78] sm:$0xff]  }
 0x139   : > { %8393 = vmatprep.subr.bf16.mxu0 %v8882_v7 }
 0x13b   : > { %8374 = vmatmul.mubr.bf16.gmra.mrb[12].mxu0 %v1962_v10  ;;  %v7176_v10 = vld [vmem:[%s9609_s30 + $0x98] ss:$2 sm:$0xff] }
 0x13c   : > { %8377 = vmatprep.mubr.bf16.mxu0 %v1963_v11  ;;  %8394 = vmatpush3.bf16.msra.mxu0 %v8882_v7  ;;  %v7174_v7 = vld [vmem:[%s9609_s30 + $0x78] ss:$2 sm:$0xff] }
 0x13d   : > { %8395 = vmatprep.subr.bf16.mxu0 %v8883_v12  ;;  %v2446_v14 = vpack.c.bf16 %v7174_v7, %v7173_v6  ;;  %v7227_v6 = vld [vmem:[%s9609_s30 + $0x119] ss:$2 sm:$0xff] }
 0x140   : > { %8396 = vmatpush3.bf16.msra.mxu0 %v8883_v12 }
 0x141   : > { %8417 = vmatprep.subr.bf16.mxu0 %v8884_v16 }
 0x143   : > { %8378 = vmatmul.mubr.bf16.gmra.mrb[40].mxu0 %v1964_v17  ;;  %v2447_v17 = vpack.c.bf16 %v7176_v10, %v7175_v9  ;;  %v7228_v9 = vld [vmem:[%s9609_s30 + $0x129] ss:$2 sm:$0x1f] }
 0x144   : > { %8397 = vmatprep.mubr.bf16.mxu0 %v2199_v18  ;;  %v2696_v10 = vpack.c.bf16 %v7228_v9, %v7228_v9 }
 0x14b   : > { %8398 = vmatmul.mubr.bf16.vlgmr.msra.gmra.mrb[0].mxu0 %v2200_v23  ;;  %v8896_v23 = vld [vmem:[%s11508_s1 + $0x260] sm:$0xff]  }
 0x14c   : > { %8418 = vmatpush3.bf16.msra.mxu0 %v8884_v16  ;;  %8401 = vmatprep.mubr.bf16.mxu0 %v2201_v24  ;;  %v7179_v24 = vld [vmem:[%s9609_s30 + $0xc8] ss:$2 sm:$0xff] }
 0x14d   : > { %8419 = vmatprep.subr.bf16.mxu0 %v8885_v25 }
 0x14e   : > { %v8199_v31 = vpop.f32.mrb[20].mxu0 }
 0x14f   : > { %v9953_v32 = vadd.f32 %v8199_v31, %v9903_v54  ;;  %v927_v33 = vpop.f32.mrb[21].mxu0  ;;  %v2206_v54 = vpack.c.bf16 %v7139_v50, %v7138_v49  ;;  %v8898_v31 = vld [vmem:[%s11508_s1 + $0x270] sm:$0xff]   ;;  %v7217_v49 = vld [vmem:[%s9609_s30 + $0x79] ss:$2 sm:$0xff] }
 0x150   : > { %v9956_v35 = vadd.f32 %v927_v33, %v9905_v55  ;;  %v8200_v36 = vpop.f32.mrb[22].mxu0  ;;  %8420 = vmatpush3.bf16.msra.mxu0 %v8885_v25  ;;  %v2207_v55 = vpack.c.bf16 %v7141_v53, %v7140_v52  ;;  %v7180_v25 = vld [vmem:[%s9609_s30 + $0xd8] ss:$2 sm:$0xff]  ;;  %v7218_v50 = vld [vmem:[%s9609_s30 + $0x89] ss:$2 sm:$0xff] }
 0x151   : > { %v930_v38 = vpop.f32.mrb[23].mxu0  ;;  %8421 = vmatprep.subr.bf16.mxu0 %v8886_v28  ;;  %v2449_v27 = vpack.c.bf16 %v7180_v25, %v7179_v24  ;;  %v7184_v33 = vld [vmem:[%s9609_s30 + $0x118] ss:$2 sm:$0xff] }
 0x152   : > { %v9962_v40 = vadd.f32 %v930_v38, %v9907_v59  ;;  %v7168_v59 = vld [vmem:[%s9609_s30 + $0x18] ss:$2 sm:$0xff]  ;;  %v7210_v38 = vld [vmem:[%s9609_s30 + $0x9] ss:$2 sm:$0xff] }
 0x153   : > { %8402 = vmatmul.mubr.bf16.gmra.mrb[4].mxu0 %v2202_v34  ;;  %v2443_v62 = vpack.c.bf16 %v7168_v59, %v7167_v58  ;;  %v2450_v34 = vpack.c.bf16 %v7182_v30, %v7181_v29  ;;  %v8899_v36 = vld [vmem:[%s11508_s1 + $0x278] sm:$0xff]  }
 0x154   : > { %8422 = vmatpush3.bf16.msra.mxu0 %v8886_v28  ;;  %8405 = vmatprep.mubr.bf16.mxu0 %v2203_v37  ;;  %v8897_v28 = vld [vmem:[%s11508_s1 + $0x268] sm:$0xff]  }
 0x155   : > { %8423 = vmatprep.subr.bf16.mxu0 %v8887_v39  ;;  %v7185_v37 = vld [vmem:[%s9609_s30 + $0x128] ss:$2 sm:$0x1f] }
 0x158   : > { %8424 = vmatpush3.bf16.msra.mxu0 %v8887_v39  ;;  %v7211_v39 = vld [vmem:[%s9609_s30 + $0x19] ss:$2 sm:$0xff] }
 0x159   : > { %8425 = vmatprep.subr.bf16.mxu0 %v8888_v43  ;;  %v2687_v41 = vpack.c.bf16 %v7211_v39, %v7210_v38  ;;  %v8900_v39 = vld [vmem:[%s11512_s5 + $0x40] sm:$0xff]  }
 0x15b   : > { %8406 = vmatmul.mubr.bf16.gmra.mrb[8].mxu0 %v2204_v46 }
 0x15c   : > { %8426 = vmatpush3.bf16.msra.mxu0 %v8888_v43  ;;  %8409 = vmatprep.mubr.bf16.mxu0 %v2205_v47  ;;  %v7213_v43 = vld [vmem:[%s9609_s30 + $0x39] ss:$2 sm:$0xff]  ;;  %v2689_v47 = vpack.c.bf16 %v7215_v45, %v7214_v44 }
 0x15d   : > { %8427 = vmatprep.subr.bf16.mxu0 %v8889_v48  ;;  %v2688_v46 = vpack.c.bf16 %v7213_v43, %v7212_v42  ;;  %v8902_v42 = vld [vmem:[%s11512_s5 + $0x50] sm:$0xff]   ;;  %v8903_v43 = vld [vmem:[%s11512_s5 + $0x58] sm:$0xff]   ;;  %v8904_v45 = vld [vmem:[%s11512_s5 + $0x60] sm:$0xff]  }
 0x160   : > { %8428 = vmatpush3.bf16.msra.mxu0 %v8889_v48  ;;  %v7216_v48 = vld [vmem:[%s9609_s30 + $0x69] ss:$2 sm:$0xff] }
 0x161   : > { %8429 = vmatprep.subr.bf16.mxu0 %v8890_v51 }
 0x163   : > { %8410 = vmatmul.mubr.bf16.gmra.mrb[12].mxu0 %v2206_v54 }
 0x164   : > { %8413 = vmatprep.mubr.bf16.mxu0 %v2207_v55  ;;  %8430 = vmatpush3.bf16.msra.mxu0 %v8890_v51  ;;  %v7219_v51 = vld [vmem:[%s9609_s30 + $0x99] ss:$2 sm:$0xff]  ;;  %v2690_v55 = vpack.c.bf16 %v7217_v49, %v7216_v48 }
 0x165   : > { %8431 = vmatprep.subr.bf16.mxu0 %v8891_v56  ;;  %v2691_v58 = vpack.c.bf16 %v7219_v51, %v7218_v50 }
 0x168   : > { %8432 = vmatpush3.bf16.msra.mxu0 %v8891_v56 }
 0x169   : > { %8453 = vmatprep.subr.bf16.mxu0 %v8892_v60 }
 0x16b   : > { %8414 = vmatmul.mubr.bf16.gmra.mrb[44].mxu0 %v2208_v61  ;;  %v7220_v61 = vld [vmem:[%s9609_s30 + $0xa9] ss:$2 sm:$0xff] }
 0x16c   : > { %8433 = vmatprep.mubr.bf16.mxu0 %v2443_v62  ;;  %v7221_v62 = vld [vmem:[%s9609_s30 + $0xb9] ss:$2 sm:$0xff] }
 0x16d   : > { %v2692_v1 = vpack.c.bf16 %v7221_v62, %v7220_v61 }
 0x173   : > { %8434 = vmatmul.mubr.bf16.vlgmr.msra.gmra.mrb[0].mxu0 %v2444_v3  ;;  %v7224_v3 = vld [vmem:[%s9609_s30 + $0xe9] ss:$2 sm:$0xff] }
 0x174   : > { %8454 = vmatpush3.bf16.msra.mxu0 %v8892_v60  ;;  %8437 = vmatprep.mubr.bf16.mxu0 %v2445_v4  ;;  %v7225_v4 = vld [vmem:[%s9609_s30 + $0xf9] ss:$2 sm:$0xff] }
 0x175   : > { %8455 = vmatprep.subr.bf16.mxu0 %v8893_v5  ;;  %v2694_v7 = vpack.c.bf16 %v7225_v4, %v7224_v3 }
 0x176   : > { %v8235_v11 = vpop.f32.mrb[24].mxu0 }
 0x177   : > { %v10005_v12 = vadd.f32 %v8235_v11, %v9953_v32  ;;  %v1152_v13 = vpop.f32.mrb[25].mxu0  ;;  %v7183_v32 = vld [vmem:[%s9609_s30 + $0x108] ss:$2 sm:$0xff] }
 0x178   : > { %v10008_v15 = vadd.f32 %v1152_v13, %v9956_v35  ;;  %v8236_v16 = vpop.f32.mrb[26].mxu0  ;;  %8456 = vmatpush3.bf16.msra.mxu0 %v8893_v5  ;;  %v2451_v35 = vpack.c.bf16 %v7184_v33, %v7183_v32  ;;  %v7226_v5 = vld [vmem:[%s9609_s30 + $0x109] ss:$2 sm:$0xff]  ;;  %s9405_s30 = scalar_lea.vmem %s9404_s16, 32 }
 0x179   : > { %v1155_v18 = vpop.f32.mrb[27].mxu0  ;;  %8457 = vmatprep.subr.bf16.mxu0 %v8894_v8  ;;  %p9407_p1 = scmp.lt.s32.totalorder %s9405_s30, %s9399_s25 }
 0x17a   : > { %v1183_v20 = vadd.f32 %v1155_v18, %v9962_v40  ;;  %v2452_v40 = vpack.c.bf16 %v7185_v37, %v7185_v37 }
 0x17b   : > { %8438 = vmatmul.mubr.bf16.gmra.mrb[4].mxu0 %v2446_v14  ;;  %p9408_p2 = por %p9407_p1, %p9406_p0 }
 0x17c   : > { %8458 = vmatpush3.bf16.msra.mxu0 %v8894_v8  ;;  %8441 = vmatprep.mubr.bf16.mxu0 %v2447_v17  ;;  %v2695_v8 = vpack.c.bf16 %v7227_v6, %v7226_v5 }
 0x17d   : > { %8459 = vmatprep.subr.bf16.mxu0 %v8895_v19  ;;  %p9409_p3 = pnand %p9408_p2, %p9402_p13 }
 0x180   : > { %8460 = vmatpush3.bf16.msra.mxu0 %v8895_v19 }
 0x181   : > { %8461 = vmatprep.subr.bf16.mxu0 %v8896_v23 }
 0x183   : > { %8442 = vmatmul.mubr.bf16.gmra.mrb[8].mxu0 %v2448_v26 }
 0x184   : > { %8462 = vmatpush3.bf16.msra.mxu0 %v8896_v23  ;;  %8445 = vmatprep.mubr.bf16.mxu0 %v2449_v27 }
 0x185   : > { %8463 = vmatprep.subr.bf16.mxu0 %v8897_v28 }
 0x188   : > { %8464 = vmatpush3.bf16.msra.mxu0 %v8897_v28 }
 0x189   : > { %8465 = vmatprep.subr.bf16.mxu0 %v8898_v31 }
 0x18b   : > { %8446 = vmatmul.mubr.bf16.gmra.mrb[12].mxu0 %v2450_v34 }
 0x18c   : > { %8449 = vmatprep.mubr.bf16.mxu0 %v2451_v35  ;;  %8466 = vmatpush3.bf16.msra.mxu0 %v8898_v31 }
 0x18d   : > { %8467 = vmatprep.subr.bf16.mxu0 %v8899_v36 }
 0x190   : > { %8468 = vmatpush3.bf16.msra.mxu0 %v8899_v36 }
 0x193   : > { %8450 = vmatmul.mubr.bf16.gmra.mrb[48].mxu0 %v2452_v40  ;;  %v9463_v40 = vmov 0.0  }
 0x194   : > { %8469 = vmatprep.mubr.bf16.mxu0 %v2687_v41  ;;  %8489 = vmatprep.subr.bf16.mxu1 %v9463_v40  ;;  %3464 = vst [vmem:[#allocation3] sm:$0xff] %v9463_v40  ;;  %3473 = vst [vmem:[#allocation3 + $0x48] sm:$0xff] %v9463_v40  ;;  %v8901_v41 = vld [vmem:[%s11512_s5 + $0x48] sm:$0xff]  }
 0x195   : > { %8490 = vmatpush3.bf16.msra.mxu1 %v8900_v39  ;;  %8505 = vmatprep.mubr.msk.bf16.mxu1 %vm9464_vm0, %v9463_v40 }
 0x196   : > { %8491 = vmatprep.subr.bf16.mxu1 %v9463_v40 }
 0x199   : > { %8492 = vmatpush3.bf16.msra.mxu1 %v8901_v41 }
 0x19a   : > { %8493 = vmatprep.subr.bf16.mxu1 %v9463_v40 }
 0x19b   : > { %8470 = vmatmul.mubr.bf16.vlgmr.msra.gmra.mrb[0].mxu0 %v2688_v46 }
 0x19c   : > { %8473 = vmatprep.mubr.bf16.mxu0 %v2689_v47 }
 0x19d   : > { %8494 = vmatpush3.bf16.msra.mxu1 %v8902_v42 }
 0x19e   : > { %v8271_v52 = vpop.f32.mrb[28].mxu0  ;;  %8495 = vmatprep.subr.bf16.mxu1 %v9463_v40 }
 0x19f   : > { %v1428_v53 = vadd.f32 %v8271_v52, %v10005_v12  ;;  %v1396_v54 = vpop.f32.mrb[29].mxu0  ;;  %v8905_v52 = vld [vmem:[%s11512_s5 + $0x68] sm:$0xff]  }
 0x1a0   : > { %v1426_v56 = vadd.f32 %v1396_v54, %v10008_v15  ;;  %v8272_v57 = vpop.f32.mrb[30].mxu0 }
 0x1a1   : > { %v1399_v59 = vpop.f32.mrb[31].mxu0  ;;  %8496 = vmatpush3.bf16.msra.mxu1 %v8903_v43 }
 0x1a2   : > { %v1427_v60 = vadd.f32 %v1399_v59, %v1183_v20  ;;  %8497 = vmatprep.subr.bf16.mxu1 %v9463_v40 }
 0x1a3   : > { %8474 = vmatmul.mubr.bf16.gmra.mrb[4].mxu0 %v2690_v55  ;;  %v8906_v55 = vld [vmem:[%s11512_s5 + $0x70] sm:$0xff]  }
 0x1a4   : > { %8477 = vmatprep.mubr.bf16.mxu0 %v2691_v58 }
 0x1a5   : > { %8498 = vmatpush3.bf16.msra.mxu1 %v8904_v45 }
 0x1a6   : > { %8499 = vmatprep.subr.bf16.mxu1 %v9463_v40 }
 0x1a9   : > { %8500 = vmatpush3.bf16.msra.mxu1 %v8905_v52 }
 0x1aa   : > { %8501 = vmatprep.subr.bf16.mxu1 %v9463_v40 }
 0x1ab   : > { %8478 = vmatmul.mubr.bf16.gmra.mrb[8].mxu0 %v2692_v1 }
 0x1ac   : > { %8481 = vmatprep.mubr.bf16.mxu0 %v2693_v2 }
 0x1ad   : > { %8502 = vmatpush3.bf16.msra.mxu1 %v8906_v55 }
 0x1ae   : > { %8503 = vmatprep.subr.bf16.mxu1 %v9463_v40 }
 0x1b1   : > { %8504 = vmatpush3.bf16.msra.mxu1 %v8907_v63 }
 0x1b2   : > { %8517 = vmatprep.subr.bf16.mxu1 %v9463_v40 }
 0x1b3   : > { %8482 = vmatmul.mubr.bf16.gmra.mrb[12].mxu0 %v2694_v7 }
 0x1b4   : > { %8485 = vmatprep.mubr.bf16.mxu0 %v2695_v8 }
 0x1bb   : > { %8486 = vmatmul.mubr.bf16.gmra.mrb[52].mxu0 %v2696_v10 }
 0x1c6   : > { %v8307_v11 = vpop.f32.mrb[32].mxu0 }
 0x1c7   : > { %v1672_v12 = vadd.f32 %v8307_v11, %v1428_v53  ;;  %v1640_v13 = vpop.f32.mrb[33].mxu0  ;;  %v10091_v53 = vld [vmem:[%s11509_s2] ss:$0 sm:$0xff] }
 0x1c8   : > { %v1670_v14 = vadd.f32 %v1640_v13, %v1426_v56  ;;  %v8308_v15 = vpop.f32.mrb[34].mxu0 }
 0x1c9   : > { %v1643_v16 = vpop.f32.mrb[35].mxu0 }
 0x1ca   : > { %v1671_v17 = vadd.f32 %v1643_v16, %v1427_v60 }
 0x1ee   : > { %v8343_v18 = vpop.f32.mrb[36].mxu0 }
 0x1ef   : > { %v1916_v19 = vadd.f32 %v8343_v18, %v1672_v12  ;;  %v1884_v20 = vpop.f32.mrb[37].mxu0 }
 0x1f0   : > { %v1914_v21 = vadd.f32 %v1884_v20, %v1670_v14  ;;  %v8344_v22 = vpop.f32.mrb[38].mxu0 }
 0x1f1   : > { %v1887_v23 = vpop.f32.mrb[39].mxu0 }
 0x1f2   : > { %v1915_v24 = vadd.f32 %v1887_v23, %v1671_v17 }
 0x216   : > { %v8379_v25 = vpop.f32.mrb[40].mxu0 }
 0x217   : > { %v2160_v26 = vadd.f32 %v8379_v25, %v1916_v19  ;;  %v2128_v27 = vpop.f32.mrb[41].mxu0 }
 0x218   : > { %v2158_v28 = vadd.f32 %v2128_v27, %v1914_v21  ;;  %v8380_v29 = vpop.f32.mrb[42].mxu0 }
 0x219   : > { %v2131_v30 = vpop.f32.mrb[43].mxu0 }
 0x21a   : > { %v2159_v31 = vadd.f32 %v2131_v30, %v1915_v24 }
 0x23e   : > { %v8415_v32 = vpop.f32.mrb[44].mxu0 }
 0x23f   : > { %v2404_v33 = vadd.f32 %v8415_v32, %v2160_v26  ;;  %v2372_v34 = vpop.f32.mrb[45].mxu0 }
 0x240   : > { %v2402_v35 = vadd.f32 %v2372_v34, %v2158_v28  ;;  %v8416_v36 = vpop.f32.mrb[46].mxu0 }
 0x241   : > { %v2375_v37 = vpop.f32.mrb[47].mxu0 }
 0x242   : > { %v2403_v38 = vadd.f32 %v2375_v37, %v2159_v31 }
 0x266   : > { %v8451_v44 = vpop.f32.mrb[48].mxu0 }
 0x267   : > { %v10078_v46 = vadd.f32 %v8451_v44, %v2404_v33  ;;  %v2616_v47 = vpop.f32.mrb[49].mxu0 }
 0x268   : > { %v10080_v48 = vadd.f32 %v2616_v47, %v2402_v35  ;;  %v8452_v49 = vpop.f32.mrb[50].mxu0 }
 0x269   : > { %v2619_v50 = vpop.f32.mrb[51].mxu0 }
 0x26a   : > { %v10083_v51 = vadd.f32 %v2619_v50, %v2403_v38 }
 0x26e   : > { %v8471_v54 = vpop.f32.mrb[0].mxu0 }
 0x26f   : > { %v2902_v56 = vadd.f32 %v8471_v54, %v10091_v53  ;;  %v2796_v57 = vpop.f32.mrb[1].mxu0 }
 0x270   : > { %v2900_v58 = vadd.f32 %v10091_v53, %v2796_v57  ;;  %v8472_v59 = vpop.f32.mrb[2].mxu0 }
 0x271   : > { %2921 = vst [vmem:[#allocation2 + $0x10] sm:$0xff] %v2902_v56  ;;  %v2903_v60 = vadd.f32 %v8472_v59, %v10091_v53  ;;  %v2799_v61 = vpop.f32.mrb[3].mxu0 }
 0x272   : > { %2919 = vst [vmem:[#allocation2] sm:$0xff] %v2900_v58  ;;  %v2901_v62 = vadd.f32 %v10091_v53, %v2799_v61 }
 0x273   : > { %2922 = vst [vmem:[#allocation2 + $0x18] sm:$0xff] %v2903_v60 }
 0x274   : > { %2920 = vst [vmem:[#allocation2 + $0x8] sm:$0xff] %v2901_v62 }
 0x276   : > { %v8475_v0 = vpop.f32.mrb[4].mxu0 }
 0x277   : > { %v2906_v1 = vadd.f32 %v8475_v0, %v10091_v53  ;;  %v2812_v2 = vpop.f32.mrb[5].mxu0 }
 0x278   : > { %v2904_v3 = vadd.f32 %v10091_v53, %v2812_v2  ;;  %v8476_v4 = vpop.f32.mrb[6].mxu0 }
 0x279   : > { %2925 = vst [vmem:[#allocation2 + $0x30] sm:$0xff] %v2906_v1  ;;  %v2907_v5 = vadd.f32 %v8476_v4, %v10091_v53  ;;  %v2815_v6 = vpop.f32.mrb[7].mxu0 }
 0x27a   : > { %2923 = vst [vmem:[#allocation2 + $0x20] sm:$0xff] %v2904_v3  ;;  %v2905_v7 = vadd.f32 %v10091_v53, %v2815_v6  ;;  %v2940_v11 = vld [vmem:[#allocation2 + $0x10] ss:$2 sm:$0xff]  ;;  %v2958_v12 = vld [vmem:[#allocation2 + $0x11] ss:$2 sm:$0xff] }
 0x27b   : > { %v2938_v8 = vld [vmem:[#allocation2] ss:$2 sm:$0xff]  ;;  %v2956_v9 = vld [vmem:[#allocation2 + $0x1] ss:$2 sm:$0xff]  ;;  %2926 = vst [vmem:[#allocation2 + $0x38] sm:$0xff] %v2907_v5  ;;  %v2974_v19 = vmax.f32 %v2940_v11, %v2958_v12 }
 0x27c   : > { %v2973_v10 = vmax.f32 %v2938_v8, %v2956_v9  ;;  %2924 = vst [vmem:[#allocation2 + $0x28] sm:$0xff] %v2905_v7  ;;  %v2983_v13 = vld [vmem:[#allocation2 + $0x2] ss:$2 sm:$0xff]  ;;  %v3010_v16 = vld [vmem:[#allocation2 + $0x3] ss:$2 sm:$0xff] }
 0x27d   : > { %v3037_v23 = vld [vmem:[#allocation2 + $0x4] ss:$2 sm:$0xff]  ;;  %v3064_v28 = vld [vmem:[#allocation2 + $0x5] ss:$2 sm:$0xff] }
 0x27e   : > { %v3000_v14 = vmax.f32 %v2973_v10, %v2983_v13  ;;  %v8479_v15 = vpop.f32.mrb[8].mxu0  ;;  %v3091_v31 = vld [vmem:[#allocation2 + $0x6] ss:$2 sm:$0xff]  ;;  %v3118_v43 = vld [vmem:[#allocation2 + $0x7] ss:$2 sm:$0xff] }
 0x27f   : > { %v2910_v17 = vadd.f32 %v8479_v15, %v10091_v53  ;;  %v2828_v18 = vpop.f32.mrb[9].mxu0  ;;  %v3145_v57 = vld [vmem:[#allocation2 + $0x8] ss:$2 sm:$0xff]  ;;  %v3172_v2 = vld [vmem:[#allocation2 + $0x9] ss:$2 sm:$0xff] }
 0x280   : > { %v3027_v20 = vmax.f32 %v3000_v14, %v3010_v16  ;;  %v2908_v21 = vadd.f32 %v10091_v53, %v2828_v18  ;;  %v8480_v22 = vpop.f32.mrb[10].mxu0 }
 0x281   : > { %v2985_v24 = vld [vmem:[#allocation2 + $0x12] ss:$2 sm:$0xff]  ;;  %2929 = vst [vmem:[#allocation2 + $0x50] sm:$0xff] %v2910_v17  ;;  %v2911_v25 = vadd.f32 %v8480_v22, %v10091_v53  ;;  %v3012_v29 = vld [vmem:[#allocation2 + $0x13] ss:$2 sm:$0xff]  ;;  %v2831_v47 = vpop.f32.mrb[11].mxu0 }
 0x282   : > { %v3054_v26 = vmax.f32 %v3027_v20, %v3037_v23  ;;  %v3001_v27 = vmax.f32 %v2974_v19, %v2985_v24  ;;  %2927 = vst [vmem:[#allocation2 + $0x40] sm:$0xff] %v2908_v21  ;;  %v3039_v35 = vld [vmem:[#allocation2 + $0x14] ss:$2 sm:$0xff]  ;;  %v2962_v37 = vld [vmem:[#allocation2 + $0x31] ss:$2 sm:$0xff]  ;;  %v2909_v55 = vadd.f32 %v10091_v53, %v2831_v47 }
 0x283   : > { %2930 = vst [vmem:[#allocation2 + $0x58] sm:$0xff] %v2911_v25  ;;  %v2942_v33 = vld [vmem:[#allocation2 + $0x20] ss:$2 sm:$0xff]  ;;  %v2960_v34 = vld [vmem:[#allocation2 + $0x21] ss:$2 sm:$0xff] }
 0x284   : > { %v3081_v30 = vmax.f32 %v3054_v26, %v3064_v28  ;;  %v3028_v32 = vmax.f32 %v3001_v27, %v3012_v29  ;;  %v2944_v36 = vld [vmem:[#allocation2 + $0x30] ss:$2 sm:$0xff]  ;;  %v2975_v38 = vmax.f32 %v2942_v33, %v2960_v34  ;;  %v3066_v44 = vld [vmem:[#allocation2 + $0x15] ss:$2 sm:$0xff]  ;;  %2928 = vst [vmem:[#allocation2 + $0x48] sm:$0xff] %v2909_v55 }
 0x285   : > { %v2987_v42 = vld [vmem:[#allocation2 + $0x22] ss:$2 sm:$0xff]  ;;  %v2976_v52 = vmax.f32 %v2944_v36, %v2962_v37  ;;  %v3014_v54 = vld [vmem:[#allocation2 + $0x23] ss:$2 sm:$0xff] }
 0x286   : > { %v3108_v39 = vmax.f32 %v3081_v30, %v3091_v31  ;;  %v3055_v41 = vmax.f32 %v3028_v32, %v3039_v35  ;;  %v3002_v45 = vmax.f32 %v2975_v38, %v2987_v42  ;;  %v8483_v56 = vpop.f32.mrb[12].mxu0  ;;  %v3093_v58 = vld [vmem:[#allocation2 + $0x16] ss:$2 sm:$0xff]  ;;  %v3120_v3 = vld [vmem:[#allocation2 + $0x17] ss:$2 sm:$0xff] }
 0x287   : > { %v2914_v61 = vadd.f32 %v8483_v56, %v10091_v53  ;;  %v3041_v0 = vld [vmem:[#allocation2 + $0x24] ss:$2 sm:$0xff]  ;;  %v3068_v8 = vld [vmem:[#allocation2 + $0x25] ss:$2 sm:$0xff]  ;;  %v2844_v10 = vpop.f32.mrb[13].mxu0 }
 0x288   : > { %v3135_v49 = vmax.f32 %v3108_v39, %v3118_v43  ;;  %v3082_v50 = vmax.f32 %v3055_v41, %v3066_v44  ;;  %v3029_v59 = vmax.f32 %v3002_v45, %v3014_v54  ;;  %v3147_v11 = vld [vmem:[#allocation2 + $0x18] ss:$2 sm:$0xff]  ;;  %v2912_v14 = vadd.f32 %v10091_v53, %v2844_v10  ;;  %v8484_v15 = vpop.f32.mrb[14].mxu0  ;;  %v3174_v21 = vld [vmem:[#allocation2 + $0x19] ss:$2 sm:$0xff] }
 0x289   : > { %v2989_v60 = vld [vmem:[#allocation2 + $0x32] ss:$2 sm:$0xff]  ;;  %v3016_v5 = vld [vmem:[#allocation2 + $0x33] ss:$2 sm:$0xff]  ;;  %2933 = vst [vmem:[#allocation2 + $0x70] sm:$0xff] %v2914_v61  ;;  %v2847_v20 = vpop.f32.mrb[15].mxu0  ;;  %v2915_v24 = vadd.f32 %v8484_v15, %v10091_v53 }
 0x28a   : > { %v3162_v62 = vmax.f32 %v3135_v49, %v3145_v57  ;;  %v3109_v63 = vmax.f32 %v3082_v50, %v3093_v58  ;;  %v3003_v1 = vmax.f32 %v2976_v52, %v2989_v60  ;;  %v3056_v4 = vmax.f32 %v3029_v59, %v3041_v0  ;;  %v3043_v13 = vld [vmem:[#allocation2 + $0x34] ss:$2 sm:$0xff]  ;;  %v3070_v23 = vld [vmem:[#allocation2 + $0x35] ss:$2 sm:$0xff]  ;;  %2931 = vst [vmem:[#allocation2 + $0x60] sm:$0xff] %v2912_v14 }
 0x28b   : > { %v3095_v18 = vld [vmem:[#allocation2 + $0x26] ss:$2 sm:$0xff]  ;;  %v2913_v25 = vadd.f32 %v10091_v53, %v2847_v20  ;;  %v3122_v29 = vld [vmem:[#allocation2 + $0x27] ss:$2 sm:$0xff]  ;;  %2934 = vst [vmem:[#allocation2 + $0x78] sm:$0xff] %v2915_v24 }
 0x28c   : > { %v10117_v6 = vmax.f32 %v3162_v62, %v3172_v2  ;;  %v3136_v7 = vmax.f32 %v3109_v63, %v3120_v3  ;;  %v3030_v9 = vmax.f32 %v3003_v1, %v3016_v5  ;;  %v3083_v12 = vmax.f32 %v3056_v4, %v3068_v8  ;;  %v3149_v33 = vld [vmem:[#allocation2 + $0x28] ss:$2 sm:$0xff]  ;;  %v2964_v35 = vld [vmem:[#allocation2 + $0x41] ss:$2 sm:$0xff]  ;;  %v2966_v49 = vld [vmem:[#allocation2 + $0x51] ss:$2 sm:$0xff] }
 0x28d   : > { %v2946_v34 = vld [vmem:[#allocation2 + $0x40] ss:$2 sm:$0xff]  ;;  %2932 = vst [vmem:[#allocation2 + $0x68] sm:$0xff] %v2913_v25  ;;  %v3176_v41 = vld [vmem:[#allocation2 + $0x29] ss:$2 sm:$0xff] }
 0x28e   : > { %v10121_v16 = vmul.f32 0.70710677, %v10117_v6  ;;  %v3163_v17 = vmax.f32 %v3136_v7, %v3147_v11  ;;  %v3057_v19 = vmax.f32 %v3030_v9, %v3043_v13  ;;  %v3110_v22 = vmax.f32 %v3083_v12, %v3095_v18  ;;  %v8487_v26 = vpop.f32.mrb[52].mxu0  ;;  %v3097_v42 = vld [vmem:[#allocation2 + $0x36] ss:$2 sm:$0xff] }
 0x28f   : > { %v2860_v31 = vpop.f32.mrb[53].mxu0  ;;  %v2892_v36 = vadd.f32 %v8487_v26, %v10078_v46  ;;  %v3124_v45 = vld [vmem:[#allocation2 + $0x37] ss:$2 sm:$0xff]  ;;  %v2948_v47 = vld [vmem:[#allocation2 + $0x50] ss:$2 sm:$0xff]  ;;  %v2977_v50 = vmax.f32 %v2946_v34, %v2964_v35 }
 0x290   : > { %v3216_v27 = vand.u32 2147483647, %v10121_v16  ;;  %v10126_v28 = vmax.f32 %v3163_v17, %v3174_v21  ;;  %v3084_v30 = vmax.f32 %v3057_v19, %v3070_v23  ;;  %v3137_v32 = vmax.f32 %v3110_v22, %v3122_v29  ;;  %v2991_v46 = vld [vmem:[#allocation2 + $0x42] ss:$2 sm:$0xff]  ;;  %v3018_v62 = vld [vmem:[#allocation2 + $0x43] ss:$2 sm:$0xff] }
 0x291   : > { %v2890_v37 = vadd.f32 %v2860_v31, %v10080_v48  ;;  %v2918_v52 = vadd.f32 %v10091_v53, %v2892_v36  ;;  %v3151_v57 = vld [vmem:[#allocation2 + $0x38] ss:$2 sm:$0xff]  ;;  %v3004_v58 = vmax.f32 %v2977_v50, %v2991_v46  ;;  %v2978_v61 = vmax.f32 %v2948_v47, %v2966_v49  ;;  %v8488_v63 = vpop.f32.mrb[54].mxu0  ;;  %v3178_v8 = vld [vmem:[#allocation2 + $0x39] ss:$2 sm:$0xff] }
 0x292   : > { %v3225_v38 = vmul.f32 0.3275911, %v3216_v27  ;;  %v10131_v39 = vmul.f32 0.70710677, %v10126_v28  ;;  %v3164_v43 = vmax.f32 %v3137_v32, %v3149_v33  ;;  %v3111_v44 = vmax.f32 %v3084_v30, %v3097_v42  ;;  %v2993_v3 = vld [vmem:[#allocation2 + $0x52] ss:$2 sm:$0xff] }
 0x293   : > { %2937 = vst [vmem:[#allocation2 + $0x90] sm:$0x1f] %v2918_v52  ;;  %v2916_v59 = vadd.f32 %v10091_v53, %v2890_v37  ;;  %v3031_v2 = vmax.f32 %v3004_v58, %v3018_v62  ;;  %v2863_v4 = vpop.f32.mrb[55].mxu0  ;;  %v3333_v5 = vsub.f32 0.0, %v3216_v27  ;;  %v3045_v9 = vld [vmem:[#allocation2 + $0x44] ss:$2 sm:$0xff]  ;;  %v3005_v10 = vmax.f32 %v2978_v61, %v2993_v3 }
 0x294   : > { %v3234_v54 = vadd.f32 1.0, %v3225_v38  ;;  %v10135_v55 = vand.u32 2147483647, %v10131_v39  ;;  %v10137_v48 = vmax.f32 %v3164_v43, %v3176_v41  ;;  %v3138_v56 = vmax.f32 %v3111_v44, %v3124_v45  ;;  %v3020_v14 = vld [vmem:[#allocation2 + $0x53] ss:$2 sm:$0xff] }
 0x295   : > { %2935 = vst [vmem:[#allocation2 + $0x80] sm:$0xff] %v2916_v59  ;;  %v3058_v13 = vmax.f32 %v3031_v2, %v3045_v9  ;;  %v3072_v15 = vld [vmem:[#allocation2 + $0x45] ss:$2 sm:$0xff]  ;;  %v3032_v17 = vmax.f32 %v3005_v10, %v3020_v14  ;;  %v2891_v18 = vadd.f32 %v2863_v4, %v10083_v51  ;;  %v3047_v21 = vld [vmem:[#allocation2 + $0x54] ss:$2 sm:$0xff]  ;;  %v3342_v22 = vmul.f32 %v3333_v5, %v3216_v27 }
 0x296   : > { %9340 = vrcp.f32 %v3234_v54  ;;  %v3226_v60 = vmul.f32 0.3275911, %v10135_v55  ;;  %v10142_v0 = vmul.f32 0.70710677, %v10137_v48  ;;  %v3165_v1 = vmax.f32 %v3138_v56, %v3151_v57  ;;  %v3099_v24 = vld [vmem:[#allocation2 + $0x46] ss:$2 sm:$0xff] }
 0x297   : > { %v3085_v23 = vmax.f32 %v3058_v13, %v3072_v15  ;;  %v3059_v25 = vmax.f32 %v3032_v17, %v3047_v21  ;;  %v2917_v26 = vadd.f32 %v10091_v53, %v2891_v18  ;;  %v3334_v29 = vsub.f32 0.0, %v10135_v55  ;;  %v3126_v32 = vld [vmem:[#allocation2 + $0x47] ss:$2 sm:$0xff]  ;;  %v3101_v35 = vld [vmem:[#allocation2 + $0x56] ss:$2 sm:$0xff] }
 0x298   : > { %v3235_v7 = vadd.f32 1.0, %v3226_v60  ;;  %v10145_v11 = vand.u32 2147483647, %v10142_v0  ;;  %v10147_v12 = vmax.f32 %v3165_v1, %v3178_v8  ;;  %v3074_v51 = vld [vmem:[#allocation2 + $0x55] ss:$2 sm:$0xff]  ;;  %v10170_v10 = vmul.f32 0.5, %v10117_v6 }
 0x299   : > { %v3112_v33 = vmax.f32 %v3085_v23, %v3099_v24  ;;  %v3086_v34 = vmax.f32 %v3059_v25, %v3074_v51  ;;  %v2950_v36 = vld [vmem:[#allocation2 + $0x60] ss:$2 sm:$0xff]  ;;  %v2968_v37 = vld [vmem:[#allocation2 + $0x61] ss:$2 sm:$0xff]  ;;  %2936 = vst [vmem:[#allocation2 + $0x88] sm:$0xff] %v2917_v26  ;;  %v3343_v63 = vmul.f32 %v3334_v29, %v10135_v55  ;;  %v10176_v17 = vmul.f32 0.5, %v10126_v28 }
 0x29a   : > { %9342 = vrcp.f32 %v3235_v7  ;;  %v3227_v19 = vmul.f32 0.3275911, %v10145_v11  ;;  %v10152_v20 = vmul.f32 0.70710677, %v10147_v12  ;;  %v2952_v38 = vld [vmem:[#allocation2 + $0x70] ss:$2 sm:$0xff]  ;;  %v2979_v49 = vmax.f32 %v2950_v36, %v2968_v37 }
 0x29b   : > { %v2970_v41 = vld [vmem:[#allocation2 + $0x71] ss:$2 sm:$0xff]  ;;  %v3351_v42 = vmul.f32 1.442695, %v3342_v22  ;;  %v3139_v43 = vmax.f32 %v3112_v33, %v3126_v32  ;;  %v3153_v44 = vld [vmem:[#allocation2 + $0x48] ss:$2 sm:$0xff]  ;;  %v3113_v45 = vmax.f32 %v3086_v34, %v3101_v35 }
 0x29c   : > { %v3236_v30 = vadd.f32 1.0, %v3227_v19  ;;  %v10157_v31 = vand.u32 2147483647, %v10152_v20  ;;  %v3128_v47 = vld [vmem:[#allocation2 + $0x57] ss:$2 sm:$0xff]  ;;  %v3335_v52 = vsub.f32 0.0, %v10145_v11  ;;  %v2980_v60 = vmax.f32 %v2952_v38, %v2970_v41 }
 0x29d   : > { %v2995_v46 = vld [vmem:[#allocation2 + $0x62] ss:$2 sm:$0xff]  ;;  %v3166_v56 = vmax.f32 %v3139_v43, %v3153_v44  ;;  %v3180_v57 = vld [vmem:[#allocation2 + $0x49] ss:$2 sm:$0xff]  ;;  %v3140_v58 = vmax.f32 %v3113_v45, %v3128_v47  ;;  %v2997_v2 = vld [vmem:[#allocation2 + $0x72] ss:$2 sm:$0xff] }
 0x29e   : > { %9344 = vrcp.f32 %v3236_v30  ;;  %v3228_v27 = vmul.f32 0.3275911, %v10157_v31  ;;  %v3155_v59 = vld [vmem:[#allocation2 + $0x58] ss:$2 sm:$0xff]  ;;  %v3006_v61 = vmax.f32 %v2979_v49, %v2995_v46  ;;  %v3022_v1 = vld [vmem:[#allocation2 + $0x63] ss:$2 sm:$0xff]  ;;  %v3007_v9 = vmax.f32 %v2980_v60, %v2997_v2 }
 0x29f   : > { %v10167_v4 = vmax.f32 %v3166_v56, %v3180_v57  ;;  %v3167_v5 = vmax.f32 %v3140_v58, %v3155_v59  ;;  %v3182_v7 = vld [vmem:[#allocation2 + $0x59] ss:$2 sm:$0xff]  ;;  %v3336_v55 = vsub.f32 0.0, %v10157_v31  ;;  %v3049_v15 = vld [vmem:[#allocation2 + $0x64] ss:$2 sm:$0xff]  ;;  %v3344_v26 = vmul.f32 %v3335_v52, %v10145_v11 }
 0x2a0   : > { %v10160_v53 = vpop.eup %9340  ;;  %v3237_v54 = vadd.f32 1.0, %v3228_v27  ;;  %v3033_v8 = vmax.f32 %v3006_v61, %v3022_v1  ;;  %v3024_v22 = vld [vmem:[#allocation2 + $0x73] ss:$2 sm:$0xff]  ;;  %v3353_v24 = vmul.f32 1.442695, %v3343_v63  ;;  %vm3387_vm1 = vcmp.ge.f32.partialorder %v10121_v16, 0.0 }
 0x2a1   : > { %v3252_v50 = vmul.f32 1.0614054, %v10160_v53  ;;  %v10179_v18 = vmul.f32 0.70710677, %v10167_v4  ;;  %v10181_v19 = vmax.f32 %v3167_v5, %v3182_v7  ;;  %v3034_v25 = vmax.f32 %v3007_v9, %v3024_v22  ;;  %v3076_v28 = vld [vmem:[#allocation2 + $0x65] ss:$2 sm:$0xff] }
 0x2a2   : > { %9346 = vrcp.f32 %v3237_v54  ;;  %v3060_v21 = vmax.f32 %v3033_v8, %v3049_v15  ;;  %v3345_v34 = vmul.f32 %v3336_v55, %v10157_v31  ;;  %v3051_v36 = vld [vmem:[#allocation2 + $0x74] ss:$2 sm:$0xff]  ;;  %v3355_v45 = vmul.f32 1.442695, %v3344_v26  ;;  %v3078_v56 = vld [vmem:[#allocation2 + $0x75] ss:$2 sm:$0xff] }
 0x2a3   : > { %v3261_v62 = vadd.f32 -1.4531521, %v3252_v50  ;;  %9348 = vpow2.f32 %v3351_v42  ;;  %v3220_v29 = vand.u32 2147483647, %v10179_v18  ;;  %v10186_v30 = vmul.f32 0.70710677, %v10181_v19 }
 0x2a4   : > { %v10165_v3 = vpop.eup %9342  ;;  %v3087_v35 = vmax.f32 %v3060_v21, %v3076_v28  ;;  %v3103_v11 = vld [vmem:[#allocation2 + $0x66] ss:$2 sm:$0xff]  ;;  %v3061_v38 = vmax.f32 %v3034_v25, %v3051_v36  ;;  %9350 = vpow2.f32 %v3353_v24  ;;  %v3357_v54 = vmul.f32 1.442695, %v3345_v34  ;;  %v3130_v59 = vld [vmem:[#allocation2 + $0x67] ss:$2 sm:$0xff] }
 0x2a5   : > { %v3270_v13 = vmul.f32 %v10160_v53, %v3261_v62  ;;  %v3253_v14 = vmul.f32 1.0614054, %v10165_v3  ;;  %v3229_v27 = vmul.f32 0.3275911, %v3220_v29  ;;  %v3221_v43 = vand.u32 2147483647, %v10186_v30 }
 0x2a6   : > { %v3114_v49 = vmax.f32 %v3087_v35, %v3103_v11  ;;  %v3088_v60 = vmax.f32 %v3061_v38, %v3078_v56  ;;  %v3337_v63 = vsub.f32 0.0, %v3220_v29  ;;  %v3157_v2 = vld [vmem:[#allocation2 + $0x68] ss:$2 sm:$0xff]  ;;  %v2972_v15 = vld [vmem:[#allocation2 + $0x81] ss:$2 sm:$0x3f] }
 0x2a7   : > { %v3279_v23 = vadd.f32 1.4214138, %v3270_v13  ;;  %v3262_v6 = vadd.f32 -1.4531521, %v3253_v14  ;;  %v3238_v47 = vadd.f32 1.0, %v3229_v27  ;;  %vm3388_vm2 = vcmp.ge.f32.partialorder %v10131_v39, 0.0 }
 0x2a8   : > { %v10188_v32 = vpop.eup %9344  ;;  %v3230_v46 = vmul.f32 0.3275911, %v3221_v43  ;;  %v3141_v8 = vmax.f32 %v3114_v49, %v3130_v59  ;;  %v3105_v9 = vld [vmem:[#allocation2 + $0x76] ss:$2 sm:$0xff]  ;;  %v3346_v28 = vmul.f32 %v3337_v63, %v3220_v29  ;;  %v3132_v36 = vld [vmem:[#allocation2 + $0x77] ss:$2 sm:$0xff] }
 0x2a9   : > { %v3288_v51 = vmul.f32 %v10160_v53, %v3279_v23  ;;  %v3271_v33 = vmul.f32 %v10165_v3, %v3262_v6  ;;  %v3254_v37 = vmul.f32 1.0614054, %v10188_v32  ;;  %9352 = vrcp.f32 %v3238_v47  ;;  %v2954_v55 = vld [vmem:[#allocation2 + $0x80] ss:$2 sm:$0x3f] }
 0x2aa   : > { %v3239_v1 = vadd.f32 1.0, %v3230_v46  ;;  %9354 = vpow2.f32 %v3355_v45  ;;  %v3168_v6 = vmax.f32 %v3141_v8, %v3157_v2  ;;  %v3115_v24 = vmax.f32 %v3088_v60, %v3105_v9  ;;  %v3159_v47 = vld [vmem:[#allocation2 + $0x78] ss:$2 sm:$0xff] }
 0x2ab   : > { %v3297_v41 = vadd.f32 -0.28449672, %v3288_v51  ;;  %v3280_v42 = vadd.f32 1.4214138, %v3271_v33  ;;  %v3263_v44 = vadd.f32 -1.4531521, %v3254_v37  ;;  %v2981_v37 = vmax.f32 %v2954_v55, %v2972_v15 }
 0x2ac   : > { %v10195_v50 = vpop.eup %9346  ;;  %9356 = vrcp.f32 %v3239_v1  ;;  %v3338_v51 = vsub.f32 0.0, %v3221_v43  ;;  %v3184_v33 = vld [vmem:[#allocation2 + $0x69] ss:$2 sm:$0xff]  ;;  %v2999_v56 = vld [vmem:[#allocation2 + $0x82] ss:$2 sm:$0x3f] }
 0x2ad   : > { %v3306_v31 = vmul.f32 %v10160_v53, %v3297_v41  ;;  %v3289_v52 = vmul.f32 %v10165_v3, %v3280_v42  ;;  %v3272_v57 = vmul.f32 %v10188_v32, %v3263_v44  ;;  %v3255_v58 = vmul.f32 1.0614054, %v10195_v50  ;;  %v9349_v21 = vpop.eup %9348 }
 0x2ae   : > { %v10207_v35 = vmax.f32 %v3168_v6, %v3184_v33  ;;  %v9351_v27 = vpop.eup %9350  ;;  %9358 = vpow2.f32 %v3357_v54  ;;  %v3142_v41 = vmax.f32 %v3115_v24, %v3132_v36  ;;  %v10211_v42 = vmul.f32 0.5, %v10137_v48 }
 0x2af   : > { %v3315_v61 = vadd.f32 0.2548296, %v3306_v31  ;;  %v3298_v62 = vadd.f32 -0.28449672, %v3289_v52  ;;  %v3281_v5 = vadd.f32 1.4214138, %v3272_v57  ;;  %v3347_v46 = vmul.f32 %v3338_v51, %v3221_v43 }
 0x2b0   : > { %v3264_v7 = vadd.f32 -1.4531521, %v3255_v58  ;;  %v10216_v45 = vmul.f32 0.70710677, %v10207_v35  ;;  %v3359_v52 = vmul.f32 1.442695, %v3346_v28  ;;  %v3008_v58 = vmax.f32 %v2981_v37, %v2999_v56 }
 0x2b1   : > { %v3324_v13 = vmul.f32 %v10160_v53, %v3315_v61  ;;  %v3307_v14 = vmul.f32 %v10165_v3, %v3298_v62  ;;  %v3290_v22 = vmul.f32 %v10188_v32, %v3281_v5  ;;  %vm3389_vm3 = vcmp.ge.f32.partialorder %v10142_v0, 0.0 }
 0x2b2   : > { %v3273_v23 = vmul.f32 %v10195_v50, %v3264_v7  ;;  %v10221_v48 = vand.u32 2147483647, %v10216_v45  ;;  %v3169_v62 = vmax.f32 %v3142_v41, %v3159_v47  ;;  %9360 = vpow2.f32 %v3359_v52 }
 0x2b3   : > { %v3369_v25 = vmul.f32 %v9349_v21, %v3324_v13  ;;  %v3316_v26 = vadd.f32 0.2548296, %v3307_v14  ;;  %v3299_v53 = vadd.f32 -0.28449672, %v3290_v22  ;;  %v10218_v57 = vpop.eup %9352  ;;  %v3361_v16 = vmul.f32 1.442695, %v3347_v46 }
 0x2b4   : > { %v3282_v34 = vadd.f32 1.4214138, %v3273_v23  ;;  %v3256_v61 = vmul.f32 1.0614054, %v10218_v57  ;;  %v9355_v63 = vpop.eup %9354  ;;  %v3231_v5 = vmul.f32 0.3275911, %v10221_v48 }
 0x2b5   : > { %v3378_v11 = vsub.f32 1.0, %v3369_v25  ;;  %v3325_v38 = vmul.f32 %v10165_v3, %v3316_v26  ;;  %v3308_v29 = vmul.f32 %v10188_v32, %v3299_v53  ;;  %v3186_v21 = vld [vmem:[#allocation2 + $0x79] ss:$2 sm:$0xff]  ;;  %vm3390_vm4 = vcmp.ge.f32.partialorder %v10152_v20, 0.0 }
 0x2b6   : > { %v3291_v44 = vmul.f32 %v10195_v50, %v3282_v34  ;;  %v10230_v7 = vpop.eup %9356  ;;  %v3265_v9 = vadd.f32 -1.4531521, %v3256_v61  ;;  %v3240_v6 = vadd.f32 1.0, %v3231_v5  ;;  %v10242_v24 = vmax.f32 %v3169_v62, %v3186_v21  ;;  %v3026_v25 = vld [vmem:[#allocation2 + $0x83] ss:$2 sm:$0x3f] }
 0x2b7   : > { %v3396_v49 = vsub.f32 0.0, %v3378_v11  ;;  %v3370_v31 = vmul.f32 %v9351_v27, %v3325_v38  ;;  %v3317_v3 = vadd.f32 0.2548296, %v3308_v29  ;;  %v3257_v15 = vmul.f32 1.0614054, %v10230_v7 }
 0x2b8   : > { %v3300_v54 = vadd.f32 -0.28449672, %v3291_v44  ;;  %v3274_v23 = vmul.f32 %v10218_v57, %v3265_v9  ;;  %v3035_v51 = vmax.f32 %v3008_v58, %v3026_v25  ;;  %v9359_v33 = vpop.eup %9358  ;;  %9362 = vrcp.f32 %v3240_v6  ;;  %v3053_v29 = vld [vmem:[#allocation2 + $0x84] ss:$2 sm:$0x3f] }
 0x2b9   : > { %v3405_v59 = vsel %vm3387_vm1, %v3378_v11, %v3396_v49  ;;  %v3379_v60 = vsub.f32 1.0, %v3370_v31  ;;  %v3326_v1 = vmul.f32 %v10188_v32, %v3317_v3  ;;  %v10237_v32 = vld [vmem:[%s11510_s3] ss:$0 sm:$0xff]  ;;  %v3266_v34 = vadd.f32 -1.4531521, %v3257_v15 }
 0x2ba   : > { %v3414_v43 = vadd.f32 1.0, %v3405_v59  ;;  %v3309_v2 = vmul.f32 %v10195_v50, %v3300_v54  ;;  %v3283_v53 = vadd.f32 1.4214138, %v3274_v23  ;;  %v10251_v11 = vld [vmem:[%s11511_s4] ss:$0 sm:$0xff]  ;;  %9364 = vpow2.f32 %v3361_v16 }
 0x2bb   : > { %v3397_v8 = vsub.f32 0.0, %v3379_v60  ;;  %v3371_v14 = vmul.f32 %v9355_v63, %v3326_v1  ;;  %v3275_v38 = vmul.f32 %v10230_v7, %v3266_v34  ;;  %v10256_v41 = vmul.f32 0.70710677, %v10242_v24  ;;  %v3080_v31 = vld [vmem:[#allocation2 + $0x85] ss:$2 sm:$0x3f] }
 0x2bc   : > { %v3423_v13 = vmul.f32 %v3414_v43, %v10170_v10  ;;  %v3318_v55 = vadd.f32 0.2548296, %v3309_v2  ;;  %v3062_v49 = vmax.f32 %v3035_v51, %v3053_v29  ;;  %v3339_v3 = vsub.f32 0.0, %v10221_v48  ;;  %v9361_v61 = vpop.eup %9360  ;;  %v3107_v43 = vld [vmem:[#allocation2 + $0x86] ss:$2 sm:$0x3f] }
 0x2bd   : > { %v3406_v22 = vsel %vm3388_vm2, %v3379_v60, %v3397_v8  ;;  %v3380_v26 = vsub.f32 1.0, %v3371_v14  ;;  %v3284_v56 = vadd.f32 1.4214138, %v3275_v38  ;;  %v10263_v58 = vand.u32 2147483647, %v10256_v41 }
 0x2be   : > { %v3415_v10 = vadd.f32 1.0, %v3406_v22  ;;  %v3327_v28 = vmul.f32 %v10195_v50, %v3318_v55  ;;  %v3439_v39 = vmul.f32 %v10237_v32, %v3423_v13  ;;  %v3292_v50 = vmul.f32 %v10218_v57, %v3283_v53  ;;  %v3134_v16 = vld [vmem:[#allocation2 + $0x87] ss:$2 sm:$0x3f] }
 0x2bf   : > { %v3398_v37 = vsub.f32 0.0, %v3380_v26  ;;  %v3089_v59 = vmax.f32 %v3062_v49, %v3080_v31  ;;  %v3293_v63 = vmul.f32 %v10230_v7, %v3284_v56  ;;  %v3201_v2 = vmul.f32 0.5, %v10147_v12  ;;  %v3161_v25 = vld [vmem:[#allocation2 + $0x88] ss:$2 sm:$0x3f] }
 0x2c0   : > { %v3424_v36 = vmul.f32 %v3415_v10, %v10176_v17  ;;  %v3372_v27 = vmul.f32 %v9359_v33, %v3327_v28  ;;  %v3301_v46 = vadd.f32 -0.28449672, %v3292_v50  ;;  %v3455_v60 = vadd.f32 %v10251_v11, %v3439_v39  ;;  %v3188_v34 = vld [vmem:[#allocation2 + $0x89] ss:$2 sm:$0x3f] }
 0x2c1   : > { %v3407_v17 = vsel %vm3389_vm3, %v3380_v26, %v3398_v37  ;;  %v3232_v8 = vmul.f32 0.3275911, %v10263_v58  ;;  %v3116_v9 = vmax.f32 %v3089_v59, %v3107_v43  ;;  %v3302_v55 = vadd.f32 -0.28449672, %v3293_v63 }
 0x2c2   : > { %v3440_v44 = vmul.f32 %v10237_v32, %v3424_v36  ;;  %v3381_v47 = vsub.f32 1.0, %v3372_v27  ;;  %v3416_v52 = vadd.f32 1.0, %v3407_v17  ;;  %v3310_v0 = vmul.f32 %v10218_v57, %v3301_v46  ;;  %3474 = vst [vmem:[#allocation3 + $0x8] sm:$0xff] %v3455_v60  ;;  %v10276_v23 = vpop.eup %9362 }
 0x2c3   : > { %v3348_v15 = vmul.f32 %v3339_v3, %v10221_v48  ;;  %v3241_v21 = vadd.f32 1.0, %v3232_v8  ;;  %v3143_v22 = vmax.f32 %v3116_v9, %v3134_v16  ;;  %v3311_v6 = vmul.f32 %v10230_v7, %v3302_v55 }
 0x2c4   : > { %v3399_v54 = vsub.f32 0.0, %v3381_v47  ;;  %v3425_v62 = vmul.f32 %v3416_v52, %v10211_v42  ;;  %v3456_v1 = vadd.f32 %v10251_v11, %v3440_v44  ;;  %v3319_v14 = vadd.f32 0.2548296, %v3310_v0  ;;  %v9365_v51 = vpop.eup %9364 }
 0x2c5   : > { %v3258_v26 = vmul.f32 1.0614054, %v10276_v23  ;;  %9366 = vrcp.f32 %v3241_v21  ;;  %v3170_v28 = vmax.f32 %v3143_v22, %v3161_v25  ;;  %v3320_v53 = vadd.f32 0.2548296, %v3311_v6  ;;  %v8909_v22 = vld [vmem:[%s11512_s5 + $0x8] sm:$0xff]  }
 0x2c6   : > { %v3408_v5 = vsel %vm3390_vm4, %v3381_v47, %v3399_v54  ;;  %v3441_v13 = vmul.f32 %v10237_v32, %v3425_v62  ;;  %3475 = vst [vmem:[#allocation3 + $0x10] sm:$0xff] %v3456_v1  ;;  %v3328_v20 = vmul.f32 %v10218_v57, %v3319_v14  ;;  %v3363_v27 = vmul.f32 1.442695, %v3348_v15 }
 0x2c7   : > { %v3417_v42 = vadd.f32 1.0, %v3408_v5  ;;  %v3267_v39 = vadd.f32 -1.4531521, %v3258_v26  ;;  %v10283_v36 = vmax.f32 %v3170_v28, %v3188_v34  ;;  %v3329_v37 = vmul.f32 %v10230_v7, %v3320_v53  ;;  %v8910_v28 = vld [vmem:[%s11512_s5 + $0x10] sm:$0xff]  }
 0x2c8   : > { %v3457_v10 = vadd.f32 %v10251_v11, %v3441_v13  ;;  %v3373_v48 = vmul.f32 %v9361_v61, %v3328_v20  ;;  %vm3391_vm5 = vcmp.ge.f32.partialorder %v10179_v18, 0.0  ;;  %v3340_v49 = vsub.f32 0.0, %v10263_v58 }
 0x2c9   : > { %v3426_v12 = vmul.f32 %v3417_v42, %v3201_v2  ;;  %v3276_v38 = vmul.f32 %v10276_v23, %v3267_v39  ;;  %v10289_v29 = vmul.f32 0.70710677, %v10283_v36  ;;  %v3374_v17 = vmul.f32 %v9365_v51, %v3329_v37  ;;  %v8911_v37 = vld [vmem:[%s11512_s5 + $0x18] sm:$0xff]  }
 0x2ca   : > { %3476 = vst [vmem:[#allocation3 + $0x18] sm:$0xff] %v3457_v10  ;;  %v3382_v57 = vsub.f32 1.0, %v3373_v48  ;;  %9368 = vpow2.f32 %v3363_v27  ;;  %v3202_v46 = vmul.f32 0.5, %v10167_v4  ;;  %vm3392_vm6 = vcmp.ge.f32.partialorder %v10186_v30, 0.0  ;;  %v8908_v30 = vld [vmem:[%s11512_s5] sm:$0xff]  }
 0x2cb   : > { %v3442_v33 = vmul.f32 %v10237_v32, %v3426_v12  ;;  %v3285_v47 = vadd.f32 1.4214138, %v3276_v38  ;;  %v3224_v31 = vand.u32 2147483647, %v10289_v29  ;;  %v3383_v7 = vsub.f32 1.0, %v3374_v17  ;;  %v10323_v17 = vld [vmem:[#allocation3] sm:$0xff] }
 0x2cc   : > { %v3400_v44 = vsub.f32 0.0, %v3382_v57  ;;  %v3349_v62 = vmul.f32 %v3340_v49, %v10263_v58  ;;  %v3203_v63 = vmul.f32 0.5, %v10181_v19  ;;  %vm3393_vm7 = vcmp.ge.f32.partialorder %v10216_v45, 0.0 }
 0x2cd   : > { %v3458_v50 = vadd.f32 %v10251_v11, %v3442_v33  ;;  %v3294_v3 = vmul.f32 %v10276_v23, %v3285_v47  ;;  %v3233_v54 = vmul.f32 0.3275911, %v3224_v31  ;;  %v3401_v59 = vsub.f32 0.0, %v3383_v7  ;;  %v3513_v8 = vld [vmem:[#allocation3 + $0x7] ss:$2 sm:$0xff] }
 0x2ce   : > { %v3409_v52 = vsel %vm3391_vm5, %v3382_v57, %v3400_v44  ;;  %v3365_v14 = vmul.f32 1.442695, %v3349_v62  ;;  %v3341_v25 = vsub.f32 0.0, %v3224_v31  ;;  %v3204_v27 = vmul.f32 0.5, %v10207_v35 }
 0x2cf   : > { %3477 = vst [vmem:[#allocation3 + $0x20] sm:$0xff] %v3458_v50  ;;  %v3418_v56 = vadd.f32 1.0, %v3409_v52  ;;  %v9367_v60 = vpop.eup %9366  ;;  %v3303_v18 = vadd.f32 -0.28449672, %v3294_v3  ;;  %v3242_v0 = vadd.f32 1.0, %v3233_v54  ;;  %v3410_v43 = vsel %vm3392_vm6, %v3383_v7, %v3401_v59  ;;  %v8912_v52 = vld [vmem:[%s11512_s5 + $0x20] sm:$0xff]  }
 0x2d0   : > { %v3259_v1 = vmul.f32 1.0614054, %v9367_v60  ;;  %v3419_v4 = vadd.f32 1.0, %v3410_v43  ;;  %v3350_v53 = vmul.f32 %v3341_v25, %v3224_v31  ;;  %v8913_v59 = vld [vmem:[%s11512_s5 + $0x28] sm:$0xff]   ;;  %vm3394_vm8 = vcmp.ge.f32.partialorder %v10256_v41, 0.0  ;;  %v8914_v43 = vld [vmem:[%s11512_s5 + $0x30] sm:$0xff]  }
 0x2d1   : > { %v3427_v61 = vmul.f32 %v3418_v56, %v3202_v46  ;;  %v3312_v5 = vmul.f32 %v10276_v23, %v3303_v18  ;;  %9370 = vrcp.f32 %v3242_v0  ;;  %v3205_v0 = vmul.f32 0.5, %v10242_v24  ;;  %v8915_v41 = vld [vmem:[%s11512_s5 + $0x38] sm:$0xff]  }
 0x2d2   : > { %v3268_v16 = vadd.f32 -1.4531521, %v3259_v1  ;;  %v3428_v58 = vmul.f32 %v3419_v4, %v3203_v63  ;;  %9372 = vpow2.f32 %v3365_v14  ;;  %vm3395_vm9 = vcmp.ge.f32.partialorder %v10289_v29, 0.0  ;;  %v3484_v29 = vld [vmem:[#allocation3 + $0x6] ss:$2 sm:$0xff] }
 0x2d3   : > { %v3443_v2 = vmul.f32 %v10237_v32, %v3427_v61  ;;  %v3321_v42 = vadd.f32 0.2548296, %v3312_v5 }
 0x2d4   : > { %v3277_v55 = vmul.f32 %v9367_v60, %v3268_v16  ;;  %v3444_v15 = vmul.f32 %v10237_v32, %v3428_v58  ;;  %v9369_v12 = vpop.eup %9368  ;;  %v3206_v58 = vmul.f32 0.5, %v10283_v36 }
 0x2d5   : > { %v3459_v19 = vadd.f32 %v10251_v11, %v3443_v2  ;;  %v3330_v21 = vmul.f32 %v10276_v23, %v3321_v42 }
 0x2d6   : > { %v3515_v9 = vld [vmem:[#allocation3 + $0x17] ss:$2 sm:$0xff]  ;;  %v3286_v20 = vadd.f32 1.4214138, %v3277_v55  ;;  %v3460_v10 = vadd.f32 %v10251_v11, %v3444_v15  ;;  %v3486_v36 = vld [vmem:[#allocation3 + $0x16] ss:$2 sm:$0xff] }
 0x2d7   : > { %v3522_v13 = vpack.c.bf16 %v3515_v9, %v3513_v8  ;;  %3478 = vst [vmem:[#allocation3 + $0x28] sm:$0xff] %v3459_v19  ;;  %v3375_v6 = vmul.f32 %v9369_v12, %v3330_v21 }
 0x2d8   : > { %v3295_v26 = vmul.f32 %v9367_v60, %v3286_v20  ;;  %3479 = vst [vmem:[#allocation3 + $0x30] sm:$0xff] %v3460_v10 }
 0x2d9   : > { %8506 = vmatmul.mubr.bf16.vlgmr.msra.gmra.mrb[0].mxu1 %v3522_v13  ;;  %v3384_v23 = vsub.f32 1.0, %v3375_v6  ;;  %v8916_v6 = vld [vmem:[%s11512_s5 + $0x80] sm:$0xff]  }
 0x2da   : > { %8518 = vmatpush3.bf16.msra.mxu1 %v8908_v30  ;;  %8509 = vmatprep.mubr.msk.bf16.mxu1 %vm9464_vm0, %v9463_v40  ;;  %v3304_v51 = vadd.f32 -0.28449672, %v3295_v26  ;;  %v8918_v26 = vld [vmem:[%s11512_s5 + $0x90] sm:$0xff]  }
 0x2db   : > { %8519 = vmatprep.subr.bf16.mxu1 %v9463_v40  ;;  %v9371_v33 = vpop.eup %9370  ;;  %v3402_v48 = vsub.f32 0.0, %v3384_v23 }
 0x2dc   : > { %v3313_v34 = vmul.f32 %v9367_v60, %v3304_v51  ;;  %v3260_v39 = vmul.f32 1.0614054, %v9371_v33  ;;  %v9373_v31 = vpop.eup %9372 }
 0x2dd   : > { %v3411_v57 = vsel %vm3393_vm7, %v3384_v23, %v3402_v48 }
 0x2de   : > { %8520 = vmatpush3.bf16.msra.mxu1 %v8909_v22  ;;  %v3420_v50 = vadd.f32 1.0, %v3411_v57  ;;  %v3322_v38 = vadd.f32 0.2548296, %v3313_v34  ;;  %v3269_v44 = vadd.f32 -1.4531521, %v3260_v39  ;;  %v8922_v34 = vld [vmem:[%s11512_s5 + $0xb0] sm:$0xff]  }
 0x2df   : > { %8521 = vmatprep.subr.bf16.mxu1 %v9463_v40  ;;  %v3367_v40 = vmul.f32 1.442695, %v3350_v53  ;;  %v3517_v19 = vld [vmem:[#allocation3 + $0x27] ss:$2 sm:$0xff]  ;;  %v3488_v10 = vld [vmem:[#allocation3 + $0x26] ss:$2 sm:$0xff] }
 0x2e0   : > { %v3429_v47 = vmul.f32 %v3420_v50, %v3204_v27  ;;  %v3331_v45 = vmul.f32 %v9367_v60, %v3322_v38  ;;  %v3278_v49 = vmul.f32 %v9371_v33, %v3269_v44  ;;  %v8921_v53 = vld [vmem:[%s11512_s5 + $0xa8] sm:$0xff]   ;;  %v8923_v39 = vld [vmem:[%s11512_s5 + $0xb8] sm:$0xff]   ;;  %v8924_v27 = vld [vmem:[%s11512_s5 + $0xc0] sm:$0xff]  }
 0x2e1   : > { %9374 = vpow2.f32 %v3367_v40  ;;  %v3753_v57 = vld [vmem:[#allocation3 + $0x18] ss:$2 sm:$0xff]  ;;  %v8925_v38 = vld [vmem:[%s11512_s5 + $0xc8] sm:$0xff]  }
 0x2e2   : > { %8522 = vmatpush3.bf16.msra.mxu1 %v8910_v28  ;;  %v3445_v7 = vmul.f32 %v10237_v32, %v3429_v47  ;;  %v3376_v35 = vmul.f32 %v9373_v31, %v3331_v45  ;;  %v3287_v46 = vadd.f32 1.4214138, %v3278_v49  ;;  %v8919_v28 = vld [vmem:[%s11512_s5 + $0x98] sm:$0xff]   ;;  %v3755_v40 = vld [vmem:[#allocation3 + $0x28] ss:$2 sm:$0xff]  ;;  %v8926_v47 = vld [vmem:[%s11512_s5 + $0xd0] sm:$0xff]  }
 0x2e3   : > { %8523 = vmatprep.subr.bf16.mxu1 %v10323_v17  ;;  %v8927_v49 = vld [vmem:[%s11512_s5 + $0xd8] sm:$0xff]  }
 0x2e4   : > { %v3385_v56 = vsub.f32 1.0, %v3376_v35  ;;  %v3296_v3 = vmul.f32 %v9371_v33, %v3287_v46  ;;  %v3461_v54 = vadd.f32 %v10251_v11, %v3445_v7  ;;  %v8929_v35 = vld [vmem:[%s11512_s5 + $0xe8] sm:$0xff]   ;;  %v8930_v46 = vld [vmem:[%s11512_s5 + $0xf0] sm:$0xff]  }
 0x2e6   : > { %8524 = vmatpush3.bf16.msra.mxu1 %v8911_v37  ;;  %v3403_v60 = vsub.f32 0.0, %v3385_v56  ;;  %v3305_v61 = vadd.f32 -0.28449672, %v3296_v3  ;;  %3480 = vst [vmem:[#allocation3 + $0x38] sm:$0xff] %v3461_v54  ;;  %v3751_v37 = vld [vmem:[#allocation3 + $0x8] ss:$2 sm:$0xff] }
 0x2e7   : > { %8525 = vmatprep.subr.bf16.mxu1 %v10323_v17  ;;  %v3760_v50 = vpack.c.bf16 %v3753_v57, %v3751_v37  ;;  %v3892_v3 = vld [vmem:[#allocation3 + $0x19] ss:$2 sm:$0xff]  ;;  %v3890_v54 = vld [vmem:[#allocation3 + $0x9] ss:$2 sm:$0xff] }
 0x2e8   : > { %v3412_v18 = vsel %vm3394_vm8, %v3385_v56, %v3403_v60  ;;  %v3314_v62 = vmul.f32 %v9371_v33, %v3305_v61  ;;  %v8931_v56 = vld [vmem:[%s11512_s5 + $0xf8] sm:$0xff]   ;;  %v3894_v61 = vld [vmem:[#allocation3 + $0x29] ss:$2 sm:$0xff] }
 0x2e9   : > { %v3421_v63 = vadd.f32 1.0, %v3412_v18  ;;  %v8958_v57 = vld [vmem:[%s11516_s9 + $0xd4] ss:$8 sps:$4 sm:$0xff]  }
 0x2ea   : > { %8526 = vmatpush3.bf16.msra.mxu1 %v8912_v52  ;;  %v3323_v1 = vadd.f32 0.2548296, %v3314_v62  ;;  %v8928_v52 = vld [vmem:[%s11512_s5 + $0xe0] sm:$0xff]   ;;  %v8961_v37 = vld [vmem:[%s11516_s9 + $0x4b4] ss:$8 sps:$4 sm:$0xff]  }
 0x2eb   : > { %8527 = vmatprep.subr.bf16.mxu1 %v10323_v17  ;;  %v3430_v2 = vmul.f32 %v3421_v63, %v3205_v0  ;;  %v9375_v5 = vpop.eup %9374 }
 0x2ec   : > { %v3332_v4 = vmul.f32 %v9371_v33, %v3323_v1  ;;  %v8920_v33 = vld [vmem:[%s11512_s5 + $0xa0] sm:$0xff]  }
 0x2ed   : > { %v3446_v8 = vmul.f32 %v10237_v32, %v3430_v2 }
 0x2ee   : > { %8528 = vmatpush3.bf16.msra.mxu1 %v8913_v59  ;;  %v3377_v24 = vmul.f32 %v9375_v5, %v3332_v4  ;;  %v3899_v59 = vpack.c.bf16 %v3892_v3, %v3890_v54  ;;  %v8971_v3 = vld [vmem:[%s11516_s9 + $0x4d0] ss:$8 sps:$4 sm:$0xff]   ;;  %v8976_v54 = vld [vmem:[%s11516_s9 + $0x4] ss:$8 sps:$4 sm:$0xff]  }
 0x2ef   : > { %8529 = vmatprep.subr.bf16.mxu1 %v10323_v17  ;;  %v3462_v9 = vadd.f32 %v10251_v11, %v3446_v8 }
 0x2f0   : > { %v3386_v30 = vsub.f32 1.0, %v3377_v24 }
 0x2f1   : > { %3481 = vst [vmem:[#allocation3 + $0x40] sm:$0xff] %v3462_v9  ;;  %v8934_v9 = vld [vmem:[%s11516_s9 + $0x84] ss:$8 sps:$4 sm:$0xff]  }
 0x2f2   : > { %8530 = vmatpush3.bf16.msra.mxu1 %v8914_v43  ;;  %v3404_v16 = vsub.f32 0.0, %v3386_v30 }
 0x2f3   : > { %8531 = vmatprep.subr.bf16.mxu1 %v10323_v17 }
 0x2f4   : > { %v3413_v13 = vsel %vm3395_vm9, %v3386_v30, %v3404_v16 }
 0x2f5   : > { %v3422_v42 = vadd.f32 1.0, %v3413_v13 }
 0x2f6   : > { %8532 = vmatpush3.bf16.msra.mxu1 %v8915_v41 }
 0x2f7   : > { %8545 = vmatprep.subr.bf16.mxu1 %v10323_v17  ;;  %v3431_v14 = vmul.f32 %v3422_v42, %v3206_v58  ;;  %v8937_v58 = vld [vmem:[%s11516_s9 + $0x94] ss:$8 sps:$4 sm:$0xff]   ;;  %v8935_v42 = vld [vmem:[%s11516_s9 + $0x90] ss:$8 sps:$4 sm:$0xff]  }
 0x2f8   : > { %v3519_v55 = vld [vmem:[#allocation3 + $0x37] ss:$2 sm:$0xff]  ;;  %v3490_v25 = vld [vmem:[#allocation3 + $0x36] ss:$2 sm:$0xff] }
 0x2f9   : > { %v3523_v15 = vpack.c.bf16 %v3519_v55, %v3517_v19  ;;  %v3447_v21 = vmul.f32 %v10237_v32, %v3431_v14  ;;  %v3493_v32 = vpack.c.bf16 %v3486_v36, %v3484_v29  ;;  %v3494_v23 = vpack.c.bf16 %v3490_v25, %v3488_v10  ;;  %v3757_v44 = vld [vmem:[#allocation3 + $0x38] ss:$2 sm:$0xff]  ;;  %v3896_v60 = vld [vmem:[#allocation3 + $0x39] ss:$2 sm:$0xff]  ;;  %v8940_v19 = vld [vmem:[%s11516_s9 + $0xa4] ss:$8 sps:$4 sm:$0xff]  }
 0x2fa   : > { %v3761_v45 = vpack.c.bf16 %v3757_v44, %v3755_v40  ;;  %v3900_v18 = vpack.c.bf16 %v3896_v60, %v3894_v61  ;;  %v8943_v55 = vld [vmem:[%s11516_s9 + $0x484] ss:$8 sps:$4 sm:$0xff]   ;;  %v8947_v25 = vld [vmem:[%s11516_s9 + $0x490] ss:$8 sps:$4 sm:$0xff]   ;;  %v8977_v61 = vld [vmem:[%s11516_s9 + $0x4e0] ss:$8 sps:$4 sm:$0xff]  }
 0x2fb   : > { %8510 = vmatmul.mubr.bf16.gmra.mrb[4].mxu1 %v3523_v15  ;;  %v3463_v22 = vadd.f32 %v10251_v11, %v3447_v21  ;;  %v8917_v11 = vld [vmem:[%s11512_s5 + $0x88] sm:$0xff]   ;;  %5550 = vmatprep.subr.bf16.mxu0 %v8943_v55  ;;  %v7336_v55 = vld [vmem:[%s11513_s6] ss:$0 sm:$0xff] }
 0x2fc   : > { %8513 = vmatprep.mubr.msk.bf16.mxu1 %vm9464_vm0, %v10323_v17  ;;  %v8964_v44 = vld [vmem:[%s11516_s9 + $0xe4] ss:$8 sps:$4 sm:$0xff]  }
 0x2fd   : > { %3482 = vst [vmem:[#allocation3 + $0x48] sm:$0x3f] %v3463_v22  ;;  %v8938_v22 = vld [vmem:[%s11516_s9 + $0xa0] ss:$8 sps:$4 sm:$0xff]   ;;  %v8967_v40 = vld [vmem:[%s11516_s9 + $0x4c4] ss:$8 sps:$4 sm:$0xff]  }
 0x2fe   : > { %v8979_v60 = vld [vmem:[%s11516_s9 + $0x4e4] ss:$8 sps:$4 sm:$0xff]  }
 0x304   : > { %v3521_v12 = vld [vmem:[#allocation3 + $0x47] ss:$2 sm:$0xf]  ;;  %v3492_v51 = vld [vmem:[#allocation3 + $0x46] ss:$2 sm:$0xf] }
 0x305   : > { %v3524_v20 = vpack.c.bf16 %v3521_v12, %v3521_v12  ;;  %v3495_v48 = vpack.c.bf16 %v3492_v51, %v3492_v51  ;;  %v3759_v31 = vld [vmem:[#allocation3 + $0x48] ss:$2 sm:$0xf]  ;;  %v3898_v62 = vld [vmem:[#allocation3 + $0x49] ss:$2 sm:$0xf] }
 0x306   : > { %v3762_v7 = vpack.c.bf16 %v3759_v31, %v3759_v31  ;;  %v3901_v0 = vpack.c.bf16 %v3898_v62, %v3898_v62  ;;  %v8941_v12 = vld [vmem:[%s11516_s9 + $0x480] ss:$8 sps:$4 sm:$0xff]   ;;  %v8983_v62 = vld [vmem:[%s11516_s9 + $0x4f0] ss:$8 sps:$4 sm:$0xff]  }
 0x307   : > { %8514 = vmatmul.mubr.bf16.gmra.mrb[8].mxu1 %v3524_v20  ;;  %5551 = vmatpush1.bf16.msra.mxu0 %v8941_v12  ;;  %v8965_v31 = vld [vmem:[%s11516_s9 + $0x4c0] ss:$8 sps:$4 sm:$0xff]  }
 0x308   : > { %8533 = vmatprep.mubr.msk.bf16.mxu1 %vm9464_vm0, %v10323_v17 }
 0x30f   : > { %8534 = vmatmul.mubr.bf16.vlgmr.msra.gmra.mrb[12].mxu1 %v3493_v32  ;;  %v8949_v32 = vld [vmem:[%s11516_s9 + $0x494] ss:$8 sps:$4 sm:$0xff]  }
 0x310   : > { %8546 = vmatpush3.bf16.msra.mxu1 %v8916_v6  ;;  %8537 = vmatprep.mubr.msk.bf16.mxu1 %vm9464_vm0, %v10323_v17  ;;  %v8946_v6 = vld [vmem:[%s11516_s9 + $0xb4] ss:$8 sps:$4 sm:$0xff]  }
 0x311   : > { %8547 = vmatprep.subr.bf16.mxu1 %v10323_v17  ;;  %5552 = vmatprep.subr.bf16.mxu0 %v8949_v32 }
 0x312   : > { %5553 = vmatpush1.bf16.msra.mxu0 %v8947_v25 }
 0x314   : > { %8548 = vmatpush3.bf16.msra.mxu1 %v8917_v11  ;;  %v8944_v11 = vld [vmem:[%s11516_s9 + $0xb0] ss:$8 sps:$4 sm:$0xff]  }
 0x315   : > { %8549 = vmatprep.subr.bf16.mxu1 %v10323_v17 }
 0x317   : > { %8538 = vmatmul.mubr.bf16.gmra.mrb[16].mxu1 %v3494_v23  ;;  %v8955_v23 = vld [vmem:[%s11516_s9 + $0x4a4] ss:$8 sps:$4 sm:$0xff]  }
 0x318   : > { %8550 = vmatpush3.bf16.msra.mxu1 %v8918_v26  ;;  %8541 = vmatprep.mubr.msk.bf16.mxu1 %vm9464_vm0, %v10323_v17  ;;  %v8952_v26 = vld [vmem:[%s11516_s9 + $0xc4] ss:$8 sps:$4 sm:$0xff]  }
 0x319   : > { %8551 = vmatprep.subr.bf16.mxu1 %v10323_v17  ;;  %5554 = vmatprep.subr.bf16.mxu0 %v8955_v23 }
 0x31c   : > { %8552 = vmatpush3.bf16.msra.mxu1 %v8919_v28 }
 0x31d   : > { %8553 = vmatprep.subr.bf16.mxu1 %v10323_v17 }
 0x31f   : > { %8542 = vmatmul.mubr.bf16.gmra.mrb[20].mxu1 %v3495_v48 }
 0x320   : > { %8554 = vmatpush3.bf16.msra.mxu1 %v8920_v33  ;;  %8561 = vmatprep.mubr.msk.bf16.mxu1 %vm9464_vm0, %v10323_v17  ;;  %v8950_v33 = vld [vmem:[%s11516_s9 + $0xc0] ss:$8 sps:$4 sm:$0xff]  }
 0x321   : > { %8555 = vmatprep.subr.bf16.mxu1 %v10323_v17 }
 0x324   : > { %8556 = vmatpush3.bf16.msra.mxu1 %v8921_v53  ;;  %v8953_v53 = vld [vmem:[%s11516_s9 + $0x4a0] ss:$8 sps:$4 sm:$0xff]  }
 0x325   : > { %8557 = vmatprep.subr.bf16.mxu1 %v10323_v17  ;;  %5555 = vmatpush1.bf16.msra.mxu0 %v8953_v53 }
 0x326   : > { %5556 = vmatprep.subr.bf16.mxu0 %v8961_v37 }
 0x328   : > { %8558 = vmatpush3.bf16.msra.mxu1 %v8922_v34 }
 0x329   : > { %8559 = vmatprep.subr.bf16.mxu1 %v10323_v17 }
 0x32c   : > { %8560 = vmatpush3.bf16.msra.mxu1 %v8923_v39 }
 0x32d   : > { %8573 = vmatprep.subr.bf16.mxu1 %v10323_v17 }
 0x32f   : > { %8562 = vmatmul.mubr.bf16.vlgmr.msra.gmra.mrb[24].mxu1 %v3760_v50  ;;  %v8959_v50 = vld [vmem:[%s11516_s9 + $0x4b0] ss:$8 sps:$4 sm:$0xff]  }
 0x330   : > { %8574 = vmatpush3.bf16.msra.mxu1 %v8924_v27  ;;  %8565 = vmatprep.mubr.msk.bf16.mxu1 %vm9464_vm0, %v10323_v17  ;;  %v8956_v27 = vld [vmem:[%s11516_s9 + $0xd0] ss:$8 sps:$4 sm:$0xff]  }
 0x331   : > { %8575 = vmatprep.subr.bf16.mxu1 %v10323_v17  ;;  %5557 = vmatpush1.bf16.msra.mxu0 %v8959_v50 }
 0x332   : > { %5558 = vmatprep.subr.bf16.mxu0 %v8967_v40 }
 0x334   : > { %8576 = vmatpush3.bf16.msra.mxu1 %v8925_v38 }
 0x335   : > { %8577 = vmatprep.subr.bf16.mxu1 %v10323_v17  ;;  %5559 = vmatpush1.bf16.msra.mxu0 %v8965_v31 }
 0x337   : > { %8566 = vmatmul.mubr.bf16.gmra.mrb[28].mxu1 %v3761_v45 }
 0x338   : > { %8578 = vmatpush3.bf16.msra.mxu1 %v8926_v47  ;;  %8569 = vmatprep.mubr.msk.bf16.mxu1 %vm9464_vm0, %v10323_v17 }
 0x339   : > { %8579 = vmatprep.subr.bf16.mxu1 %v10323_v17 }
 0x33c   : > { %8580 = vmatpush3.bf16.msra.mxu1 %v8927_v49  ;;  %v8962_v49 = vld [vmem:[%s11516_s9 + $0xe0] ss:$8 sps:$4 sm:$0xff]  }
 0x33d   : > { %8581 = vmatprep.subr.bf16.mxu1 %v10323_v17 }
 0x33f   : > { %8570 = vmatmul.mubr.bf16.gmra.mrb[32].mxu1 %v3762_v7 }
 0x340   : > { %8582 = vmatpush3.bf16.msra.mxu1 %v8928_v52  ;;  %8589 = vmatprep.mubr.msk.bf16.mxu1 %vm9464_vm0, %v10323_v17 }
 0x341   : > { %8583 = vmatprep.subr.bf16.mxu1 %v10323_v17 }
 0x344   : > { %8584 = vmatpush3.bf16.msra.mxu1 %v8929_v35  ;;  %v8970_v35 = vld [vmem:[%s11516_s9 + $0xf4] ss:$8 sps:$4 sm:$0xff]  }
 0x345   : > { %8585 = vmatprep.subr.bf16.mxu1 %v10323_v17 }
 0x348   : > { %8586 = vmatpush3.bf16.msra.mxu1 %v8930_v46  ;;  %v8973_v46 = vld [vmem:[%s11516_s9 + $0x4d4] ss:$8 sps:$4 sm:$0xff]  }
 0x349   : > { %8587 = vmatprep.subr.bf16.mxu1 %v10323_v17  ;;  %5560 = vmatprep.subr.bf16.mxu0 %v8973_v46 }
 0x34a   : > { %5561 = vmatpush1.bf16.msra.mxu0 %v8971_v3 }
 0x34b   : > { %5562 = vmatprep.subr.bf16.mxu0 %v8979_v60 }
 0x34c   : > { %8588 = vmatpush3.bf16.msra.mxu1 %v8931_v56  ;;  %v8968_v56 = vld [vmem:[%s11516_s9 + $0xf0] ss:$8 sps:$4 sm:$0xff]  }
 0x34d   : > { %4295 = vmatprep.subr.bf16.mxu1 %v8934_v9 }
 0x34e   : > { %5563 = vmatpush1.bf16.msra.mxu0 %v8977_v61 }
 0x34f   : > { %8590 = vmatmul.mubr.bf16.vlgmr.msra.gmra.mrb[36].mxu1 %v3899_v59  ;;  %v9465_v59 = vmov 0  }
 0x350   : > { %8593 = vmatprep.mubr.msk.bf16.mxu1 %vm9464_vm0, %v10323_v17  ;;  %5582 = vmatprep.mubr.bf16.mxu0 %v9465_v59 }
 0x357   : > { %8594 = vmatmul.mubr.bf16.gmra.mrb[40].mxu1 %v3900_v18  ;;  %v8985_v18 = vld [vmem:[%s11516_s9 + $0x4f4] ss:$8 sps:$4 sm:$0xff]  }
 0x358   : > { %8597 = vmatprep.mubr.msk.bf16.mxu1 %vm9464_vm0, %v10323_v17  ;;  %v8932_v17 = vld [vmem:[%s11516_s9 + $0x80] ss:$8 sps:$4 sm:$0xff]   ;;  %5564 = vmatprep.subr.bf16.mxu0 %v8985_v18 }
 0x359   : > { %4296 = vmatpush1.bf16.msra.mxu1 %v8932_v17  ;;  %5565 = vmatpush1.bf16.msra.mxu0 %v8983_v62 }
 0x35a   : > { %4297 = vmatprep.subr.bf16.mxu1 %v8937_v58 }
 0x35d   : > { %4298 = vmatpush1.bf16.msra.mxu1 %v8935_v42 }
 0x35e   : > { %4299 = vmatprep.subr.bf16.mxu1 %v8940_v19 }
 0x35f   : > { %8598 = vmatmul.mubr.bf16.gmra.mrb[44].mxu1 %v3901_v0  ;;  %v8991_v0 = vld [vmem:[%s11516_s9 + $0x584] ss:$8 sps:$4 sm:$0xff]  }
 0x360   : > { %4327 = vmatprep.mubr.bf16.mxu1 %v9465_v59  ;;  %5834 = vmatprep.subr.bf16.mxu0 %v8991_v0 }
 0x361   : > { %4300 = vmatpush1.bf16.msra.mxu1 %v8938_v22 }
 0x362   : > { %4301 = vmatprep.subr.bf16.mxu1 %v8946_v6 }
 0x365   : > { %4302 = vmatpush1.bf16.msra.mxu1 %v8944_v11 }
 0x366   : > { %4303 = vmatprep.subr.bf16.mxu1 %v8952_v26 }
 0x369   : > { %4304 = vmatpush1.bf16.msra.mxu1 %v8950_v33 }
 0x36a   : > { %4305 = vmatprep.subr.bf16.mxu1 %v8958_v57 }
 0x36d   : > { %4306 = vmatpush1.bf16.msra.mxu1 %v8956_v27 }
 0x36e   : > { %4307 = vmatprep.subr.bf16.mxu1 %v8964_v44 }
 0x371   : > { %4308 = vmatpush1.bf16.msra.mxu1 %v8962_v49 }
 0x372   : > { %4309 = vmatprep.subr.bf16.mxu1 %v8970_v35 }
 0x375   : > { %4310 = vmatpush1.bf16.msra.mxu1 %v8968_v56 }
 0x376   : > { %4416 = vmatprep.subr.bf16.mxu1 %v8976_v54 }
 0x3ac   : > { %v3624_v63 = vpop.f32.mrb[0].mxu1 }
 0x3ad   : > { %v8507_v43 = vpop.f32.mrb[1].mxu1 }
 0x3ae   : > { %v3627_v1 = vpop.f32.mrb[2].mxu1 }
 0x3af   : > { %v8508_v2 = vpop.f32.mrb[3].mxu1 }
 0x3ce   : > { %v3632_v4 = vpop.f32.mrb[4].mxu1 }
 0x3cf   : > { %v8511_v5 = vpop.f32.mrb[5].mxu1 }
 0x3d0   : > { %v3635_v8 = vpop.f32.mrb[6].mxu1 }
 0x3d1   : > { %v8512_v41 = vpop.f32.mrb[7].mxu1 }
 0x3da   : > { %v3640_v24 = vpop.f32.mrb[8].mxu1 }
 0x3db   : > { %v8515_v30 = vpop.f32.mrb[9].mxu1 }
 0x3dc   : > { %v3643_v16 = vpop.f32.mrb[10].mxu1 }
 0x3dd   : > { %v8516_v13 = vpop.f32.mrb[11].mxu1 }
 0x3e2   : > { %v3728_v14 = vpop.f32.mrb[12].mxu1 }
 0x3e3   : > { %v10454_v15 = vadd.f32 %v3728_v14, %v3624_v63  ;;  %v8535_v21 = vpop.f32.mrb[13].mxu1 }
 0x3e4   : > { %v3731_v20 = vpop.f32.mrb[14].mxu1 }
 0x3e5   : > { %v10462_v36 = vadd.f32 %v3731_v20, %v3627_v1  ;;  %v8536_v29 = vpop.f32.mrb[15].mxu1 }
 0x3ea   : > { %v3736_v10 = vpop.f32.mrb[16].mxu1 }
 0x3eb   : > { %v3737_v28 = vadd.f32 %v3736_v10, %v3632_v4  ;;  %v8539_v51 = vpop.f32.mrb[17].mxu1 }
 0x3ec   : > { %v3739_v48 = vpop.f32.mrb[18].mxu1 }
 0x3ed   : > { %v3740_v34 = vadd.f32 %v3739_v48, %v3635_v8  ;;  %v8540_v39 = vpop.f32.mrb[19].mxu1 }
 0x3f2   : > { %v3744_v38 = vpop.f32.mrb[20].mxu1 }
 0x3f3   : > { %v3745_v47 = vadd.f32 %v3744_v38, %v3640_v24  ;;  %v8543_v45 = vpop.f32.mrb[21].mxu1 }
 0x3f4   : > { %v3747_v52 = vpop.f32.mrb[22].mxu1 }
 0x3f5   : > { %v8544_v7 = vpop.f32.mrb[23].mxu1 }
 0x402   : > { %v3862_v63 = vpop.f32.mrb[24].mxu1 }
 0x403   : > { %v3884_v43 = vadd.f32 %v3862_v63, %v10454_v15  ;;  %v8563_v1 = vpop.f32.mrb[25].mxu1 }
 0x404   : > { %v3865_v2 = vpop.f32.mrb[26].mxu1 }
 0x405   : > { %v3885_v4 = vadd.f32 %v3865_v2, %v10462_v36  ;;  %v8564_v5 = vpop.f32.mrb[27].mxu1 }
 0x40a   : > { %v3870_v8 = vpop.f32.mrb[28].mxu1 }
 0x40b   : > { %v3886_v41 = vadd.f32 %v3870_v8, %v3737_v28  ;;  %v8567_v24 = vpop.f32.mrb[29].mxu1 }
 0x40c   : > { %v3873_v9 = vpop.f32.mrb[30].mxu1 }
 0x40d   : > { %v3887_v30 = vadd.f32 %v3873_v9, %v3740_v34  ;;  %v8568_v17 = vpop.f32.mrb[31].mxu1 }
 0x412   : > { %v3878_v16 = vpop.f32.mrb[32].mxu1 }
 0x413   : > { %v3888_v13 = vadd.f32 %v3878_v16, %v3745_v47  ;;  %v8571_v58 = vpop.f32.mrb[33].mxu1 }
 0x414   : > { %v3881_v42 = vpop.f32.mrb[34].mxu1 }
 0x415   : > { %v8572_v14 = vpop.f32.mrb[35].mxu1 }
 0x422   : > { %v4001_v19 = vpop.f32.mrb[36].mxu1 }
 0x423   : > { %v4023_v15 = vadd.f32 %v4001_v19, %v3884_v43  ;;  %v8591_v21 = vpop.f32.mrb[37].mxu1 }
 0x424   : > { %v4004_v22 = vpop.f32.mrb[38].mxu1 }
 0x425   : > { %v4035_v12 = vadd.f32 %v7336_v55, %v4023_v15  ;;  %v4024_v20 = vadd.f32 %v4004_v22, %v3885_v4  ;;  %v8592_v36 = vpop.f32.mrb[39].mxu1 }
 0x427   : > { %4040 = vst [vmem:[#allocation4] sm:$0xff] %v4035_v12  ;;  %v4036_v29 = vadd.f32 %v7336_v55, %v4024_v20 }
 0x429   : > { %4041 = vst [vmem:[#allocation4 + $0x8] sm:$0xff] %v4036_v29 }
 0x42a   : > { %v4009_v6 = vpop.f32.mrb[40].mxu1 }
 0x42b   : > { %v4025_v32 = vadd.f32 %v4009_v6, %v3886_v41  ;;  %v8595_v11 = vpop.f32.mrb[41].mxu1 }
 0x42c   : > { %v4012_v25 = vpop.f32.mrb[42].mxu1 }
 0x42d   : > { %v4037_v10 = vadd.f32 %v7336_v55, %v4025_v32  ;;  %v4026_v26 = vadd.f32 %v4012_v25, %v3887_v30  ;;  %v8596_v23 = vpop.f32.mrb[43].mxu1 }
 0x42f   : > { %4042 = vst [vmem:[#allocation4 + $0x10] sm:$0xff] %v4037_v10  ;;  %v4038_v28 = vadd.f32 %v7336_v55, %v4026_v26 }
 0x430   : > { %v4045_v51 = vld [vmem:[#allocation4] ss:$2 sm:$0xff]  ;;  %v4051_v33 = vld [vmem:[#allocation4 + $0x1] ss:$2 sm:$0xff] }
 0x431   : > { %4043 = vst [vmem:[#allocation4 + $0x18] sm:$0xff] %v4038_v28  ;;  %v4056_v57 = vmax.f32 %v4045_v51, %v4051_v33 }
 0x432   : > { %v4017_v48 = vpop.f32.mrb[44].mxu1 }
 0x433   : > { %v4027_v53 = vadd.f32 %v4017_v48, %v3888_v13  ;;  %v8599_v34 = vpop.f32.mrb[45].mxu1 }
 0x434   : > { %v4020_v39 = vpop.f32.mrb[46].mxu1 }
 0x435   : > { %v4039_v37 = vadd.f32 %v7336_v55, %v4027_v53  ;;  %v8600_v27 = vpop.f32.mrb[47].mxu1 }
 0x436   : > { %v4060_v50 = vld [vmem:[#allocation4 + $0x2] ss:$2 sm:$0xff]  ;;  %v4069_v44 = vld [vmem:[#allocation4 + $0x3] ss:$2 sm:$0xff] }
 0x437   : > { %v4065_v38 = vmax.f32 %v4056_v57, %v4060_v50  ;;  %4044 = vst [vmem:[#allocation4 + $0x20] sm:$0xf] %v4039_v37 }
 0x438   : > { %v4047_v45 = vld [vmem:[#allocation4 + $0x10] ss:$2 sm:$0xff]  ;;  %v4053_v49 = vld [vmem:[#allocation4 + $0x11] ss:$2 sm:$0xff] }
 0x439   : > { %v10549_v40 = vmax.f32 %v4065_v38, %v4069_v44  ;;  %v4057_v52 = vmax.f32 %v4047_v45, %v4053_v49 }
 0x43b   : > { %v10552_v47 = vmul.f32 0.70710677, %v10549_v40 }
 0x43d   : > { %v4083_v31 = vand.u32 2147483647, %v10552_v47  ;;  %vm4140_vm10 = vcmp.ge.f32.partialorder %v10552_v47, 0.0  ;;  %v7338_v47 = vld [vmem:[%s11515_s8] ss:$0 sm:$0xff] }
 0x43e   : > { %v4049_v7 = vld [vmem:[#allocation4 + $0x20] ss:$2 sm:$0x1]  ;;  %v4055_v35 = vld [vmem:[#allocation4 + $0x21] ss:$2 sm:$0x1] }
 0x43f   : > { %v4086_v46 = vmul.f32 0.3275911, %v4083_v31  ;;  %v4058_v56 = vmax.f32 %v4049_v7, %v4055_v35  ;;  %v4062_v3 = vld [vmem:[#allocation4 + $0x12] ss:$2 sm:$0xff]  ;;  %v4071_v62 = vld [vmem:[#allocation4 + $0x13] ss:$2 sm:$0xff] }
 0x440   : > { %v4064_v54 = vld [vmem:[#allocation4 + $0x22] ss:$2 sm:$0x1]  ;;  %v4066_v60 = vmax.f32 %v4057_v52, %v4062_v3  ;;  %v4073_v0 = vld [vmem:[#allocation4 + $0x23] ss:$2 sm:$0x1] }
 0x441   : > { %v4089_v61 = vadd.f32 1.0, %v4086_v46  ;;  %v4067_v18 = vmax.f32 %v4058_v56, %v4064_v54  ;;  %v4122_v41 = vsub.f32 0.0, %v4083_v31  ;;  %v4077_v46 = vmul.f32 0.5, %v10549_v40 }
 0x442   : > { %v10555_v63 = vmax.f32 %v4066_v60, %v4071_v62  ;;  %v7337_v60 = vld [vmem:[%s11514_s7] ss:$0 sm:$0xff] }
 0x443   : > { %9376 = vrcp.f32 %v4089_v61  ;;  %v10557_v43 = vmax.f32 %v4067_v18, %v4073_v0  ;;  %v4125_v16 = vmul.f32 %v4122_v41, %v4083_v31 }
 0x444   : > { %v10560_v1 = vmul.f32 0.70710677, %v10555_v63 }
 0x445   : > { %v10563_v2 = vmul.f32 0.70710677, %v10557_v43  ;;  %v4128_v42 = vmul.f32 1.442695, %v4125_v16 }
 0x446   : > { %v4084_v4 = vand.u32 2147483647, %v10560_v1  ;;  %vm4141_vm11 = vcmp.ge.f32.partialorder %v10560_v1, 0.0  ;;  %v8974_v1 = vld [vmem:[%s11516_s9] ss:$8 sps:$4 sm:$0xff]  }
 0x447   : > { %v4085_v5 = vand.u32 2147483647, %v10563_v2  ;;  %vm4142_vm12 = vcmp.ge.f32.partialorder %v10563_v2, 0.0 }
 0x448   : > { %v4087_v8 = vmul.f32 0.3275911, %v4084_v4  ;;  %v4123_v19 = vsub.f32 0.0, %v4084_v4 }
 0x449   : > { %v4088_v24 = vmul.f32 0.3275911, %v4085_v5  ;;  %v4124_v55 = vsub.f32 0.0, %v4085_v5 }
 0x44a   : > { %v4090_v9 = vadd.f32 1.0, %v4087_v8  ;;  %v4126_v12 = vmul.f32 %v4123_v19, %v4084_v4 }
 0x44b   : > { %v4091_v30 = vadd.f32 1.0, %v4088_v24  ;;  %v4127_v29 = vmul.f32 %v4124_v55, %v4085_v5 }
 0x44c   : > { %9378 = vrcp.f32 %v4090_v9  ;;  %v4130_v26 = vmul.f32 1.442695, %v4126_v12 }
 0x44d   : > { %v9377_v17 = vpop.eup %9376  ;;  %9380 = vrcp.f32 %v4091_v30  ;;  %v4132_v28 = vmul.f32 1.442695, %v4127_v29  ;;  %v8989_v29 = vld [vmem:[%s11516_s9 + $0x580] ss:$8 sps:$4 sm:$0xff]  }
 0x44e   : > { %v4095_v13 = vmul.f32 1.0614054, %v9377_v17  ;;  %9382 = vpow2.f32 %v4128_v42 }
 0x44f   : > { %9384 = vpow2.f32 %v4130_v26  ;;  %v8995_v26 = vld [vmem:[%s11516_s9 + $0x590] ss:$8 sps:$4 sm:$0xff]  }
 0x450   : > { %v4098_v58 = vadd.f32 -1.4531521, %v4095_v13  ;;  %9386 = vpow2.f32 %v4132_v28  ;;  %v9003_v28 = vld [vmem:[%s11516_s9 + $0x5a4] ss:$8 sps:$4 sm:$0xff]  }
 0x452   : > { %v4101_v14 = vmul.f32 %v9377_v17, %v4098_v58  ;;  %v4079_v58 = vmul.f32 0.5, %v10557_v43  ;;  %v8980_v43 = vld [vmem:[%s11516_s9 + $0x10] ss:$8 sps:$4 sm:$0xff]  }
 0x454   : > { %v4104_v15 = vadd.f32 1.4214138, %v4101_v14 }
 0x456   : > { %v9379_v21 = vpop.eup %9378  ;;  %v4107_v22 = vmul.f32 %v9377_v17, %v4104_v15 }
 0x457   : > { %v9381_v20 = vpop.eup %9380  ;;  %v4096_v36 = vmul.f32 1.0614054, %v9379_v21 }
 0x458   : > { %v4110_v6 = vadd.f32 -0.28449672, %v4107_v22  ;;  %v4097_v32 = vmul.f32 1.0614054, %v9381_v20  ;;  %v9383_v39 = vpop.eup %9382 }
 0x459   : > { %v4099_v11 = vadd.f32 -1.4531521, %v4096_v36  ;;  %v9385_v54 = vpop.eup %9384  ;;  %v8986_v36 = vld [vmem:[%s11516_s9 + $0x20] ss:$8 sps:$4 sm:$0xff]  }
 0x45a   : > { %v4113_v25 = vmul.f32 %v9377_v17, %v4110_v6  ;;  %v4100_v10 = vadd.f32 -1.4531521, %v4097_v32  ;;  %v9387_v18 = vpop.eup %9386  ;;  %v8994_v32 = vld [vmem:[%s11516_s9 + $0x34] ss:$8 sps:$4 sm:$0xff]  }
 0x45b   : > { %v4102_v23 = vmul.f32 %v9379_v21, %v4099_v11 }
 0x45c   : > { %v4116_v51 = vadd.f32 0.2548296, %v4113_v25  ;;  %v4103_v33 = vmul.f32 %v9381_v20, %v4100_v10  ;;  %v8997_v25 = vld [vmem:[%s11516_s9 + $0x594] ss:$8 sps:$4 sm:$0xff]   ;;  %v8992_v10 = vld [vmem:[%s11516_s9 + $0x30] ss:$8 sps:$4 sm:$0xff]  }
 0x45d   : > { %v4105_v48 = vadd.f32 1.4214138, %v4102_v23  ;;  %v9000_v23 = vld [vmem:[%s11516_s9 + $0x44] ss:$8 sps:$4 sm:$0xff]  }
 0x45e   : > { %v4119_v53 = vmul.f32 %v9377_v17, %v4116_v51  ;;  %v4106_v34 = vadd.f32 1.4214138, %v4103_v33  ;;  %v4078_v17 = vmul.f32 0.5, %v10555_v63  ;;  %v8982_v63 = vld [vmem:[%s11516_s9 + $0x14] ss:$8 sps:$4 sm:$0xff]  }
 0x45f   : > { %v4108_v57 = vmul.f32 %v9379_v21, %v4105_v48  ;;  %v8998_v51 = vld [vmem:[%s11516_s9 + $0x40] ss:$8 sps:$4 sm:$0xff]   ;;  %v9006_v48 = vld [vmem:[%s11516_s9 + $0x54] ss:$8 sps:$4 sm:$0xff]  }
 0x460   : > { %v4134_v37 = vmul.f32 %v9383_v39, %v4119_v53  ;;  %v4109_v27 = vmul.f32 %v9381_v20, %v4106_v34  ;;  %v9001_v33 = vld [vmem:[%s11516_s9 + $0x5a0] ss:$8 sps:$4 sm:$0xff]   ;;  %v9009_v53 = vld [vmem:[%s11516_s9 + $0x5b4] ss:$8 sps:$4 sm:$0xff]   ;;  %v9004_v34 = vld [vmem:[%s11516_s9 + $0x50] ss:$8 sps:$4 sm:$0xff]  }
 0x461   : > { %v4111_v50 = vadd.f32 -0.28449672, %v4108_v57  ;;  %v9007_v39 = vld [vmem:[%s11516_s9 + $0x5b0] ss:$8 sps:$4 sm:$0xff]   ;;  %v9012_v57 = vld [vmem:[%s11516_s9 + $0x64] ss:$8 sps:$4 sm:$0xff]  }
 0x462   : > { %v4137_v38 = vsub.f32 1.0, %v4134_v37  ;;  %v4112_v44 = vadd.f32 -0.28449672, %v4109_v27  ;;  %v9015_v37 = vld [vmem:[%s11516_s9 + $0x5c4] ss:$8 sps:$4 sm:$0xff]  }
 0x463   : > { %v4114_v45 = vmul.f32 %v9379_v21, %v4111_v50  ;;  %v9010_v27 = vld [vmem:[%s11516_s9 + $0x60] ss:$8 sps:$4 sm:$0xff]  }
 0x464   : > { %v4143_v49 = vsub.f32 0.0, %v4137_v38  ;;  %v4115_v31 = vmul.f32 %v9381_v20, %v4112_v44  ;;  %v9013_v50 = vld [vmem:[%s11516_s9 + $0x5c0] ss:$8 sps:$4 sm:$0xff]   ;;  %v9021_v44 = vld [vmem:[%s11516_s9 + $0x5d4] ss:$8 sps:$4 sm:$0xff]  }
 0x465   : > { %v4117_v52 = vadd.f32 0.2548296, %v4114_v45  ;;  %v9016_v45 = vld [vmem:[%s11516_s9 + $0x70] ss:$8 sps:$4 sm:$0xff]  }
 0x466   : > { %v4146_v7 = vsel %vm4140_vm10, %v4137_v38, %v4143_v49  ;;  %v4118_v35 = vadd.f32 0.2548296, %v4115_v31  ;;  %v9018_v38 = vld [vmem:[%s11516_s9 + $0x74] ss:$8 sps:$4 sm:$0xff]   ;;  %v9019_v49 = vld [vmem:[%s11516_s9 + $0x5d0] ss:$8 sps:$4 sm:$0xff]  }
 0x467   : > { %v4149_v56 = vadd.f32 1.0, %v4146_v7  ;;  %v4120_v3 = vmul.f32 %v9379_v21, %v4117_v52  ;;  %v9024_v31 = vld [vmem:[%s11516_s9 + $0x104] ss:$8 sps:$4 sm:$0xff]  }
 0x468   : > { %v4121_v61 = vmul.f32 %v9381_v20, %v4118_v35  ;;  %v8988_v20 = vld [vmem:[%s11516_s9 + $0x24] ss:$8 sps:$4 sm:$0xff]   ;;  %v9022_v35 = vld [vmem:[%s11516_s9 + $0x100] ss:$8 sps:$4 sm:$0xff]  }
 0x469   : > { %v4152_v62 = vmul.f32 %v4149_v56, %v4077_v46  ;;  %v4135_v0 = vmul.f32 %v9385_v54, %v4120_v3  ;;  %v9027_v7 = vld [vmem:[%s11516_s9 + $0x5e4] ss:$8 sps:$4 sm:$0xff]   ;;  %v9025_v56 = vld [vmem:[%s11516_s9 + $0x5e0] ss:$8 sps:$4 sm:$0xff]   ;;  %v9030_v3 = vld [vmem:[%s11516_s9 + $0x114] ss:$8 sps:$4 sm:$0xff]  }
 0x46a   : > { %v4136_v4 = vmul.f32 %v9387_v18, %v4121_v61  ;;  %v9033_v54 = vld [vmem:[%s11516_s9 + $0x5f4] ss:$8 sps:$4 sm:$0xff]   ;;  %v9031_v61 = vld [vmem:[%s11516_s9 + $0x5f0] ss:$8 sps:$4 sm:$0xff]   ;;  %v9036_v18 = vld [vmem:[%s11516_s9 + $0x124] ss:$8 sps:$4 sm:$0xff]  }
 0x46b   : > { %v4162_v5 = vmul.f32 %v7337_v60, %v4152_v62  ;;  %v4138_v8 = vsub.f32 1.0, %v4135_v0  ;;  %v9039_v62 = vld [vmem:[%s11516_s9 + $0x684] ss:$8 sps:$4 sm:$0xff]  }
 0x46c   : > { %v4139_v41 = vsub.f32 1.0, %v4136_v4  ;;  %v9037_v4 = vld [vmem:[%s11516_s9 + $0x680] ss:$8 sps:$4 sm:$0xff]  }
 0x46d   : > { %v4172_v40 = vadd.f32 %v7338_v47, %v4162_v5  ;;  %v4144_v24 = vsub.f32 0.0, %v4138_v8  ;;  %v9042_v5 = vld [vmem:[%s11516_s9 + $0x134] ss:$8 sps:$4 sm:$0xff]  }
 0x46e   : > { %v4145_v9 = vsub.f32 0.0, %v4139_v41 }
 0x46f   : > { %4175 = vst [vmem:[#allocation5] sm:$0xff] %v4172_v40  ;;  %v4147_v30 = vsel %vm4141_vm11, %v4138_v8, %v4144_v24  ;;  %v9040_v40 = vld [vmem:[%s11516_s9 + $0x130] ss:$8 sps:$4 sm:$0xff]  }
 0x470   : > { %v4148_v16 = vsel %vm4142_vm12, %v4139_v41, %v4145_v9  ;;  %v4150_v13 = vadd.f32 1.0, %v4147_v30  ;;  %v9045_v41 = vld [vmem:[%s11516_s9 + $0x694] ss:$8 sps:$4 sm:$0xff]   ;;  %v9043_v24 = vld [vmem:[%s11516_s9 + $0x690] ss:$8 sps:$4 sm:$0xff]  }
 0x471   : > { %v4151_v42 = vadd.f32 1.0, %v4148_v16  ;;  %v9048_v9 = vld [vmem:[%s11516_s9 + $0x144] ss:$8 sps:$4 sm:$0xff]   ;;  %v9049_v16 = vld [vmem:[%s11516_s9 + $0x6a0] ss:$8 sps:$4 sm:$0xff]  }
 0x472   : > { %v4153_v14 = vmul.f32 %v4150_v13, %v4078_v17  ;;  %v9051_v30 = vld [vmem:[%s11516_s9 + $0x6a4] ss:$8 sps:$4 sm:$0xff]   ;;  %v9046_v17 = vld [vmem:[%s11516_s9 + $0x140] ss:$8 sps:$4 sm:$0xff]   ;;  %v9054_v13 = vld [vmem:[%s11516_s9 + $0x154] ss:$8 sps:$4 sm:$0xff]  }
 0x473   : > { %v4154_v19 = vmul.f32 %v4151_v42, %v4079_v58  ;;  %v9057_v58 = vld [vmem:[%s11516_s9 + $0x6b4] ss:$8 sps:$4 sm:$0xff]   ;;  %v9052_v42 = vld [vmem:[%s11516_s9 + $0x150] ss:$8 sps:$4 sm:$0xff]  }
 0x474   : > { %v4163_v55 = vmul.f32 %v7337_v60, %v4153_v14  ;;  %v9055_v14 = vld [vmem:[%s11516_s9 + $0x6b0] ss:$8 sps:$4 sm:$0xff]  }
 0x475   : > { %v4164_v15 = vmul.f32 %v7337_v60, %v4154_v19  ;;  %v9028_v60 = vld [vmem:[%s11516_s9 + $0x110] ss:$8 sps:$4 sm:$0xff]   ;;  %v9060_v19 = vld [vmem:[%s11516_s9 + $0x164] ss:$8 sps:$4 sm:$0xff]  }
 0x476   : > { %v4173_v21 = vadd.f32 %v7338_v47, %v4163_v55  ;;  %v4196_v22 = vld [vmem:[#allocation5 + $0x1] sm:$0x1]  ;;  %v4178_v52 = vld [vmem:[#allocation5] sm:$0x1]  ;;  %v9063_v55 = vld [vmem:[%s11516_s9 + $0x6c4] ss:$8 sps:$4 sm:$0xff]  }
 0x477   : > { %v4197_v12 = vpack.c.bf16 %v4196_v22, %v4196_v22  ;;  %v4174_v2 = vadd.f32 %v7338_v47, %v4164_v15  ;;  %v4179_v46 = vpack.c.bf16 %v4178_v52, %v4178_v52  ;;  %v9034_v47 = vld [vmem:[%s11516_s9 + $0x120] ss:$8 sps:$4 sm:$0xff]   ;;  %v9069_v22 = vld [vmem:[%s11516_s9 + $0x6d4] ss:$8 sps:$4 sm:$0xff]   ;;  %v9108_v52 = vld [vmem:[%s11516_s9 + $0x1e4] ss:$8 sps:$4 sm:$0xff]  }
 0x478   : > { %4176 = vst [vmem:[#allocation5 + $0x8] sm:$0xff] %v4173_v21  ;;  %v9058_v15 = vld [vmem:[%s11516_s9 + $0x160] ss:$8 sps:$4 sm:$0xff]  }
 0x479   : > { %4328 = vmatmul.mubr.bf16.vlgmr.msra.gmra.mrb[48].mxu1 %v4197_v12  ;;  %4177 = vst [vmem:[#allocation5 + $0x10] sm:$0x1] %v4174_v2  ;;  %v9061_v21 = vld [vmem:[%s11516_s9 + $0x6c0] ss:$8 sps:$4 sm:$0xff]   ;;  %v9064_v12 = vld [vmem:[%s11516_s9 + $0x170] ss:$8 sps:$4 sm:$0xff]  }
 0x47a   : > { %4417 = vmatpush1.bf16.msra.mxu1 %v8974_v1  ;;  %4448 = vmatprep.mubr.bf16.mxu1 %v9465_v59  ;;  %v9066_v1 = vld [vmem:[%s11516_s9 + $0x174] ss:$8 sps:$4 sm:$0xff]   ;;  %v9072_v2 = vld [vmem:[%s11516_s9 + $0x184] ss:$8 sps:$4 sm:$0xff]  }
 0x47b   : > { %4418 = vmatprep.subr.bf16.mxu1 %v8982_v63  ;;  %v9067_v63 = vld [vmem:[%s11516_s9 + $0x6d0] ss:$8 sps:$4 sm:$0xff]  }
 0x47e   : > { %4419 = vmatpush1.bf16.msra.mxu1 %v8980_v43  ;;  %v4457_v43 = vld [vmem:[#allocation5 + $0x2] sm:$0x1] }
 0x47f   : > { %4420 = vmatprep.subr.bf16.mxu1 %v8988_v20  ;;  %v5451_v6 = vld [vmem:[#allocation5 + $0x9] sm:$0x1]  ;;  %v5735_v0 = vld [vmem:[#allocation5 + $0xb] sm:$0x1]  ;;  %v9075_v20 = vld [vmem:[%s11516_s9 + $0x6e4] ss:$8 sps:$4 sm:$0xff]  }
 0x480   : > { %v5452_v11 = vpack.c.bf16 %v5451_v6, %v5451_v6  ;;  %v5736_v8 = vpack.c.bf16 %v5735_v0, %v5735_v0  ;;  %v9073_v6 = vld [vmem:[%s11516_s9 + $0x6e0] ss:$8 sps:$4 sm:$0xff]  }
 0x481   : > { %v9118_v0 = vld [vmem:[%s11516_s9 + $0x200] ss:$8 sps:$4 sm:$0xff]  }
 0x482   : > { %4421 = vmatpush1.bf16.msra.mxu1 %v8986_v36  ;;  %5583 = vmatmul.mubr.bf16.vlgmr.msra.gmra.mrb[56].mxu0 %v5452_v11  ;;  %v9070_v36 = vld [vmem:[%s11516_s9 + $0x180] ss:$8 sps:$4 sm:$0xff]   ;;  %v9081_v11 = vld [vmem:[%s11516_s9 + $0x6f4] ss:$8 sps:$4 sm:$0xff]  }
 0x483   : > { %5835 = vmatpush1.bf16.msra.mxu0 %v8989_v29  ;;  %4422 = vmatprep.subr.bf16.mxu1 %v8994_v32  ;;  %v4458_v29 = vpack.c.bf16 %v4457_v43, %v4457_v43  ;;  %v9078_v32 = vld [vmem:[%s11516_s9 + $0x194] ss:$8 sps:$4 sm:$0xff]  }
 0x484   : > { %5836 = vmatprep.subr.bf16.mxu0 %v8997_v25  ;;  %5866 = vmatprep.mubr.bf16.mxu0 %v9465_v59  ;;  %v9076_v25 = vld [vmem:[%s11516_s9 + $0x190] ss:$8 sps:$4 sm:$0xff]   ;;  %v9153_v43 = vld [vmem:[%s11516_s9 + $0x294] ss:$8 sps:$4 sm:$0xff]  }
 0x486   : > { %4423 = vmatpush1.bf16.msra.mxu1 %v8992_v10  ;;  %v9079_v10 = vld [vmem:[%s11516_s9 + $0x6f0] ss:$8 sps:$4 sm:$0xff]  }
 0x487   : > { %5837 = vmatpush1.bf16.msra.mxu0 %v8995_v26  ;;  %4424 = vmatprep.subr.bf16.mxu1 %v9000_v23  ;;  %v9084_v26 = vld [vmem:[%s11516_s9 + $0x1a4] ss:$8 sps:$4 sm:$0xff]  }
 0x488   : > { %5838 = vmatprep.subr.bf16.mxu0 %v9003_v28  ;;  %v9087_v23 = vld [vmem:[%s11516_s9 + $0x784] ss:$8 sps:$4 sm:$0xff]   ;;  %v6019_v28 = vld [vmem:[#allocation5 + $0xd] sm:$0x1] }
 0x48a   : > { %4425 = vmatpush1.bf16.msra.mxu1 %v8998_v51  ;;  %v9082_v51 = vld [vmem:[%s11516_s9 + $0x1a0] ss:$8 sps:$4 sm:$0xff]  }
 0x48b   : > { %5839 = vmatpush1.bf16.msra.mxu0 %v9001_v33  ;;  %4426 = vmatprep.subr.bf16.mxu1 %v9006_v48  ;;  %v9085_v33 = vld [vmem:[%s11516_s9 + $0x780] ss:$8 sps:$4 sm:$0xff]   ;;  %v9090_v48 = vld [vmem:[%s11516_s9 + $0x1b4] ss:$8 sps:$4 sm:$0xff]  }
 0x48c   : > { %5840 = vmatprep.subr.bf16.mxu0 %v9009_v53  ;;  %v6020_v53 = vpack.c.bf16 %v6019_v28, %v6019_v28  ;;  %v9166_v28 = vld [vmem:[%s11516_s9 + $0x2e0] ss:$8 sps:$4 sm:$0xff]  }
 0x48e   : > { %4427 = vmatpush1.bf16.msra.mxu1 %v9004_v34  ;;  %v9093_v34 = vld [vmem:[%s11516_s9 + $0x794] ss:$8 sps:$4 sm:$0xff]  }
 0x48f   : > { %5841 = vmatpush1.bf16.msra.mxu0 %v9007_v39  ;;  %4428 = vmatprep.subr.bf16.mxu1 %v9012_v57  ;;  %v9088_v39 = vld [vmem:[%s11516_s9 + $0x1b0] ss:$8 sps:$4 sm:$0xff]  }
 0x490   : > { %5842 = vmatprep.subr.bf16.mxu0 %v9015_v37  ;;  %v9091_v57 = vld [vmem:[%s11516_s9 + $0x790] ss:$8 sps:$4 sm:$0xff]   ;;  %v9096_v37 = vld [vmem:[%s11516_s9 + $0x1c4] ss:$8 sps:$4 sm:$0xff]  }
 0x492   : > { %4429 = vmatpush1.bf16.msra.mxu1 %v9010_v27  ;;  %v9099_v27 = vld [vmem:[%s11516_s9 + $0x7a4] ss:$8 sps:$4 sm:$0xff]  }
 0x493   : > { %5843 = vmatpush1.bf16.msra.mxu0 %v9013_v50  ;;  %4430 = vmatprep.subr.bf16.mxu1 %v9018_v38  ;;  %v9094_v50 = vld [vmem:[%s11516_s9 + $0x1c0] ss:$8 sps:$4 sm:$0xff]  }
 0x494   : > { %5844 = vmatprep.subr.bf16.mxu0 %v9021_v44  ;;  %v9097_v38 = vld [vmem:[%s11516_s9 + $0x7a0] ss:$8 sps:$4 sm:$0xff]   ;;  %v9102_v44 = vld [vmem:[%s11516_s9 + $0x1d4] ss:$8 sps:$4 sm:$0xff]  }
 0x496   : > { %4431 = vmatpush1.bf16.msra.mxu1 %v9016_v45  ;;  %v9105_v45 = vld [vmem:[%s11516_s9 + $0x7b4] ss:$8 sps:$4 sm:$0xff]  }
 0x497   : > { %5845 = vmatpush1.bf16.msra.mxu0 %v9019_v49  ;;  %4556 = vmatprep.subr.bf16.mxu1 %v9024_v31  ;;  %v9100_v49 = vld [vmem:[%s11516_s9 + $0x1d0] ss:$8 sps:$4 sm:$0xff]  }
 0x498   : > { %5846 = vmatprep.subr.bf16.mxu0 %v9027_v7  ;;  %v9103_v31 = vld [vmem:[%s11516_s9 + $0x7b0] ss:$8 sps:$4 sm:$0xff]   ;;  %v9111_v7 = vld [vmem:[%s11516_s9 + $0x7c4] ss:$8 sps:$4 sm:$0xff]  }
 0x499   : > { %4449 = vmatmul.mubr.bf16.vlgmr.msra.gmra.mrb[52].mxu1 %v4179_v46  ;;  %v9109_v46 = vld [vmem:[%s11516_s9 + $0x7c0] ss:$8 sps:$4 sm:$0xff]  }
 0x49a   : > { %4557 = vmatpush1.bf16.msra.mxu1 %v9022_v35  ;;  %4588 = vmatprep.mubr.bf16.mxu1 %v9465_v59  ;;  %v9106_v35 = vld [vmem:[%s11516_s9 + $0x1e0] ss:$8 sps:$4 sm:$0xff]  }
 0x49b   : > { %5847 = vmatpush1.bf16.msra.mxu0 %v9025_v56  ;;  %4558 = vmatprep.subr.bf16.mxu1 %v9030_v3  ;;  %v9114_v56 = vld [vmem:[%s11516_s9 + $0x1f4] ss:$8 sps:$4 sm:$0xff]  }
 0x49c   : > { %5848 = vmatprep.subr.bf16.mxu0 %v9033_v54  ;;  %v9117_v3 = vld [vmem:[%s11516_s9 + $0x7d4] ss:$8 sps:$4 sm:$0xff]   ;;  %v9112_v54 = vld [vmem:[%s11516_s9 + $0x1f0] ss:$8 sps:$4 sm:$0xff]  }
 0x49e   : > { %4559 = vmatpush1.bf16.msra.mxu1 %v9028_v60  ;;  %v9115_v60 = vld [vmem:[%s11516_s9 + $0x7d0] ss:$8 sps:$4 sm:$0xff]  }
 0x49f   : > { %5849 = vmatpush1.bf16.msra.mxu0 %v9031_v61  ;;  %4560 = vmatprep.subr.bf16.mxu1 %v9036_v18  ;;  %v9120_v61 = vld [vmem:[%s11516_s9 + $0x204] ss:$8 sps:$4 sm:$0xff]   ;;  %v4599_v18 = vld [vmem:[#allocation5 + $0x3] sm:$0x1] }
 0x4a0   : > { %6118 = vmatprep.subr.bf16.mxu0 %v9039_v62  ;;  %v9123_v62 = vld [vmem:[%s11516_s9 + $0x7e4] ss:$8 sps:$4 sm:$0xff]  }
 0x4a2   : > { %5867 = vmatmul.mubr.bf16.vlgmr.msra.gmra.mrb[60].mxu0 %v5736_v8  ;;  %4561 = vmatpush1.bf16.msra.mxu1 %v9034_v47  ;;  %v4600_v47 = vpack.c.bf16 %v4599_v18, %v4599_v18  ;;  %v9129_v8 = vld [vmem:[%s11516_s9 + $0x7f4] ss:$8 sps:$4 sm:$0xff]  }
 0x4a3   : > { %6119 = vmatpush1.bf16.msra.mxu0 %v9037_v4  ;;  %4562 = vmatprep.subr.bf16.mxu1 %v9042_v5  ;;  %v9121_v4 = vld [vmem:[%s11516_s9 + $0x7e0] ss:$8 sps:$4 sm:$0xff]   ;;  %v9126_v5 = vld [vmem:[%s11516_s9 + $0x214] ss:$8 sps:$4 sm:$0xff]  }
 0x4a4   : > { %6120 = vmatprep.subr.bf16.mxu0 %v9045_v41  ;;  %6150 = vmatprep.mubr.bf16.mxu0 %v9465_v59  ;;  %v9124_v41 = vld [vmem:[%s11516_s9 + $0x210] ss:$8 sps:$4 sm:$0xff]   ;;  %v9201_v18 = vld [vmem:[%s11516_s9 + $0x394] ss:$8 sps:$4 sm:$0xff]  }
 0x4a6   : > { %4563 = vmatpush1.bf16.msra.mxu1 %v9040_v40  ;;  %v9127_v40 = vld [vmem:[%s11516_s9 + $0x7f0] ss:$8 sps:$4 sm:$0xff]  }
 0x4a7   : > { %6121 = vmatpush1.bf16.msra.mxu0 %v9043_v24  ;;  %4564 = vmatprep.subr.bf16.mxu1 %v9048_v9  ;;  %v9132_v24 = vld [vmem:[%s11516_s9 + $0x224] ss:$8 sps:$4 sm:$0xff]   ;;  %v6303_v9 = vld [vmem:[#allocation5 + $0xf] sm:$0x1] }
 0x4a8   : > { %6122 = vmatprep.subr.bf16.mxu0 %v9051_v30  ;;  %v9130_v30 = vld [vmem:[%s11516_s9 + $0x220] ss:$8 sps:$4 sm:$0xff]  }
 0x4aa   : > { %4565 = vmatpush1.bf16.msra.mxu1 %v9046_v17  ;;  %v9135_v17 = vld [vmem:[%s11516_s9 + $0x234] ss:$8 sps:$4 sm:$0xff]  }
 0x4ab   : > { %6123 = vmatpush1.bf16.msra.mxu0 %v9049_v16  ;;  %4566 = vmatprep.subr.bf16.mxu1 %v9054_v13  ;;  %v6304_v16 = vpack.c.bf16 %v6303_v9, %v6303_v9  ;;  %v9133_v13 = vld [vmem:[%s11516_s9 + $0x230] ss:$8 sps:$4 sm:$0xff]   ;;  %v9216_v9 = vld [vmem:[%s11516_s9 + $0x3e4] ss:$8 sps:$4 sm:$0xff]  }
 0x4ac   : > { %6124 = vmatprep.subr.bf16.mxu0 %v9057_v58  ;;  %v9138_v58 = vld [vmem:[%s11516_s9 + $0x244] ss:$8 sps:$4 sm:$0xff]  }
 0x4ae   : > { %4567 = vmatpush1.bf16.msra.mxu1 %v9052_v42  ;;  %v9136_v42 = vld [vmem:[%s11516_s9 + $0x240] ss:$8 sps:$4 sm:$0xff]  }
 0x4af   : > { %6125 = vmatpush1.bf16.msra.mxu0 %v9055_v14  ;;  %4568 = vmatprep.subr.bf16.mxu1 %v9060_v19  ;;  %v9141_v14 = vld [vmem:[%s11516_s9 + $0x254] ss:$8 sps:$4 sm:$0xff]   ;;  %v9139_v19 = vld [vmem:[%s11516_s9 + $0x250] ss:$8 sps:$4 sm:$0xff]  }
 0x4b0   : > { %6126 = vmatprep.subr.bf16.mxu0 %v9063_v55  ;;  %v9144_v55 = vld [vmem:[%s11516_s9 + $0x264] ss:$8 sps:$4 sm:$0xff]  }
 0x4b2   : > { %4569 = vmatpush1.bf16.msra.mxu1 %v9058_v15  ;;  %v9142_v15 = vld [vmem:[%s11516_s9 + $0x260] ss:$8 sps:$4 sm:$0xff]  }
 0x4b3   : > { %6127 = vmatpush1.bf16.msra.mxu0 %v9061_v21  ;;  %4570 = vmatprep.subr.bf16.mxu1 %v9066_v1  ;;  %v9147_v21 = vld [vmem:[%s11516_s9 + $0x274] ss:$8 sps:$4 sm:$0xff]   ;;  %v9145_v1 = vld [vmem:[%s11516_s9 + $0x270] ss:$8 sps:$4 sm:$0xff]  }
 0x4b4   : > { %6128 = vmatprep.subr.bf16.mxu0 %v9069_v22  ;;  %v9150_v22 = vld [vmem:[%s11516_s9 + $0x284] ss:$8 sps:$4 sm:$0xff]  }
 0x4b6   : > { %4571 = vmatpush1.bf16.msra.mxu1 %v9064_v12  ;;  %v4741_v12 = vld [vmem:[#allocation5 + $0x4] sm:$0x1] }
 0x4b7   : > { %6129 = vmatpush1.bf16.msra.mxu0 %v9067_v63  ;;  %4698 = vmatprep.subr.bf16.mxu1 %v9072_v2  ;;  %v9148_v63 = vld [vmem:[%s11516_s9 + $0x280] ss:$8 sps:$4 sm:$0xff]   ;;  %v4742_v2 = vpack.c.bf16 %v4741_v12, %v4741_v12 }
 0x4b8   : > { %6130 = vmatprep.subr.bf16.mxu0 %v9075_v20  ;;  %v9151_v20 = vld [vmem:[%s11516_s9 + $0x290] ss:$8 sps:$4 sm:$0xff]  }
 0x4b9   : > { %4589 = vmatmul.mubr.bf16.vlgmr.msra.gmra.mrb[56].mxu1 %v4458_v29  ;;  %v9154_v29 = vld [vmem:[%s11516_s9 + $0x2a0] ss:$8 sps:$4 sm:$0xff]  }
 0x4ba   : > { %4699 = vmatpush1.bf16.msra.mxu1 %v9070_v36  ;;  %4730 = vmatprep.mubr.bf16.mxu1 %v9465_v59  ;;  %v9156_v36 = vld [vmem:[%s11516_s9 + $0x2a4] ss:$8 sps:$4 sm:$0xff]  }
 0x4bb   : > { %6131 = vmatpush1.bf16.msra.mxu0 %v9073_v6  ;;  %4700 = vmatprep.subr.bf16.mxu1 %v9078_v32  ;;  %v9159_v6 = vld [vmem:[%s11516_s9 + $0x2b4] ss:$8 sps:$4 sm:$0xff]   ;;  %v9157_v32 = vld [vmem:[%s11516_s9 + $0x2b0] ss:$8 sps:$4 sm:$0xff]  }
 0x4bc   : > { %6132 = vmatprep.subr.bf16.mxu0 %v9081_v11  ;;  %v9162_v11 = vld [vmem:[%s11516_s9 + $0x2c4] ss:$8 sps:$4 sm:$0xff]  }
 0x4be   : > { %4701 = vmatpush1.bf16.msra.mxu1 %v9076_v25  ;;  %v9160_v25 = vld [vmem:[%s11516_s9 + $0x2c0] ss:$8 sps:$4 sm:$0xff]  }
 0x4bf   : > { %6133 = vmatpush1.bf16.msra.mxu0 %v9079_v10  ;;  %4702 = vmatprep.subr.bf16.mxu1 %v9084_v26  ;;  %v9165_v10 = vld [vmem:[%s11516_s9 + $0x2d4] ss:$8 sps:$4 sm:$0xff]   ;;  %v9163_v26 = vld [vmem:[%s11516_s9 + $0x2d0] ss:$8 sps:$4 sm:$0xff]  }
 0x4c0   : > { %6402 = vmatprep.subr.bf16.mxu0 %v9087_v23  ;;  %v9168_v23 = vld [vmem:[%s11516_s9 + $0x2e4] ss:$8 sps:$4 sm:$0xff]  }
 0x4c2   : > { %6151 = vmatmul.mubr.bf16.vlgmr.msra.gmra.mrb[64].mxu0 %v6020_v53  ;;  %4703 = vmatpush1.bf16.msra.mxu1 %v9082_v51  ;;  %v9171_v51 = vld [vmem:[%s11516_s9 + $0x2f4] ss:$8 sps:$4 sm:$0xff]  }
 0x4c3   : > { %6403 = vmatpush1.bf16.msra.mxu0 %v9085_v33  ;;  %4704 = vmatprep.subr.bf16.mxu1 %v9090_v48  ;;  %v9169_v33 = vld [vmem:[%s11516_s9 + $0x2f0] ss:$8 sps:$4 sm:$0xff]   ;;  %v9174_v48 = vld [vmem:[%s11516_s9 + $0x304] ss:$8 sps:$4 sm:$0xff]   ;;  %v4883_v53 = vld [vmem:[#allocation5 + $0x5] sm:$0x1] }
 0x4c4   : > { %6404 = vmatprep.subr.bf16.mxu0 %v9093_v34  ;;  %6434 = vmatprep.mubr.bf16.mxu0 %v9465_v59  ;;  %v9172_v34 = vld [vmem:[%s11516_s9 + $0x300] ss:$8 sps:$4 sm:$0xff]  }
 0x4c6   : > { %4705 = vmatpush1.bf16.msra.mxu1 %v9088_v39  ;;  %v4884_v39 = vpack.c.bf16 %v4883_v53, %v4883_v53  ;;  %v9238_v53 = vld [vmem:[%s11516_s9 + $0x460] ss:$8 sps:$4 sm:$0xff]  }
 0x4c7   : > { %6405 = vmatpush1.bf16.msra.mxu0 %v9091_v57  ;;  %4706 = vmatprep.subr.bf16.mxu1 %v9096_v37  ;;  %v9177_v57 = vld [vmem:[%s11516_s9 + $0x314] ss:$8 sps:$4 sm:$0xff]   ;;  %v9175_v37 = vld [vmem:[%s11516_s9 + $0x310] ss:$8 sps:$4 sm:$0xff]  }
 0x4c8   : > { %6406 = vmatprep.subr.bf16.mxu0 %v9099_v27  ;;  %v9180_v27 = vld [vmem:[%s11516_s9 + $0x324] ss:$8 sps:$4 sm:$0xff]  }
 0x4ca   : > { %4707 = vmatpush1.bf16.msra.mxu1 %v9094_v50  ;;  %v9178_v50 = vld [vmem:[%s11516_s9 + $0x320] ss:$8 sps:$4 sm:$0xff]  }
 0x4cb   : > { %6407 = vmatpush1.bf16.msra.mxu0 %v9097_v38  ;;  %4708 = vmatprep.subr.bf16.mxu1 %v9102_v44  ;;  %v9183_v38 = vld [vmem:[%s11516_s9 + $0x334] ss:$8 sps:$4 sm:$0xff]   ;;  %v9181_v44 = vld [vmem:[%s11516_s9 + $0x330] ss:$8 sps:$4 sm:$0xff]  }
 0x4cc   : > { %6408 = vmatprep.subr.bf16.mxu0 %v9105_v45  ;;  %v9186_v45 = vld [vmem:[%s11516_s9 + $0x344] ss:$8 sps:$4 sm:$0xff]  }
 0x4ce   : > { %4709 = vmatpush1.bf16.msra.mxu1 %v9100_v49  ;;  %v9184_v49 = vld [vmem:[%s11516_s9 + $0x340] ss:$8 sps:$4 sm:$0xff]  }
 0x4cf   : > { %6409 = vmatpush1.bf16.msra.mxu0 %v9103_v31  ;;  %4710 = vmatprep.subr.bf16.mxu1 %v9108_v52  ;;  %v9189_v31 = vld [vmem:[%s11516_s9 + $0x354] ss:$8 sps:$4 sm:$0xff]   ;;  %v9187_v52 = vld [vmem:[%s11516_s9 + $0x350] ss:$8 sps:$4 sm:$0xff]  }
 0x4d0   : > { %6410 = vmatprep.subr.bf16.mxu0 %v9111_v7  ;;  %v9192_v7 = vld [vmem:[%s11516_s9 + $0x364] ss:$8 sps:$4 sm:$0xff]  }
 0x4d2   : > { %4711 = vmatpush1.bf16.msra.mxu1 %v9106_v35  ;;  %v9190_v35 = vld [vmem:[%s11516_s9 + $0x360] ss:$8 sps:$4 sm:$0xff]  }
 0x4d3   : > { %6411 = vmatpush1.bf16.msra.mxu0 %v9109_v46  ;;  %4712 = vmatprep.subr.bf16.mxu1 %v9114_v56  ;;  %v9195_v46 = vld [vmem:[%s11516_s9 + $0x374] ss:$8 sps:$4 sm:$0xff]   ;;  %v9193_v56 = vld [vmem:[%s11516_s9 + $0x370] ss:$8 sps:$4 sm:$0xff]  }
 0x4d4   : > { %6412 = vmatprep.subr.bf16.mxu0 %v9117_v3  ;;  %v9198_v3 = vld [vmem:[%s11516_s9 + $0x384] ss:$8 sps:$4 sm:$0xff]  }
 0x4d6   : > { %4713 = vmatpush1.bf16.msra.mxu1 %v9112_v54  ;;  %v5025_v54 = vld [vmem:[#allocation5 + $0x6] sm:$0x1] }
 0x4d7   : > { %6413 = vmatpush1.bf16.msra.mxu0 %v9115_v60  ;;  %4840 = vmatprep.subr.bf16.mxu1 %v9120_v61  ;;  %v9196_v60 = vld [vmem:[%s11516_s9 + $0x380] ss:$8 sps:$4 sm:$0xff]   ;;  %v5026_v61 = vpack.c.bf16 %v5025_v54, %v5025_v54  ;;  %v9258_v54 = vld [vmem:[%s11516_s9 + $0x544] ss:$8 sps:$4 sm:$0xff]  }
 0x4d8   : > { %6414 = vmatprep.subr.bf16.mxu0 %v9123_v62  ;;  %v9199_v62 = vld [vmem:[%s11516_s9 + $0x390] ss:$8 sps:$4 sm:$0xff]  }
 0x4d9   : > { %4731 = vmatmul.mubr.bf16.vlgmr.msra.gmra.mrb[60].mxu1 %v4600_v47  ;;  %v9202_v47 = vld [vmem:[%s11516_s9 + $0x3a0] ss:$8 sps:$4 sm:$0xff]  }
 0x4da   : > { %4841 = vmatpush1.bf16.msra.mxu1 %v9118_v0  ;;  %4872 = vmatprep.mubr.bf16.mxu1 %v9465_v59  ;;  %v9204_v0 = vld [vmem:[%s11516_s9 + $0x3a4] ss:$8 sps:$4 sm:$0xff]  }
 0x4db   : > { %6415 = vmatpush1.bf16.msra.mxu0 %v9121_v4  ;;  %4842 = vmatprep.subr.bf16.mxu1 %v9126_v5  ;;  %v9207_v4 = vld [vmem:[%s11516_s9 + $0x3b4] ss:$8 sps:$4 sm:$0xff]   ;;  %v9205_v5 = vld [vmem:[%s11516_s9 + $0x3b0] ss:$8 sps:$4 sm:$0xff]  }
 0x4dc   : > { %6416 = vmatprep.subr.bf16.mxu0 %v9129_v8  ;;  %v9210_v8 = vld [vmem:[%s11516_s9 + $0x3c4] ss:$8 sps:$4 sm:$0xff]  }
 0x4de   : > { %4843 = vmatpush1.bf16.msra.mxu1 %v9124_v41  ;;  %v9208_v41 = vld [vmem:[%s11516_s9 + $0x3c0] ss:$8 sps:$4 sm:$0xff]  }
 0x4df   : > { %6417 = vmatpush1.bf16.msra.mxu0 %v9127_v40  ;;  %4844 = vmatprep.subr.bf16.mxu1 %v9132_v24  ;;  %v9213_v40 = vld [vmem:[%s11516_s9 + $0x3d4] ss:$8 sps:$4 sm:$0xff]   ;;  %v9211_v24 = vld [vmem:[%s11516_s9 + $0x3d0] ss:$8 sps:$4 sm:$0xff]  }
 0x4e2   : > { %6435 = vmatmul.mubr.bf16.vlgmr.msra.gmra.mrb[68].mxu0 %v6304_v16  ;;  %4845 = vmatpush1.bf16.msra.mxu1 %v9130_v30 }
 0x4e3   : > { %4846 = vmatprep.subr.bf16.mxu1 %v9135_v17 }
 0x4e6   : > { %4847 = vmatpush1.bf16.msra.mxu1 %v9133_v13  ;;  %v9214_v13 = vld [vmem:[%s11516_s9 + $0x3e0] ss:$8 sps:$4 sm:$0xff]  }
 0x4e7   : > { %4848 = vmatprep.subr.bf16.mxu1 %v9138_v58 }
 0x4ea   : > { %4849 = vmatpush1.bf16.msra.mxu1 %v9136_v42  ;;  %v9219_v42 = vld [vmem:[%s11516_s9 + $0x3f4] ss:$8 sps:$4 sm:$0xff]  }
 0x4eb   : > { %4850 = vmatprep.subr.bf16.mxu1 %v9141_v14  ;;  %v9217_v14 = vld [vmem:[%s11516_s9 + $0x3f0] ss:$8 sps:$4 sm:$0xff]  }
 0x4ee   : > { %4851 = vmatpush1.bf16.msra.mxu1 %v9139_v19  ;;  %v9222_v19 = vld [vmem:[%s11516_s9 + $0x404] ss:$8 sps:$4 sm:$0xff]  }
 0x4ef   : > { %4852 = vmatprep.subr.bf16.mxu1 %v9144_v55  ;;  %v5167_v55 = vld [vmem:[#allocation5 + $0x7] sm:$0x1] }
 0x4f0   : > { %v5168_v12 = vpack.c.bf16 %v5167_v55, %v5167_v55 }
 0x4f2   : > { %4853 = vmatpush1.bf16.msra.mxu1 %v9142_v15 }
 0x4f3   : > { %4854 = vmatprep.subr.bf16.mxu1 %v9147_v21 }
 0x4f6   : > { %4855 = vmatpush1.bf16.msra.mxu1 %v9145_v1  ;;  %v9220_v1 = vld [vmem:[%s11516_s9 + $0x400] ss:$8 sps:$4 sm:$0xff]  }
 0x4f7   : > { %4982 = vmatprep.subr.bf16.mxu1 %v9150_v22 }
 0x4f9   : > { %4873 = vmatmul.mubr.bf16.vlgmr.msra.gmra.mrb[64].mxu1 %v4742_v2 }
 0x4fa   : > { %4983 = vmatpush1.bf16.msra.mxu1 %v9148_v63  ;;  %5014 = vmatprep.mubr.bf16.mxu1 %v9465_v59  ;;  %v9225_v63 = vld [vmem:[%s11516_s9 + $0x414] ss:$8 sps:$4 sm:$0xff]  }
 0x4fb   : > { %4984 = vmatprep.subr.bf16.mxu1 %v9153_v43  ;;  %v9223_v43 = vld [vmem:[%s11516_s9 + $0x410] ss:$8 sps:$4 sm:$0xff]  }
 0x4fe   : > { %4985 = vmatpush1.bf16.msra.mxu1 %v9151_v20  ;;  %v9228_v20 = vld [vmem:[%s11516_s9 + $0x424] ss:$8 sps:$4 sm:$0xff]  }
 0x4ff   : > { %4986 = vmatprep.subr.bf16.mxu1 %v9156_v36  ;;  %v9226_v36 = vld [vmem:[%s11516_s9 + $0x420] ss:$8 sps:$4 sm:$0xff]  }
 0x502   : > { %4987 = vmatpush1.bf16.msra.mxu1 %v9154_v29  ;;  %v9231_v29 = vld [vmem:[%s11516_s9 + $0x434] ss:$8 sps:$4 sm:$0xff]  }
 0x503   : > { %4988 = vmatprep.subr.bf16.mxu1 %v9159_v6  ;;  %v9229_v6 = vld [vmem:[%s11516_s9 + $0x430] ss:$8 sps:$4 sm:$0xff]  }
 0x506   : > { %4989 = vmatpush1.bf16.msra.mxu1 %v9157_v32  ;;  %v9234_v32 = vld [vmem:[%s11516_s9 + $0x444] ss:$8 sps:$4 sm:$0xff]  }
 0x507   : > { %4990 = vmatprep.subr.bf16.mxu1 %v9162_v11  ;;  %v9232_v11 = vld [vmem:[%s11516_s9 + $0x440] ss:$8 sps:$4 sm:$0xff]  }
 0x50a   : > { %4991 = vmatpush1.bf16.msra.mxu1 %v9160_v25  ;;  %v9237_v25 = vld [vmem:[%s11516_s9 + $0x454] ss:$8 sps:$4 sm:$0xff]  }
 0x50b   : > { %4992 = vmatprep.subr.bf16.mxu1 %v9165_v10  ;;  %v9235_v10 = vld [vmem:[%s11516_s9 + $0x450] ss:$8 sps:$4 sm:$0xff]  }
 0x50e   : > { %4993 = vmatpush1.bf16.msra.mxu1 %v9163_v26  ;;  %v9240_v26 = vld [vmem:[%s11516_s9 + $0x464] ss:$8 sps:$4 sm:$0xff]  }
 0x50f   : > { %4994 = vmatprep.subr.bf16.mxu1 %v9168_v23 }
 0x512   : > { %4995 = vmatpush1.bf16.msra.mxu1 %v9166_v28 }
 0x513   : > { %4996 = vmatprep.subr.bf16.mxu1 %v9171_v51 }
 0x516   : > { %4997 = vmatpush1.bf16.msra.mxu1 %v9169_v33 }
 0x517   : > { %5124 = vmatprep.subr.bf16.mxu1 %v9174_v48 }
 0x519   : > { %5015 = vmatmul.mubr.bf16.vlgmr.msra.gmra.mrb[68].mxu1 %v4884_v39  ;;  %v9243_v39 = vld [vmem:[%s11516_s9 + $0x474] ss:$8 sps:$4 sm:$0xff]  }
 0x51a   : > { %5125 = vmatpush1.bf16.msra.mxu1 %v9172_v34  ;;  %5156 = vmatprep.mubr.bf16.mxu1 %v9465_v59 }
 0x51b   : > { %5126 = vmatprep.subr.bf16.mxu1 %v9177_v57  ;;  %v9241_v57 = vld [vmem:[%s11516_s9 + $0x470] ss:$8 sps:$4 sm:$0xff]  }
 0x51e   : > { %5127 = vmatpush1.bf16.msra.mxu1 %v9175_v37  ;;  %v9246_v37 = vld [vmem:[%s11516_s9 + $0x504] ss:$8 sps:$4 sm:$0xff]  }
 0x51f   : > { %5128 = vmatprep.subr.bf16.mxu1 %v9180_v27  ;;  %v5309_v27 = vld [vmem:[#allocation5 + $0x8] sm:$0x1] }
 0x522   : > { %5129 = vmatpush1.bf16.msra.mxu1 %v9178_v50 }
 0x523   : > { %5130 = vmatprep.subr.bf16.mxu1 %v9183_v38 }
 0x526   : > { %5131 = vmatpush1.bf16.msra.mxu1 %v9181_v44  ;;  %v9244_v44 = vld [vmem:[%s11516_s9 + $0x500] ss:$8 sps:$4 sm:$0xff]  }
 0x527   : > { %5132 = vmatprep.subr.bf16.mxu1 %v9186_v45 }
 0x52a   : > { %5133 = vmatpush1.bf16.msra.mxu1 %v9184_v49  ;;  %v5310_v49 = vpack.c.bf16 %v5309_v27, %v5309_v27 }
 0x52b   : > { %5134 = vmatprep.subr.bf16.mxu1 %v9189_v31  ;;  %v9249_v31 = vld [vmem:[%s11516_s9 + $0x514] ss:$8 sps:$4 sm:$0xff]  }
 0x52e   : > { %5135 = vmatpush1.bf16.msra.mxu1 %v9187_v52 }
 0x52f   : > { %5136 = vmatprep.subr.bf16.mxu1 %v9192_v7  ;;  %v9247_v7 = vld [vmem:[%s11516_s9 + $0x510] ss:$8 sps:$4 sm:$0xff]  }
 0x532   : > { %5137 = vmatpush1.bf16.msra.mxu1 %v9190_v35  ;;  %v9252_v35 = vld [vmem:[%s11516_s9 + $0x524] ss:$8 sps:$4 sm:$0xff]  }
 0x533   : > { %5138 = vmatprep.subr.bf16.mxu1 %v9195_v46  ;;  %v9250_v46 = vld [vmem:[%s11516_s9 + $0x520] ss:$8 sps:$4 sm:$0xff]  }
 0x536   : > { %5139 = vmatpush1.bf16.msra.mxu1 %v9193_v56  ;;  %v9255_v56 = vld [vmem:[%s11516_s9 + $0x534] ss:$8 sps:$4 sm:$0xff]  }
 0x537   : > { %5266 = vmatprep.subr.bf16.mxu1 %v9198_v3  ;;  %v9253_v3 = vld [vmem:[%s11516_s9 + $0x530] ss:$8 sps:$4 sm:$0xff]  }
 0x539   : > { %5157 = vmatmul.mubr.bf16.vlgmr.msra.gmra.mrb[72].mxu1 %v5026_v61  ;;  %v9261_v61 = vld [vmem:[%s11516_s9 + $0x554] ss:$8 sps:$4 sm:$0xff]  }
 0x53a   : > { %5267 = vmatpush1.bf16.msra.mxu1 %v9196_v60  ;;  %5298 = vmatprep.mubr.bf16.mxu1 %v9465_v59  ;;  %v9256_v60 = vld [vmem:[%s11516_s9 + $0x540] ss:$8 sps:$4 sm:$0xff]  }
 0x53b   : > { %5268 = vmatprep.subr.bf16.mxu1 %v9201_v18  ;;  %v9259_v18 = vld [vmem:[%s11516_s9 + $0x550] ss:$8 sps:$4 sm:$0xff]  }
 0x53e   : > { %5269 = vmatpush1.bf16.msra.mxu1 %v9199_v62  ;;  %v9264_v62 = vld [vmem:[%s11516_s9 + $0x564] ss:$8 sps:$4 sm:$0xff]  }
 0x53f   : > { %5270 = vmatprep.subr.bf16.mxu1 %v9204_v0 }
 0x542   : > { %5271 = vmatpush1.bf16.msra.mxu1 %v9202_v47 }
 0x543   : > { %5272 = vmatprep.subr.bf16.mxu1 %v9207_v4 }
 0x546   : > { %5273 = vmatpush1.bf16.msra.mxu1 %v9205_v5 }
 0x547   : > { %5274 = vmatprep.subr.bf16.mxu1 %v9210_v8 }
 0x54a   : > { %5275 = vmatpush1.bf16.msra.mxu1 %v9208_v41  ;;  %v9262_v41 = vld [vmem:[%s11516_s9 + $0x560] ss:$8 sps:$4 sm:$0xff]  }
 0x54b   : > { %5276 = vmatprep.subr.bf16.mxu1 %v9213_v40 }
 0x54c   : > { %v4329_v30 = vpop.f32.mrb[48].mxu1 }
 0x54d   : > { %v4331_v17 = vpop.f32.mrb[49].mxu1 }
 0x54e   : > { %5277 = vmatpush1.bf16.msra.mxu1 %v9211_v24  ;;  %v4333_v16 = vpop.f32.mrb[50].mxu1  ;;  %v9267_v24 = vld [vmem:[%s11516_s9 + $0x574] ss:$8 sps:$4 sm:$0xff]  }
 0x54f   : > { %v4334_v58 = vpop.f32.mrb[51].mxu1  ;;  %5278 = vmatprep.subr.bf16.mxu1 %v9216_v9  ;;  %v9265_v9 = vld [vmem:[%s11516_s9 + $0x570] ss:$8 sps:$4 sm:$0xff]  }
 0x550   : > { %v9268_v58 = vld [vmem:[%s11516_s9 + $0x600] ss:$8 sps:$4 sm:$0xff]  }
 0x552   : > { %5279 = vmatpush1.bf16.msra.mxu1 %v9214_v13 }
 0x553   : > { %5280 = vmatprep.subr.bf16.mxu1 %v9219_v42 }
 0x555   : > { %v11066_v15 = vpop.f32.mrb[56].mxu0 }
 0x556   : > { %5281 = vmatpush1.bf16.msra.mxu1 %v9217_v14  ;;  %v11068_v21 = vpop.f32.mrb[57].mxu0 }
 0x557   : > { %v5588_v22 = vpop.f32.mrb[58].mxu0  ;;  %5408 = vmatprep.subr.bf16.mxu1 %v9222_v19  ;;  %v9273_v19 = vld [vmem:[%s11516_s9 + $0x614] ss:$8 sps:$4 sm:$0xff]  }
 0x558   : > { %v5589_v2 = vpop.f32.mrb[59].mxu0  ;;  %v9276_v22 = vld [vmem:[%s11516_s9 + $0x624] ss:$8 sps:$4 sm:$0xff]  }
 0x559   : > { %5299 = vmatmul.mubr.bf16.vlgmr.msra.gmra.mrb[76].mxu1 %v5168_v12  ;;  %v9274_v12 = vld [vmem:[%s11516_s9 + $0x620] ss:$8 sps:$4 sm:$0xff]   ;;  %v9277_v2 = vld [vmem:[%s11516_s9 + $0x630] ss:$8 sps:$4 sm:$0xff]  }
 0x55a   : > { %5409 = vmatpush1.bf16.msra.mxu1 %v9220_v1  ;;  %5440 = vmatprep.mubr.bf16.mxu1 %v9465_v59  ;;  %v9271_v1 = vld [vmem:[%s11516_s9 + $0x610] ss:$8 sps:$4 sm:$0xff]  }
 0x55b   : > { %5410 = vmatprep.subr.bf16.mxu1 %v9225_v63  ;;  %v9279_v63 = vld [vmem:[%s11516_s9 + $0x634] ss:$8 sps:$4 sm:$0xff]  }
 0x55e   : > { %5411 = vmatpush1.bf16.msra.mxu1 %v9223_v43  ;;  %v9282_v43 = vld [vmem:[%s11516_s9 + $0x644] ss:$8 sps:$4 sm:$0xff]  }
 0x55f   : > { %5412 = vmatprep.subr.bf16.mxu1 %v9228_v20  ;;  %v9280_v20 = vld [vmem:[%s11516_s9 + $0x640] ss:$8 sps:$4 sm:$0xff]  }
 0x562   : > { %5413 = vmatpush1.bf16.msra.mxu1 %v9226_v36  ;;  %v9285_v36 = vld [vmem:[%s11516_s9 + $0x654] ss:$8 sps:$4 sm:$0xff]  }
 0x563   : > { %5414 = vmatprep.subr.bf16.mxu1 %v9231_v29  ;;  %v9283_v29 = vld [vmem:[%s11516_s9 + $0x650] ss:$8 sps:$4 sm:$0xff]  }
 0x566   : > { %5415 = vmatpush1.bf16.msra.mxu1 %v9229_v6  ;;  %v9288_v6 = vld [vmem:[%s11516_s9 + $0x664] ss:$8 sps:$4 sm:$0xff]  }
 0x567   : > { %5416 = vmatprep.subr.bf16.mxu1 %v9234_v32 }
 0x56a   : > { %5417 = vmatpush1.bf16.msra.mxu1 %v9232_v11 }
 0x56b   : > { %5418 = vmatprep.subr.bf16.mxu1 %v9237_v25 }
 0x56c   : > { %v4450_v23 = vpop.f32.mrb[52].mxu1 }
 0x56d   : > { %v4451_v28 = vadd.f32 %v4450_v23, %v4329_v30  ;;  %v4452_v51 = vpop.f32.mrb[53].mxu1  ;;  %v9270_v30 = vld [vmem:[%s11516_s9 + $0x604] ss:$8 sps:$4 sm:$0xff]   ;;  %v9286_v23 = vld [vmem:[%s11516_s9 + $0x660] ss:$8 sps:$4 sm:$0xff]  }
 0x56e   : > { %v4453_v33 = vadd.f32 %v4452_v51, %v4331_v17  ;;  %v4454_v48 = vpop.f32.mrb[54].mxu1  ;;  %5419 = vmatpush1.bf16.msra.mxu1 %v9235_v10  ;;  %v5593_v17 = vld [vmem:[#allocation5 + $0xa] sm:$0x1]  ;;  %v9291_v51 = vld [vmem:[%s11516_s9 + $0x674] ss:$8 sps:$4 sm:$0xff]  }
 0x56f   : > { %v4455_v34 = vpop.f32.mrb[55].mxu1  ;;  %5420 = vmatprep.subr.bf16.mxu1 %v9240_v26  ;;  %v5594_v14 = vpack.c.bf16 %v5593_v17, %v5593_v17  ;;  %v9294_v48 = vld [vmem:[%s11516_s9 + $0x704] ss:$8 sps:$4 sm:$0xff]   ;;  %v9321_v17 = vld [vmem:[%s11516_s9 + $0x814] ss:$8 sps:$4 sm:$0xff]  }
 0x572   : > { %5421 = vmatpush1.bf16.msra.mxu1 %v9238_v53  ;;  %v5877_v53 = vld [vmem:[#allocation5 + $0xc] sm:$0x1] }
 0x573   : > { %5422 = vmatprep.subr.bf16.mxu1 %v9243_v39  ;;  %v5878_v27 = vpack.c.bf16 %v5877_v53, %v5877_v53 }
 0x575   : > { %v11119_v50 = vpop.f32.mrb[60].mxu0 }
 0x576   : > { %v11121_v38 = vpop.f32.mrb[61].mxu0  ;;  %5423 = vmatpush1.bf16.msra.mxu1 %v9241_v57  ;;  %v9292_v57 = vld [vmem:[%s11516_s9 + $0x700] ss:$8 sps:$4 sm:$0xff]  }
 0x577   : > { %v5872_v45 = vpop.f32.mrb[62].mxu0  ;;  %5692 = vmatprep.subr.bf16.mxu1 %v9246_v37 }
 0x578   : > { %v5873_v52 = vpop.f32.mrb[63].mxu0 }
 0x579   : > { %5441 = vmatmul.mubr.bf16.vlgmr.msra.gmra.mrb[80].mxu1 %v5310_v49  ;;  %v9295_v49 = vld [vmem:[%s11516_s9 + $0x710] ss:$8 sps:$4 sm:$0xff]   ;;  %v9298_v52 = vld [vmem:[%s11516_s9 + $0x720] ss:$8 sps:$4 sm:$0xff]  }
 0x57a   : > { %5693 = vmatpush1.bf16.msra.mxu1 %v9244_v44  ;;  %5724 = vmatprep.mubr.bf16.mxu1 %v9465_v59  ;;  %v9297_v44 = vld [vmem:[%s11516_s9 + $0x714] ss:$8 sps:$4 sm:$0xff]  }
 0x57b   : > { %5694 = vmatprep.subr.bf16.mxu1 %v9249_v31  ;;  %v9300_v31 = vld [vmem:[%s11516_s9 + $0x724] ss:$8 sps:$4 sm:$0xff]  }
 0x57e   : > { %5695 = vmatpush1.bf16.msra.mxu1 %v9247_v7  ;;  %v9303_v7 = vld [vmem:[%s11516_s9 + $0x734] ss:$8 sps:$4 sm:$0xff]  }
 0x57f   : > { %5696 = vmatprep.subr.bf16.mxu1 %v9252_v35  ;;  %v9301_v35 = vld [vmem:[%s11516_s9 + $0x730] ss:$8 sps:$4 sm:$0xff]  }
 0x582   : > { %5697 = vmatpush1.bf16.msra.mxu1 %v9250_v46  ;;  %v9306_v46 = vld [vmem:[%s11516_s9 + $0x744] ss:$8 sps:$4 sm:$0xff]  }
 0x583   : > { %5698 = vmatprep.subr.bf16.mxu1 %v9255_v56  ;;  %v9304_v56 = vld [vmem:[%s11516_s9 + $0x740] ss:$8 sps:$4 sm:$0xff]  }
 0x586   : > { %5699 = vmatpush1.bf16.msra.mxu1 %v9253_v3  ;;  %v9309_v3 = vld [vmem:[%s11516_s9 + $0x754] ss:$8 sps:$4 sm:$0xff]  }
 0x587   : > { %5700 = vmatprep.subr.bf16.mxu1 %v9258_v54  ;;  %v9307_v54 = vld [vmem:[%s11516_s9 + $0x750] ss:$8 sps:$4 sm:$0xff]  }
 0x58a   : > { %5701 = vmatpush1.bf16.msra.mxu1 %v9256_v60  ;;  %v9312_v60 = vld [vmem:[%s11516_s9 + $0x764] ss:$8 sps:$4 sm:$0xff]  }
 0x58b   : > { %5702 = vmatprep.subr.bf16.mxu1 %v9261_v61 }
 0x58c   : > { %v4590_v0 = vpop.f32.mrb[56].mxu1 }
 0x58d   : > { %v4597_v47 = vadd.f32 %v4590_v0, %v4451_v28  ;;  %v4592_v4 = vpop.f32.mrb[57].mxu1 }
 0x58e   : > { %v4598_v5 = vadd.f32 %v4592_v4, %v4453_v33  ;;  %v4594_v8 = vpop.f32.mrb[58].mxu1  ;;  %5703 = vmatpush1.bf16.msra.mxu1 %v9259_v18  ;;  %v9289_v33 = vld [vmem:[%s11516_s9 + $0x670] ss:$8 sps:$4 sm:$0xff]   ;;  %v9310_v4 = vld [vmem:[%s11516_s9 + $0x760] ss:$8 sps:$4 sm:$0xff]  }
 0x58f   : > { %v4595_v40 = vpop.f32.mrb[59].mxu1  ;;  %5704 = vmatprep.subr.bf16.mxu1 %v9264_v62  ;;  %v9315_v8 = vld [vmem:[%s11516_s9 + $0x774] ss:$8 sps:$4 sm:$0xff]  }
 0x590   : > { %v9318_v40 = vld [vmem:[%s11516_s9 + $0x804] ss:$8 sps:$4 sm:$0xff]  }
 0x592   : > { %5705 = vmatpush1.bf16.msra.mxu1 %v9262_v41  ;;  %v9313_v41 = vld [vmem:[%s11516_s9 + $0x770] ss:$8 sps:$4 sm:$0xff]  }
 0x593   : > { %5706 = vmatprep.subr.bf16.mxu1 %v9267_v24  ;;  %v6161_v24 = vld [vmem:[#allocation5 + $0xe] sm:$0x1] }
 0x595   : > { %v11172_v16 = vpop.f32.mrb[64].mxu0 }
 0x596   : > { %v11174_v13 = vpop.f32.mrb[65].mxu0  ;;  %5707 = vmatpush1.bf16.msra.mxu1 %v9265_v9  ;;  %v9316_v9 = vld [vmem:[%s11516_s9 + $0x800] ss:$8 sps:$4 sm:$0xff]  }
 0x597   : > { %v6156_v42 = vpop.f32.mrb[66].mxu0  ;;  %5976 = vmatprep.subr.bf16.mxu1 %v9270_v30  ;;  %v6162_v30 = vpack.c.bf16 %v6161_v24, %v6161_v24 }
 0x598   : > { %v6157_v55 = vpop.f32.mrb[67].mxu0  ;;  %v9324_v42 = vld [vmem:[%s11516_s9 + $0x824] ss:$8 sps:$4 sm:$0xff]  }
 0x599   : > { %5725 = vmatmul.mubr.bf16.vlgmr.msra.gmra.mrb[84].mxu1 %v5594_v14  ;;  %v9322_v14 = vld [vmem:[%s11516_s9 + $0x820] ss:$8 sps:$4 sm:$0xff]   ;;  %v9330_v55 = vld [vmem:[%s11516_s9 + $0x844] ss:$8 sps:$4 sm:$0xff]  }
 0x59a   : > { %5977 = vmatpush1.bf16.msra.mxu1 %v9268_v58  ;;  %6008 = vmatprep.mubr.bf16.mxu1 %v9465_v59  ;;  %v9319_v58 = vld [vmem:[%s11516_s9 + $0x810] ss:$8 sps:$4 sm:$0xff]  }
 0x59b   : > { %5978 = vmatprep.subr.bf16.mxu1 %v9273_v19  ;;  %v9327_v19 = vld [vmem:[%s11516_s9 + $0x834] ss:$8 sps:$4 sm:$0xff]  }
 0x59e   : > { %5979 = vmatpush1.bf16.msra.mxu1 %v9271_v1  ;;  %v9328_v1 = vld [vmem:[%s11516_s9 + $0x840] ss:$8 sps:$4 sm:$0xff]  }
 0x59f   : > { %5980 = vmatprep.subr.bf16.mxu1 %v9276_v22  ;;  %v9333_v22 = vld [vmem:[%s11516_s9 + $0x854] ss:$8 sps:$4 sm:$0xff]  }
 0x5a2   : > { %5981 = vmatpush1.bf16.msra.mxu1 %v9274_v12  ;;  %v9331_v12 = vld [vmem:[%s11516_s9 + $0x850] ss:$8 sps:$4 sm:$0xff]  }
 0x5a3   : > { %5982 = vmatprep.subr.bf16.mxu1 %v9279_v63  ;;  %v9336_v63 = vld [vmem:[%s11516_s9 + $0x864] ss:$8 sps:$4 sm:$0xff]  }
 0x5a6   : > { %5983 = vmatpush1.bf16.msra.mxu1 %v9277_v2 }
 0x5a7   : > { %5984 = vmatprep.subr.bf16.mxu1 %v9282_v43 }
 0x5aa   : > { %5985 = vmatpush1.bf16.msra.mxu1 %v9280_v20 }
 0x5ab   : > { %5986 = vmatprep.subr.bf16.mxu1 %v9285_v36 }
 0x5ac   : > { %v4732_v32 = vpop.f32.mrb[60].mxu1 }
 0x5ad   : > { %v4739_v11 = vadd.f32 %v4732_v32, %v4597_v47  ;;  %v4734_v25 = vpop.f32.mrb[61].mxu1 }
 0x5ae   : > { %v4740_v10 = vadd.f32 %v4734_v25, %v4598_v5  ;;  %v4736_v26 = vpop.f32.mrb[62].mxu1  ;;  %5987 = vmatpush1.bf16.msra.mxu1 %v9283_v29  ;;  %v9337_v25 = vld [vmem:[%s11516_s9 + $0x870] ss:$8 sps:$4 sm:$0xff]  }
 0x5af   : > { %v4737_v28 = vpop.f32.mrb[63].mxu1  ;;  %5988 = vmatprep.subr.bf16.mxu1 %v9288_v6  ;;  %v9334_v6 = vld [vmem:[%s11516_s9 + $0x860] ss:$8 sps:$4 sm:$0xff]  }
 0x5b2   : > { %5989 = vmatpush1.bf16.msra.mxu1 %v9286_v23 }
 0x5b3   : > { %5990 = vmatprep.subr.bf16.mxu1 %v9291_v51 }
 0x5b5   : > { %v11225_v34 = vpop.f32.mrb[68].mxu0 }
 0x5b6   : > { %v11227_v39 = vpop.f32.mrb[69].mxu0  ;;  %5991 = vmatpush1.bf16.msra.mxu1 %v9289_v33 }
 0x5b7   : > { %v6440_v37 = vpop.f32.mrb[70].mxu0  ;;  %6260 = vmatprep.subr.bf16.mxu1 %v9294_v48 }
 0x5b8   : > { %v6441_v45 = vpop.f32.mrb[71].mxu0 }
 0x5b9   : > { %6009 = vmatmul.mubr.bf16.vlgmr.msra.gmra.mrb[88].mxu1 %v5878_v27 }
 0x5ba   : > { %6261 = vmatpush1.bf16.msra.mxu1 %v9292_v57  ;;  %6292 = vmatprep.mubr.bf16.mxu1 %v9465_v59 }
 0x5bb   : > { %6262 = vmatprep.subr.bf16.mxu1 %v9297_v44 }
 0x5be   : > { %6263 = vmatpush1.bf16.msra.mxu1 %v9295_v49 }
 0x5bf   : > { %6264 = vmatprep.subr.bf16.mxu1 %v9300_v31 }
 0x5c2   : > { %6265 = vmatpush1.bf16.msra.mxu1 %v9298_v52 }
 0x5c3   : > { %6266 = vmatprep.subr.bf16.mxu1 %v9303_v7 }
 0x5c6   : > { %6267 = vmatpush1.bf16.msra.mxu1 %v9301_v35 }
 0x5c7   : > { %6268 = vmatprep.subr.bf16.mxu1 %v9306_v46 }
 0x5ca   : > { %6269 = vmatpush1.bf16.msra.mxu1 %v9304_v56 }
 0x5cb   : > { %6270 = vmatprep.subr.bf16.mxu1 %v9309_v3 }
 0x5cc   : > { %v4874_v61 = vpop.f32.mrb[64].mxu1 }
 0x5cd   : > { %v4881_v18 = vadd.f32 %v4874_v61, %v4739_v11  ;;  %v4876_v62 = vpop.f32.mrb[65].mxu1  ;;  %v9339_v11 = vld [vmem:[%s11516_s9 + $0x874] ss:$8 sps:$4 sm:$0xff]  }
 0x5ce   : > { %v4882_v0 = vadd.f32 %v4876_v62, %v4740_v10  ;;  %v4878_v47 = vpop.f32.mrb[66].mxu1  ;;  %6271 = vmatpush1.bf16.msra.mxu1 %v9307_v54  ;;  %v6445_v10 = vld [vmem:[#allocation5 + $0x10] sm:$0x1] }
 0x5cf   : > { %v4879_v5 = vpop.f32.mrb[67].mxu1  ;;  %6272 = vmatprep.subr.bf16.mxu1 %v9312_v60  ;;  %v6446_v26 = vpack.c.bf16 %v6445_v10, %v6445_v10 }
 0x5d2   : > { %6273 = vmatpush1.bf16.msra.mxu1 %v9310_v4 }
 0x5d3   : > { %6274 = vmatprep.subr.bf16.mxu1 %v9315_v8 }
 0x5d6   : > { %6275 = vmatpush1.bf16.msra.mxu1 %v9313_v41 }
 0x5d7   : > { %6544 = vmatprep.subr.bf16.mxu1 %v9318_v40 }
 0x5d9   : > { %6293 = vmatmul.mubr.bf16.vlgmr.msra.gmra.mrb[92].mxu1 %v6162_v30 }
 0x5da   : > { %6545 = vmatpush1.bf16.msra.mxu1 %v9316_v9  ;;  %6576 = vmatprep.mubr.bf16.mxu1 %v9465_v59  ;;  %v9325_v59 = vld [vmem:[%s11516_s9 + $0x830] ss:$8 sps:$4 sm:$0xff]  }
 0x5db   : > { %6546 = vmatprep.subr.bf16.mxu1 %v9321_v17 }
 0x5de   : > { %6547 = vmatpush1.bf16.msra.mxu1 %v9319_v58 }
 0x5df   : > { %6548 = vmatprep.subr.bf16.mxu1 %v9324_v42 }
 0x5e2   : > { %6549 = vmatpush1.bf16.msra.mxu1 %v9322_v14 }
 0x5e3   : > { %6550 = vmatprep.subr.bf16.mxu1 %v9327_v19 }
 0x5e6   : > { %6551 = vmatpush1.bf16.msra.mxu1 %v9325_v59 }
 0x5e7   : > { %6552 = vmatprep.subr.bf16.mxu1 %v9330_v55  ;;  %v6589_v55 = vlaneseq }
 0x5ea   : > { %6553 = vmatpush1.bf16.msra.mxu1 %v9328_v1  ;;  %v6590_v1 = vshrl.u32 %v6589_v55, 7  ;;  %v6692_v55 = vld [vmem:[%s11520_s13 + $0xe8] sm:$0xff] }
 0x5eb   : > { %6554 = vmatprep.subr.bf16.mxu1 %v9333_v22 }
 0x5ec   : > { %v5016_v2 = vpop.f32.mrb[68].mxu1  ;;  %v11332_v22 = vsub.s32 0, %v6590_v1 }
 0x5ed   : > { %v5023_v43 = vadd.f32 %v5016_v2, %v4881_v18  ;;  %v5018_v20 = vpop.f32.mrb[69].mxu1 }
 0x5ee   : > { %v5024_v36 = vadd.f32 %v5018_v20, %v4882_v0  ;;  %v5020_v29 = vpop.f32.mrb[70].mxu1  ;;  %6555 = vmatpush1.bf16.msra.mxu1 %v9331_v12  ;;  %v11337_v12 = vsub.s32 1, %v6590_v1  ;;  %v6675_v1 = vld [vmem:[%s11520_s13 + $0x60] sm:$0xff] }
 0x5ef   : > { %v5021_v32 = vpop.f32.mrb[71].mxu1  ;;  %6556 = vmatprep.subr.bf16.mxu1 %v9336_v63 }
 0x5f2   : > { %6557 = vmatpush1.bf16.msra.mxu1 %v9334_v6 }
 0x5f3   : > { %6558 = vmatprep.subr.bf16.mxu1 %v9339_v11 }
 0x5f6   : > { %6559 = vmatpush1.bf16.msra.mxu1 %v9337_v25 }
 0x5f9   : > { %6577 = vmatmul.mubr.bf16.vlgmr.msra.gmra.mrb[96].mxu1 %v6446_v26 }
 0x60c   : > { %v5158_v23 = vpop.f32.mrb[72].mxu1 }
 0x60d   : > { %v5165_v28 = vadd.f32 %v5158_v23, %v5023_v43  ;;  %v5160_v51 = vpop.f32.mrb[73].mxu1 }
 0x60e   : > { %v5166_v33 = vadd.f32 %v5160_v51, %v5024_v36  ;;  %v5162_v48 = vpop.f32.mrb[74].mxu1 }
 0x60f   : > { %v5163_v53 = vpop.f32.mrb[75].mxu1 }
 0x62c   : > { %v5300_v57 = vpop.f32.mrb[76].mxu1 }
 0x62d   : > { %v5307_v37 = vadd.f32 %v5300_v57, %v5165_v28  ;;  %v5302_v27 = vpop.f32.mrb[77].mxu1 }
 0x62e   : > { %v5308_v44 = vadd.f32 %v5302_v27, %v5166_v33  ;;  %v5304_v45 = vpop.f32.mrb[78].mxu1  ;;  %v6680_v27 = vld [vmem:[%s11520_s13 + $0x88] sm:$0xff] }
 0x62f   : > { %v5305_v49 = vpop.f32.mrb[79].mxu1  ;;  %v6663_v45 = vld [vmem:[%s11520_s13] sm:$0xff] }
 0x630   : > { %v6664_v49 = vld [vmem:[%s11520_s13 + $0x8] sm:$0xff] }
 0x64c   : > { %v5442_v31 = vpop.f32.mrb[80].mxu1 }
 0x64d   : > { %v5449_v52 = vadd.f32 %v5442_v31, %v5307_v37  ;;  %v5444_v7 = vpop.f32.mrb[81].mxu1  ;;  %v6679_v37 = vld [vmem:[%s11520_s13 + $0x80] sm:$0xff]  ;;  %v8603_v31 = vpack.c.bf16 %v6664_v49, %v6663_v45 }
 0x64e   : > { %v5450_v35 = vadd.f32 %v5444_v7, %v5308_v44  ;;  %v5446_v46 = vpop.f32.mrb[82].mxu1  ;;  %v8601_v44 = vpack.c.bf16 %v6680_v27, %v6679_v37  ;;  %v6682_v7 = vld [vmem:[%s11520_s13 + $0x98] sm:$0xff] }
 0x64f   : > { %v5447_v56 = vpop.f32.mrb[83].mxu1  ;;  %v5591_v3 = vadd.f32 %v11066_v15, %v5449_v52  ;;  %v6681_v52 = vld [vmem:[%s11520_s13 + $0x90] sm:$0xff] }
 0x650   : > { %v5592_v54 = vadd.f32 %v11068_v21, %v5450_v35  ;;  %8602 = vmatprep.subr.bf16.mxu0 %v8601_v44  ;;  %v8605_v35 = vpack.c.bf16 %v6682_v7, %v6681_v52  ;;  %v6665_v46 = vld [vmem:[%s11520_s13 + $0x10] sm:$0xff]  ;;  %v6666_v56 = vld [vmem:[%s11520_s13 + $0x18] sm:$0xff] }
 0x651   : > { %8604 = vmatpush3.bf16.msra.mxu0 %v8603_v31 }
 0x652   : > { %8606 = vmatprep.subr.bf16.mxu0 %v8605_v35 }
 0x66c   : > { %v5726_v60 = vpop.f32.mrb[84].mxu1 }
 0x66d   : > { %v5733_v61 = vadd.f32 %v5726_v60, %v5591_v3  ;;  %v5728_v18 = vpop.f32.mrb[85].mxu1  ;;  %v8607_v3 = vpack.c.bf16 %v6666_v56, %v6665_v46  ;;  %v6684_v60 = vld [vmem:[%s11520_s13 + $0xa8] sm:$0xff] }
 0x66e   : > { %v5734_v62 = vadd.f32 %v5728_v18, %v5592_v54  ;;  %v5730_v0 = vpop.f32.mrb[86].mxu1  ;;  %v6683_v54 = vld [vmem:[%s11520_s13 + $0xa0] sm:$0xff] }
 0x66f   : > { %v5731_v47 = vpop.f32.mrb[87].mxu1  ;;  %v5875_v4 = vadd.f32 %v11119_v50, %v5733_v61  ;;  %8608 = vmatpush3.bf16.msra.mxu0 %v8607_v3  ;;  %v8609_v61 = vpack.c.bf16 %v6684_v60, %v6683_v54  ;;  %v6667_v18 = vld [vmem:[%s11520_s13 + $0x20] sm:$0xff] }
 0x670   : > { %v5876_v5 = vadd.f32 %v11121_v38, %v5734_v62  ;;  %v6668_v62 = vld [vmem:[%s11520_s13 + $0x28] sm:$0xff]  ;;  %v6685_v47 = vld [vmem:[%s11520_s13 + $0xb0] sm:$0xff]  ;;  %v6695_v3 = vld [vmem:[%s11521_s14] sm:$0x1] }
 0x671   : > { %v8611_v0 = vpack.c.bf16 %v6668_v62, %v6667_v18  ;;  %8610 = vmatprep.subr.bf16.mxu0 %v8609_v61 }
 0x673   : > { %8612 = vmatpush3.bf16.msra.mxu0 %v8611_v0 }
 0x68c   : > { %v6010_v8 = vpop.f32.mrb[88].mxu1 }
 0x68d   : > { %v6017_v41 = vadd.f32 %v6010_v8, %v5875_v4  ;;  %v6012_v40 = vpop.f32.mrb[89].mxu1  ;;  %v6686_v4 = vld [vmem:[%s11520_s13 + $0xb8] sm:$0xff]  ;;  %v6669_v8 = vld [vmem:[%s11520_s13 + $0x30] sm:$0xff] }
 0x68e   : > { %v6018_v24 = vadd.f32 %v6012_v40, %v5876_v5  ;;  %v6014_v9 = vpop.f32.mrb[90].mxu1  ;;  %v8613_v5 = vpack.c.bf16 %v6686_v4, %v6685_v47 }
 0x68f   : > { %v6015_v30 = vpop.f32.mrb[91].mxu1  ;;  %v6159_v15 = vadd.f32 %v11172_v16, %v6017_v41  ;;  %v6587_v16 = vld [vmem:[%s11517_s10] sm:$0x3]  ;;  %v6670_v41 = vld [vmem:[%s11520_s13 + $0x38] sm:$0xff]  ;;  %v6688_v9 = vld [vmem:[%s11520_s13 + $0xc8] sm:$0xff] }
 0x690   : > { %v6160_v21 = vadd.f32 %v11174_v13, %v6018_v24  ;;  %v6592_v13 = vrot.slane %v6587_v16, %v11332_v22  ;;  %v6596_v2 = vrot.slane %v6587_v16, %v11337_v12  ;;  %v8615_v40 = vpack.c.bf16 %v6670_v41, %v6669_v8  ;;  %8614 = vmatprep.subr.bf16.mxu0 %v8613_v5  ;;  %v6687_v24 = vld [vmem:[%s11520_s13 + $0xc0] sm:$0xff]  ;;  %v6676_v16 = vld [vmem:[%s11520_s13 + $0x68] sm:$0xff] }
 0x691   : > { %v8617_v30 = vpack.c.bf16 %v6688_v9, %v6687_v24 }
 0x692   : > { %8616 = vmatpush3.bf16.msra.mxu0 %v8615_v40 }
 0x693   : > { %8618 = vmatprep.subr.bf16.mxu0 %v8617_v30 }
 0x6ac   : > { %v6294_v17 = vpop.f32.mrb[92].mxu1 }
 0x6ad   : > { %v6301_v58 = vadd.f32 %v6294_v17, %v6159_v15  ;;  %v6296_v42 = vpop.f32.mrb[93].mxu1  ;;  %v6671_v15 = vld [vmem:[%s11520_s13 + $0x40] sm:$0xff] }
 0x6ae   : > { %v6302_v14 = vadd.f32 %v6296_v42, %v6160_v21  ;;  %v6298_v19 = vpop.f32.mrb[94].mxu1  ;;  %v6672_v21 = vld [vmem:[%s11520_s13 + $0x48] sm:$0xff]  ;;  %v6690_v42 = vld [vmem:[%s11520_s13 + $0xd8] sm:$0xff] }
 0x6af   : > { %v6299_v59 = vpop.f32.mrb[95].mxu1  ;;  %v6443_v50 = vadd.f32 %v11225_v34, %v6301_v58  ;;  %v8619_v17 = vpack.c.bf16 %v6672_v21, %v6671_v15  ;;  %v6689_v58 = vld [vmem:[%s11520_s13 + $0xd0] sm:$0xff] }
 0x6b0   : > { %v6444_v38 = vadd.f32 %v11227_v39, %v6302_v14  ;;  %v8621_v14 = vpack.c.bf16 %v6690_v42, %v6689_v58  ;;  %v6673_v19 = vld [vmem:[%s11520_s13 + $0x50] sm:$0xff]  ;;  %v6674_v59 = vld [vmem:[%s11520_s13 + $0x58] sm:$0xff] }
 0x6b1   : > { %8620 = vmatpush3.bf16.msra.mxu0 %v8619_v17 }
 0x6b2   : > { %8622 = vmatprep.subr.bf16.mxu0 %v8621_v14 }
 0x6cc   : > { %v6578_v63 = vpop.f32.mrb[96].mxu1 }
 0x6cd   : > { %v6585_v43 = vadd.f32 %v6578_v63, %v6443_v50  ;;  %v6580_v20 = vpop.f32.mrb[97].mxu1  ;;  %v6691_v50 = vld [vmem:[%s11520_s13 + $0xe0] sm:$0xff]  ;;  %v6693_v63 = vld [vmem:[%s11520_s13 + $0xf0] sm:$0xff] }
 0x6ce   : > { %v6586_v34 = vadd.f32 %v6580_v20, %v6444_v38  ;;  %v6582_v36 = vpop.f32.mrb[98].mxu1  ;;  %v8623_v38 = vpack.c.bf16 %v6674_v59, %v6673_v19 }
 0x6cf   : > { %v6599_v39 = vadd.f32 %v6592_v13, %v6585_v43  ;;  %v6583_v29 = vpop.f32.mrb[99].mxu1  ;;  %v8625_v13 = vpack.c.bf16 %v6692_v55, %v6691_v50  ;;  %v8627_v43 = vpack.c.bf16 %v6676_v16, %v6675_v1  ;;  %v6678_v36 = vld [vmem:[%s11520_s13 + $0x78] sm:$0xff] }
 0x6d0   : > { %v6600_v6 = vadd.f32 %v6596_v2, %v6586_v34  ;;  %v6694_v2 = vld [vmem:[%s11520_s13 + $0xf8] sm:$0xff]  ;;  %8624 = vmatpush3.bf16.msra.mxu0 %v8623_v38  ;;  %v6677_v34 = vld [vmem:[%s11520_s13 + $0x70] sm:$0xff] }
 0x6d1   : > { %v6602_v32 = vsel %vm6601_vm13, %v6599_v39, 0.0  ;;  %8626 = vmatprep.subr.bf16.mxu0 %v8625_v13  ;;  %v8629_v20 = vpack.c.bf16 %v6694_v2, %v6693_v63 }
 0x6d2   : > { %v6603_v11 = vsel %vm6601_vm13, %v6600_v6, 0.0 }
 0x6d3   : > { %v6604_v25 = vadd.f32 %v6603_v11, %v6602_v32  ;;  %v6623_v11 = vld [vmem:[%s11518_s11] sm:$0x3] }
 0x6d4   : > { %8628 = vmatpush3.bf16.msra.mxu0 %v8627_v43 }
 0x6d5   : > { %6605 = vadd.xlane.f32.xlu0 %v6604_v25  ;;  %8630 = vmatprep.subr.bf16.mxu0 %v8629_v20  ;;  %v6637_v25 = vld [vmem:[%s11519_s12] sm:$0x3] }
 0x762   : > { %v6606_v10 = vpop.xlane.xlu0 %6605 }
 0x763   : > { %v6608_v26 = vmul.f32 0.00390625, %v6606_v10  ;;  %v6628_v10 = vrot.slane %v6623_v11, %v11332_v22 }
 0x765   : > { %v11341_v23 = vsub.f32 %v6599_v39, %v6608_v26  ;;  %v11343_v28 = vsub.f32 %v6600_v6, %v6608_v26  ;;  %v8631_v39 = vpack.c.bf16 %v6678_v36, %v6677_v34  ;;  %v6632_v26 = vrot.slane %v6623_v11, %v11337_v12 }
 0x767   : > { %v6611_v51 = vmul.f32 %v11341_v23, %v11341_v23  ;;  %v6612_v33 = vmul.f32 %v11343_v28, %v11343_v28  ;;  %8632 = vmatpush3.bf16.msra.mxu0 %v8631_v39 }
 0x769   : > { %v6613_v48 = vsel %vm6601_vm13, %v6611_v51, 0.0  ;;  %v6614_v53 = vsel %vm6601_vm13, %v6612_v33, 0.0  ;;  %v6642_v33 = vrot.slane %v6637_v25, %v11332_v22 }
 0x76a   : > { %v6615_v57 = vadd.f32 %v6614_v53, %v6613_v48  ;;  %v6646_v48 = vrot.slane %v6637_v25, %v11337_v12 }
 0x76c   : > { %6616 = vadd.xlane.f32.xlu0 %v6615_v57 }
 0x7f9   : > { %v6617_v29 = vpop.xlane.xlu0 %6616 }
 0x7fa   : > { %v6618_v6 = vmul.f32 0.00390625, %v6617_v29 }
 0x7fc   : > { %v6619_v32 = vadd.f32 1e-05, %v6618_v6 }
 0x7fe   : > { %9388 = vrsqrt.f32 %v6619_v32 }
 0x808   : > { %v9389_v51 = vpop.eup %9388 }
 0x809   : > { %v6621_v53 = vmul.f32 %v9389_v51, %v11341_v23  ;;  %v6622_v57 = vmul.f32 %v9389_v51, %v11343_v28 }
 0x80b   : > { %v6635_v37 = vmul.f32 %v6628_v10, %v6621_v53  ;;  %v6636_v27 = vmul.f32 %v6632_v26, %v6622_v57 }
 0x80d   : > { %v6649_v44 = vadd.f32 %v6642_v33, %v6635_v37  ;;  %v6650_v45 = vadd.f32 %v6646_v48, %v6636_v27 }
 0x80f   : > { %v6651_v49 = vsub.f32 0.0, %v6649_v44  ;;  %v6652_v31 = vsub.f32 0.0, %v6650_v45 }
 0x811   : > { %v6653_v52 = vmul.f32 1.442695, %v6651_v49  ;;  %v6655_v7 = vmul.f32 1.442695, %v6652_v31 }
 0x813   : > { %9390 = vpow2.f32 %v6653_v52 }
 0x814   : > { %9392 = vpow2.f32 %v6655_v7 }
 0x81d   : > { %v9391_v35 = vpop.eup %9390 }
 0x81e   : > { %v9393_v22 = vpop.eup %9392  ;;  %v6657_v46 = vadd.f32 1.0, %v9391_v35 }
 0x81f   : > { %v6658_v12 = vadd.f32 1.0, %v9393_v22 }
 0x820   : > { %9394 = vrcp.f32 %v6657_v46 }
 0x821   : > { %9396 = vrcp.f32 %v6658_v12 }
 0x82a   : > { %v9395_v23 = vpop.eup %9394 }
 0x82b   : > { %v9397_v28 = vpop.eup %9396 }
 0x82c   : > { %6760 = vmatprep.mubr.f32.mxu0 %v9397_v28 }
 0x82d   : > { %6761 = vmatmul.mubr.f32.vlgmr.msra.gmra.mrb[72].mxu0 %v9395_v23 }
 0x900   : > { %v8126_v56 = vpop.f32.mrb[72].mxu0 }
 0x901   : > { %v8127_v54 = vpop.f32.mrb[73].mxu0 }
 0x902   : > { %v8128_v60 = vadd.f32 %v8127_v54, %v8126_v56 }
 0x904   : > { %v6763_v61 = vadd.f32 %v8128_v60, %v6695_v3 }
 0x906   : > { %6766 = vst [vmem:[%s486_s27] sm:$0x1] %v6763_v61 }
 0x907   : > { %9412 = shalt.err (!%p9409_p3)
}
 0x908   : > { %s9413_s26 = scalar_lea.hbm %s11465_s29, 16  ;;  %s9417_s24 = scalar_lea.hbm %s11522_s15, 32 }
 0x909   : > { %p9414_p4 = scmp.ne.s32.totalorder %s11465_s29, %s9413_s26  ;;  %p9418_p9 = scmp.lt.u32.totalorder %s11465_s29, %s11522_s15 }
 0x90a   : > { %p9419_p10 = scmp.lt.u32.totalorder %s9417_s24, %s9413_s26  ;;  %p9421_p12 = scmp.lt.u32.totalorder %s9413_s26, %s11465_s29 }
 0x90b   : > { %p9415_p7 = pnand %p9414_p4, %p9585_p5 }
 0x90c   : > { %p9420_p11 = por %p9419_p10, %p9418_p9 }
 0x90d   : > { %p9416_p8 = pneg %p9415_p7 }
 0x90e   : > { %p9422_p13 = por %p9421_p12, %p9420_p11 }
 0x910   : > { %p9423_p0 = pnand %p9422_p13, %p9416_p8 }
 0x912   : > { %9426 = shalt.err (!%p9423_p0)
}
 0x913   : > { %8778 = dma.vmem_to_hbm [thread:$0]  (%p9585_p5), %s11467_s0, 16, %s11465_s29, %s6768_s23  }
 0x914 PF: > { %p8784_p1 = scmp.ge.s32.totalorder %s9461_s21, 2  ;;  %s6792_s16 = sand.u32 1, %s9449_s18  }
 0x915   : > { %s6793_s30 = scalar_lea.sflag [#allocation7], %s6792_s16 }
 0x916   : > { %p8781_p2 = pnand %p8784_p1, %p9589_p6 }
 0x918   : > { %9444 = dma.done.wait (!%p8781_p2), %s6793_s30, 16  }
 0x919   : > { %9446 = vsyncadd (!%p8781_p2), %s6793_s30, 4294967280  ;;  %s11536_s21 = sld [smem:[#allocation10_spill]]  ;;  %s11537_s26 = sld [smem:[#allocation9_spill]] }
 0x91a   : > { %s11538_s20 = sld [smem:[#allocation11_spill]]  ;;  %s11539_s18 = smov %s9453_s19 }
 0x91f   : > { %p25_p3 = scmp.ge.s32.totalorder %s11536_s21, 4   ;;  %s11540_s19 = smov %s11537_s26 }
 0x921   :  { %27 = sbr.rel (!%p25_p3) target bundleno = 5 (0x5), region = 452 }
 0x928   :  { %6797 = vsyncpa [#allocation7], 1 }
 0x929   :  { %6799 = vsyncpa [#allocation7 + $0x1], 1 }

</bundles_post_ra>
